<compile_context>
chip_gen: v7x
topology: tpu7x:2x2x1
jax: 0.10.0
libtpu: 0.0.40
codegen_flags: <defaults>
</compile_context>

<pallas_src>
import jax
import jax.numpy as jnp
from jax.experimental import pallas as pl
from jax.experimental.pallas import tpu as pltpu

# ---------------------------------------------------------------------------
# Model hyper-parameters (small, TPU-friendly sizes consistent with the module)
# ---------------------------------------------------------------------------
N_OBJ = 240         # total proposals across the "batch" (padded to tile inside)
ROI_DIM = 128       # cfg.roi_dim  (obj_dim / in_channels)
EMBED_DIM = 128     # cfg.embed_dim
HIDDEN_DIM = 128    # cfg.hidden_dim
NUM_CLASSES = 32    # len(obj_classes)
POS_IN = 9          # encode_box_info output width
POS_HID = 32        # first Linear in pos_embed
POS_OUT = 128       # second Linear in pos_embed

PACK = 128          # padded class-lane width (>= NUM_CLASSES + 1)
AUX_LANES = 128     # packed (box_info | det_dists | zeros) input width

# Row layout of the single folded weight slab (all sub-blocks 8-row aligned).
W_MAIN_ROWS = ROI_DIM + POS_OUT       # 256  : [x rows | pos rows] -> [pred | fc]
W_AUX_START = W_MAIN_ROWS             # 256  : packed aux weight (pos MLP + e1-folded)
BIAS_ROW = W_AUX_START + AUX_LANES    # 384  : row 384 = [b_pred|b_fc], row 385 = b12
WE2_START = BIAS_ROW + 8              # 392  : obj_embed2 folded into fc_layer
W_ROWS = WE2_START + NUM_CLASSES      # 424


# ---------------------------------------------------------------------------
# Fused kernel: pos-MLP, pred_layer (+argmax), fc_layer + ReLU, packed outputs
# ---------------------------------------------------------------------------
def vtranse_kernel(x_ref, aux_ref, w_ref, packed_ref, edge_ref):
    f32 = jnp.float32
    tn = x_ref.shape[0]

    x = x_ref[...]                                            # [TN, 128]
    aux = aux_ref[...]                                        # [TN, 128] (box|dists|0)

    # --- one matmul gives pre-ReLU pos_embed (lanes 0:128) and
    #     dists @ (obj_embed1.weight @ w_pred_embed) (lanes 128:256)
    aux_out = jnp.dot(aux, w_ref[W_AUX_START:W_AUX_START + AUX_LANES, :],
                      preferred_element_type=f32)             # [TN, 256]
    b12 = w_ref[BIAS_ROW + 1:BIAS_ROW + 2, :POS_OUT]          # [1, 128]
    pos = jnp.maximum(aux_out[:, :POS_OUT] + b12, 0.0)        # [TN, 128]

    # --- shared x / pos contributions to pred_layer (lanes 0:128, classes
    #     zero-padded) and fc_layer (lanes 128:256): single K=256 matmul.
    xpos = jnp.concatenate([x, pos], axis=1)                  # [TN, 256]
    b_all = w_ref[BIAS_ROW:BIAS_ROW + 1, :]                   # [1, 256]
    base = jnp.dot(xpos, w_ref[:W_MAIN_ROWS, :],
                   preferred_element_type=f32) + b_all        # [TN, 256]

    # --- obj_scores = pred_layer(cat(x, obj_embed, pos)); embed1 already folded
    scores = base[:, :PACK] + aux_out[:, PACK:]               # lanes >= C are 0

    # --- obj_preds = argmax over classes 1..C-1, +1 (softmax is monotonic);
    #     reduction kept at 32 lanes.
    col32 = jax.lax.broadcasted_iota(jnp.int32, (tn, NUM_CLASSES), 1)
    valid = col32 >= 1
    masked = jnp.where(valid, scores[:, :NUM_CLASSES], jnp.finfo(f32).min)
    mx = jnp.max(masked, axis=-1, keepdims=True)
    cand = jnp.where(jnp.logical_and(valid, masked == mx), col32, NUM_CLASSES)
    preds = jnp.min(cand, axis=-1, keepdims=True)             # [TN,1], class id (>=1)

    # --- edge_ctx = relu(fc_layer(cat(x, pos, obj_embed2))); embed2 folded into
    #     we2 [32,128]; gathered with a K=32 one-hot matmul.
    onehot = (col32 == preds).astype(f32)                     # [TN, 32]
    we2 = w_ref[WE2_START:WE2_START + NUM_CLASSES, :HIDDEN_DIM]
    edge = base[:, PACK:] + jnp.dot(onehot, we2, preferred_element_type=f32)
    edge_ref[...] = jnp.maximum(edge, 0.0)

    # --- lane-dense packed output: scores in lanes 0:C, preds (as f32) in lane C
    col = jax.lax.broadcasted_iota(jnp.int32, (tn, PACK), 1)
    packed_ref[...] = jnp.where(col == NUM_CLASSES, preds.astype(f32), scores)


# ---------------------------------------------------------------------------
# Chip-aware row tile: v7x has 2 TensorCores -> two parallel 128-row tiles;
# single-TC v5e/v6e prefer one fat 256-row tile (single grid step).
# ---------------------------------------------------------------------------
def _pick_row_tile():
    try:
        kind = jax.devices()[0].device_kind.lower()
    except Exception:
        kind = ""
    return 128 if "7" in kind else 256


# ---------------------------------------------------------------------------
# Wrapper: host-side input packing, BlockSpecs / grid plumbing, output unpacking
# ---------------------------------------------------------------------------
def vtranse_context_forward(x, box_info, det_dists, w_slab, *, tile=None):
    if tile is None:
        tile = _pick_row_tile()
    n = x.shape[0]

    # Pack the two narrow inputs into one lane-dense [N,128] operand.
    aux = jnp.concatenate(
        [box_info, det_dists,
         jnp.zeros((n, AUX_LANES - POS_IN - NUM_CLASSES), x.dtype)], axis=1)

    n_pad = ((n + tile - 1) // tile) * tile
    if n_pad != n:
        pad = n_pad - n
        x = jnp.pad(x, ((0, pad), (0, 0)))
        aux = jnp.pad(aux, ((0, pad), (0, 0)))
    grid = (n_pad // tile,)

    row = lambda d: pl.BlockSpec((tile, d), lambda i: (i, 0))
    # Constant index map -> the pipeline fetches the weight slab once.
    w_spec = pl.BlockSpec(w_slab.shape, lambda i: (0, 0))

    flops = 2 * n_pad * (AUX_LANES * 2 * PACK
                         + (ROI_DIM + POS_OUT) * 2 * PACK
                         + NUM_CLASSES * HIDDEN_DIM)
    bytes_acc = 4 * (n_pad * (ROI_DIM + AUX_LANES + PACK + HIDDEN_DIM) + w_slab.size)

    packed, edge = pl.pallas_call(
        vtranse_kernel,
        grid=grid,
        in_specs=[row(ROI_DIM), row(AUX_LANES), w_spec],
        out_specs=[row(PACK), row(HIDDEN_DIM)],
        out_shape=[
            jax.ShapeDtypeStruct((n_pad, PACK), jnp.float32),
            jax.ShapeDtypeStruct((n_pad, HIDDEN_DIM), jnp.float32),
        ],
        compiler_params=pltpu.CompilerParams(
            dimension_semantics=("parallel",) if grid[0] > 1 else ("arbitrary",)),
        cost_estimate=pl.CostEstimate(
            flops=flops, transcendentals=0, bytes_accessed=bytes_acc),
    )(x, aux, w_slab)

    scores = packed[:n, :NUM_CLASSES]
    preds = packed[:n, NUM_CLASSES].astype(jnp.int32)
    edge = edge[:n]
    # (obj_scores, obj_preds, edge_ctx, None) — matches the PyTorch return.
    return scores, preds, edge, None


# ---------------------------------------------------------------------------
# Deterministic "PyTorch-like" raw parameters (synthetic, no checkpoint)
# ---------------------------------------------------------------------------
def make_params(key):
    ks = jax.random.split(key, 14)
    u = lambda k, shape, s=0.1: jax.random.uniform(k, shape, jnp.float32, -s, s)
    feat = ROI_DIM + EMBED_DIM + POS_OUT
    return dict(
        # pos_embed: Linear(9,32) -> BatchNorm1d(32) -> Linear(32,128) -> ReLU
        w1=u(ks[0], (POS_IN, POS_HID)),
        b1=u(ks[1], (POS_HID,)),
        bn_gamma=1.0 + u(ks[2], (POS_HID,)),
        bn_beta=u(ks[3], (POS_HID,)),
        bn_mean=u(ks[4], (POS_HID,)),
        bn_var=1.0 + jnp.abs(u(ks[5], (POS_HID,))),
        w2=u(ks[6], (POS_HID, POS_OUT)),
        b2=u(ks[7], (POS_OUT,)),
        # obj_embed1 / obj_embed2 weights (GloVe surrogate)
        e1=u(ks[8], (NUM_CLASSES, EMBED_DIM), 0.5),
        e2=u(ks[9], (NUM_CLASSES, EMBED_DIM), 0.5),
        # pred_layer / fc_layer on the concatenated 384-dim representation
        w_pred=u(ks[10], (feat, NUM_CLASSES)),
        b_pred=u(ks[11], (NUM_CLASSES,)),
        w_fc=u(ks[12], (feat, HIDDEN_DIM)),
        b_fc=u(ks[13], (HIDDEN_DIM,)),
    )


# ---------------------------------------------------------------------------
# Host-side algebraic folding of the raw parameters into ONE weight slab
# ---------------------------------------------------------------------------
def fold_params(raw):
    eps = 1e-5
    # Fold eval-mode BN into pos_embed Linear#1, then collapse Linear#1 @ Linear#2.
    scale = raw["bn_gamma"] / jnp.sqrt(raw["bn_var"] + eps)
    w1e = raw["w1"] * scale[None, :]
    b1e = (raw["b1"] - raw["bn_mean"]) * scale + raw["bn_beta"]
    w12 = w1e @ raw["w2"]                           # [9, 128]
    b12 = b1e @ raw["w2"] + raw["b2"]               # [128]

    # Split the big linears by input segment (concat order from the module):
    #   pred_layer input = cat(x, obj_embed1, pos);  fc_layer input = cat(x, pos, obj_embed2)
    wp = raw["w_pred"]
    wf = raw["w_fc"]
    wp_x, wp_e, wp_p = wp[:ROI_DIM], wp[ROI_DIM:ROI_DIM + EMBED_DIM], wp[ROI_DIM + EMBED_DIM:]
    wf_x, wf_p, wf_e = wf[:ROI_DIM], wf[ROI_DIM:ROI_DIM + POS_OUT], wf[ROI_DIM + POS_OUT:]

    wd = raw["e1"] @ wp_e                           # [32, 32]  obj_embed1 folded into pred
    we2 = raw["e2"] @ wf_e                          # [32, 128] obj_embed2 folded into fc

    padc = lambda m: jnp.pad(m, ((0, 0), (0, PACK - m.shape[1])))

    # W_main [256,256]: rows 0:128 = x contribution, rows 128:256 = pos contribution;
    # lanes 0:128 -> pred_layer (classes zero-padded), lanes 128:256 -> fc_layer.
    w_main = jnp.concatenate([
        jnp.concatenate([padc(wp_x), wf_x], axis=1),
        jnp.concatenate([padc(wp_p), wf_p], axis=1),
    ], axis=0)

    # W_aux [128,256]: aux = (box | dists | 0); left half -> pre-ReLU pos_embed,
    # right half -> dists @ wd (class lanes 0:32 of the right half).
    w_aux = jnp.zeros((AUX_LANES, 2 * PACK), jnp.float32)
    w_aux = w_aux.at[:POS_IN, :POS_OUT].set(w12)
    w_aux = w_aux.at[POS_IN:POS_IN + NUM_CLASSES, PACK:PACK + NUM_CLASSES].set(wd)

    # Bias block [8,256]: row 0 = [b_pred(pad)|b_fc], row 1 lanes 0:128 = b12.
    bias_blk = jnp.zeros((8, 2 * PACK), jnp.float32)
    b_all = jnp.concatenate([jnp.pad(raw["b_pred"], (0, PACK - NUM_CLASSES)), raw["b_fc"]])
    bias_blk = bias_blk.at[0].set(b_all)
    bias_blk = bias_blk.at[1, :POS_OUT].set(b12)

    # we2 block [32,256]: lanes 0:128 = we2.
    we2_blk = jnp.zeros((NUM_CLASSES, 2 * PACK), jnp.float32)
    we2_blk = we2_blk.at[:, :HIDDEN_DIM].set(we2)

    w_slab = jnp.concatenate([w_main, w_aux, bias_blk, we2_blk], axis=0)
    assert w_slab.shape == (W_ROWS, 2 * PACK)
    return w_slab


# ---------------------------------------------------------------------------
# Pure-JAX reference mirroring the original (unfolded) module for correctness
# ---------------------------------------------------------------------------
def reference_forward(x, box, dists, raw):
    h = box @ raw["w1"] + raw["b1"]
    h = (h - raw["bn_mean"]) / jnp.sqrt(raw["bn_var"] + 1e-5) * raw["bn_gamma"] + raw["bn_beta"]
    pos = jnp.maximum(h @ raw["w2"] + raw["b2"], 0.0)
    obj_embed = dists @ raw["e1"]
    rep = jnp.concatenate([x, obj_embed, pos], axis=-1)
    scores = rep @ raw["w_pred"] + raw["b_pred"]
    probs = jax.nn.softmax(scores, axis=1)
    preds = jnp.argmax(probs[:, 1:], axis=1).astype(jnp.int32) + 1
    e2 = raw["e2"][preds]
    rep2 = jnp.concatenate([x, pos, e2], axis=-1)
    edge = jnp.maximum(rep2 @ raw["w_fc"] + raw["b_fc"], 0.0)
    return scores, preds, edge


if __name__ == "__main__":
    key = jax.random.PRNGKey(0)
    kx, kb, kd, kp = jax.random.split(key, 4)

    x = jax.random.normal(kx, (N_OBJ, ROI_DIM), jnp.float32)           # RoI features
    box_info = jax.random.uniform(kb, (N_OBJ, POS_IN), jnp.float32)    # encode_box_info(det_result)
    det_dists = jax.nn.softmax(                                        # det_result.dists
        jax.random.normal(kd, (N_OBJ, NUM_CLASSES), jnp.float32), axis=-1)

    raw = make_params(kp)
    w_slab = fold_params(raw)

    scores, preds, edge, _ = jax.block_until_ready(
        vtranse_context_forward(x, box_info, det_dists, w_slab))

    ref_scores, ref_preds, ref_edge = reference_forward(x, box_info, det_dists, raw)
    assert jnp.allclose(scores, ref_scores, atol=1e-4, rtol=1e-4)
    assert jnp.array_equal(preds, ref_preds)
    assert jnp.allclose(edge, ref_edge, atol=1e-4, rtol=1e-4)

    print("KERNEL_OK")
</pallas_src>

<mosaic_0001>
module attributes {stable_mosaic.version = 11 : i64} {
  func.func @vtranse_kernel(%arg0: i32, %arg1: memref<256x128xf32, #tpu.memory_space<vmem>>, %arg2: memref<256x128xf32, #tpu.memory_space<vmem>>, %arg3: memref<424x256xf32, #tpu.memory_space<vmem>>, %arg4: memref<256x128xf32, #tpu.memory_space<vmem>>, %arg5: memref<256x128xf32, #tpu.memory_space<vmem>>) attributes {dimension_semantics = [#tpu.dimension_semantics<arbitrary>], iteration_bounds = array<i64: 1>, scalar_prefetch = 0 : i64, scratch_operands = 0 : i64, tpu.core_type = #tpu.core_type<tc>, window_params = [{transform_indices = @transform_0, window_bounds = array<i64: 256, 128>}, {transform_indices = @transform_1, window_bounds = array<i64: 256, 128>}, {pipeline_mode = #tpu.pipeline_mode<synchronous>, transform_indices = @transform_2, window_bounds = array<i64: 424, 256>}, {transform_indices = @transform_3, window_bounds = array<i64: 256, 128>}, {transform_indices = @transform_4, window_bounds = array<i64: 256, 128>}]} {
    %c0 = arith.constant 0 : index
    %c0_0 = arith.constant 0 : index
    %0 = vector.load %arg1[%c0, %c0_0] : memref<256x128xf32, #tpu.memory_space<vmem>>, vector<256x128xf32>
    %c0_1 = arith.constant 0 : index
    %c0_2 = arith.constant 0 : index
    %1 = vector.load %arg2[%c0_1, %c0_2] : memref<256x128xf32, #tpu.memory_space<vmem>>, vector<256x128xf32>
    %c256 = arith.constant 256 : index
    %c0_3 = arith.constant 0 : index
    %2 = vector.load %arg3[%c256, %c0_3] : memref<424x256xf32, #tpu.memory_space<vmem>>, vector<128x256xf32>
    %cst = arith.constant dense<0.000000e+00> : vector<256x256xf32>
    %3 = tpu.matmul %1, %2, %cst {dimension_numbers = #tpu.dot_dimension_numbers<[1], [0], [0], [1], [0, 0, 1, 1], [], []>} : vector<256x128xf32>, vector<128x256xf32>, vector<256x256xf32> -> vector<256x256xf32>
    %c385 = arith.constant 385 : index
    %c0_4 = arith.constant 0 : index
    %4 = vector.load %arg3[%c385, %c0_4] : memref<424x256xf32, #tpu.memory_space<vmem>>, vector<1x128xf32>
    %5 = vector.extract_strided_slice %3 {offsets = [0, 0], sizes = [256, 128], strides = [1, 1]} : vector<256x256xf32> to vector<256x128xf32>
    %6 = vector.broadcast %4 : vector<1x128xf32> to vector<256x128xf32>
    %7 = arith.addf %5, %6 : vector<256x128xf32>
    %cst_5 = arith.constant 0.000000e+00 : f32
    %8 = vector.broadcast %cst_5 : f32 to vector<256x128xf32>
    %9 = arith.maximumf %7, %8 : vector<256x128xf32>
    %10 = tpu.concatenate %0, %9 in 1 : vector<256x128xf32>, vector<256x128xf32> -> vector<256x256xf32>
    %c384 = arith.constant 384 : index
    %c0_6 = arith.constant 0 : index
    %11 = vector.load %arg3[%c384, %c0_6] : memref<424x256xf32, #tpu.memory_space<vmem>>, vector<1x256xf32>
    %c0_7 = arith.constant 0 : index
    %c0_8 = arith.constant 0 : index
    %12 = vector.load %arg3[%c0_7, %c0_8] : memref<424x256xf32, #tpu.memory_space<vmem>>, vector<256x256xf32>
    %cst_9 = arith.constant dense<0.000000e+00> : vector<256x256xf32>
    %13 = tpu.matmul %10, %12, %cst_9 {dimension_numbers = #tpu.dot_dimension_numbers<[1], [0], [0], [1], [0, 0, 1, 1], [], []>} : vector<256x256xf32>, vector<256x256xf32>, vector<256x256xf32> -> vector<256x256xf32>
    %14 = vector.broadcast %11 : vector<1x256xf32> to vector<256x256xf32>
    %15 = arith.addf %13, %14 : vector<256x256xf32>
    %16 = vector.extract_strided_slice %15 {offsets = [0, 0], sizes = [256, 128], strides = [1, 1]} : vector<256x256xf32> to vector<256x128xf32>
    %17 = vector.extract_strided_slice %3 {offsets = [0, 128], sizes = [256, 128], strides = [1, 1]} : vector<256x256xf32> to vector<256x128xf32>
    %18 = arith.addf %16, %17 : vector<256x128xf32>
    %19 = tpu.iota {dimensions = array<i32: 1>} : vector<256x32xi32>
    %c1_i32 = arith.constant 1 : i32
    %20 = vector.broadcast %c1_i32 : i32 to vector<256x32xi32>
    %21 = arith.cmpi sge, %19, %20 : vector<256x32xi32>
    %22 = vector.extract_strided_slice %18 {offsets = [0, 0], sizes = [256, 32], strides = [1, 1]} : vector<256x128xf32> to vector<256x32xf32>
    %cst_10 = arith.constant -3.40282347E+38 : f32
    %23 = vector.broadcast %cst_10 : f32 to vector<256x32xf32>
    %24 = arith.select %21, %22, %23 : vector<256x32xi1>, vector<256x32xf32>
    %cst_11 = arith.constant dense<0xFF800000> : vector<256xf32>
    %25 = vector.multi_reduction <maximumf>, %24, %cst_11 [1] : vector<256x32xf32> to vector<256xf32>
    %26 = vector.shape_cast %25 : vector<256xf32> to vector<256x1xf32>
    %27 = vector.broadcast %26 : vector<256x1xf32> to vector<256x32xf32>
    %28 = arith.cmpf oeq, %24, %27 : vector<256x32xf32>
    %29 = arith.andi %21, %28 : vector<256x32xi1>
    %c32_i32 = arith.constant 32 : i32
    %30 = vector.broadcast %c32_i32 : i32 to vector<256x32xi32>
    %31 = arith.select %29, %19, %30 : vector<256x32xi1>, vector<256x32xi32>
    %cst_12 = arith.constant dense<2147483647> : vector<256xi32>
    %32 = vector.multi_reduction <minsi>, %31, %cst_12 [1] : vector<256x32xi32> to vector<256xi32>
    %33 = vector.shape_cast %32 : vector<256xi32> to vector<256x1xi32>
    %34 = vector.broadcast %33 : vector<256x1xi32> to vector<256x32xi32>
    %35 = arith.cmpi eq, %19, %34 : vector<256x32xi32>
    %36 = arith.extui %35 : vector<256x32xi1> to vector<256x32xi32>
    %37 = arith.sitofp %36 : vector<256x32xi32> to vector<256x32xf32>
    %c392 = arith.constant 392 : index
    %c0_13 = arith.constant 0 : index
    %38 = vector.load %arg3[%c392, %c0_13] : memref<424x256xf32, #tpu.memory_space<vmem>>, vector<32x128xf32>
    %39 = vector.extract_strided_slice %15 {offsets = [0, 128], sizes = [256, 128], strides = [1, 1]} : vector<256x256xf32> to vector<256x128xf32>
    %cst_14 = arith.constant dense<0.000000e+00> : vector<256x128xf32>
    %40 = tpu.matmul %37, %38, %cst_14 {dimension_numbers = #tpu.dot_dimension_numbers<[1], [0], [0], [1], [0, 0, 1, 1], [], []>} : vector<256x32xf32>, vector<32x128xf32>, vector<256x128xf32> -> vector<256x128xf32>
    %41 = arith.addf %39, %40 : vector<256x128xf32>
    %cst_15 = arith.constant 0.000000e+00 : f32
    %42 = vector.broadcast %cst_15 : f32 to vector<256x128xf32>
    %43 = arith.maximumf %41, %42 : vector<256x128xf32>
    %c0_16 = arith.constant 0 : index
    %c0_17 = arith.constant 0 : index
    %44 = vector.load %arg5[%c0_16, %c0_17] : memref<256x128xf32, #tpu.memory_space<vmem>>, vector<256x128xf32>
    tpu.vector_store %arg5[%c0_16, %c0_17], %43 {strides = array<i32>} : memref<256x128xf32, #tpu.memory_space<vmem>>, vector<256x128xf32>,
    %45 = tpu.iota {dimensions = array<i32: 1>} : vector<256x128xi32>
    %c32_i32_18 = arith.constant 32 : i32
    %46 = vector.broadcast %c32_i32_18 : i32 to vector<256x128xi32>
    %47 = arith.cmpi eq, %45, %46 : vector<256x128xi32>
    %48 = arith.sitofp %33 : vector<256x1xi32> to vector<256x1xf32>
    %49 = vector.shape_cast %48 : vector<256x1xf32> to vector<256x1xf32>
    %50 = vector.broadcast %49 : vector<256x1xf32> to vector<256x128xf32>
    %51 = arith.select %47, %50, %18 : vector<256x128xi1>, vector<256x128xf32>
    %c0_19 = arith.constant 0 : index
    %c0_20 = arith.constant 0 : index
    %52 = vector.load %arg4[%c0_19, %c0_20] : memref<256x128xf32, #tpu.memory_space<vmem>>, vector<256x128xf32>
    tpu.vector_store %arg4[%c0_19, %c0_20], %51 {strides = array<i32>} : memref<256x128xf32, #tpu.memory_space<vmem>>, vector<256x128xf32>,
    return
  }
  func.func @transform_0(%arg0: i32) -> (i32, i32) {
    %c0_i32 = arith.constant 0 : i32
    %c0_i32_0 = arith.constant 0 : i32
    return %arg0, %c0_i32 : i32, i32
  }
  func.func @transform_1(%arg0: i32) -> (i32, i32) {
    %c0_i32 = arith.constant 0 : i32
    %c0_i32_0 = arith.constant 0 : i32
    return %arg0, %c0_i32 : i32, i32
  }
  func.func @transform_2(%arg0: i32) -> (i32, i32) {
    %c0_i32 = arith.constant 0 : i32
    %c0_i32_0 = arith.constant 0 : i32
    %c0_i32_1 = arith.constant 0 : i32
    return %c0_i32, %c0_i32_0 : i32, i32
  }
  func.func @transform_3(%arg0: i32) -> (i32, i32) {
    %c0_i32 = arith.constant 0 : i32
    %c0_i32_0 = arith.constant 0 : i32
    return %arg0, %c0_i32 : i32, i32
  }
  func.func @transform_4(%arg0: i32) -> (i32, i32) {
    %c0_i32 = arith.constant 0 : i32
    %c0_i32_0 = arith.constant 0 : i32
    return %arg0, %c0_i32 : i32, i32
  }
}

</mosaic_0001>

<bundles_post_ra>
// kernel: tpu_custom_call.1
= control target key start
LH: loop header
LB: loop body
LE: loop exit
PB: predicated region body
PF: predicated region fallthrough
CT: control target
= control target key end

     0   :  { %10 = vsyncpa [#allocation3], 0  ;;  %s4064_s0 = inlined_call_operand.hbm [shape: f32[256,128], index: 0, kind: input, shape index: {}]   ;;  %s4065_s1 = inlined_call_operand.hbm [shape: f32[256,128], index: 1, kind: input, shape index: {}]   ;;  %s4066_s2 = inlined_call_operand.hbm [shape: f32[424,256], index: 2, kind: input, shape index: {}]   ;;  %s4067_s3 = inlined_call_operand.hbm [shape: f32[256,128], index: 3, kind: output, shape index: {0}]   ;;  %s4068_s4 = inlined_call_operand.hbm [shape: f32[256,128], index: 4, kind: output, shape index: {1}]  }
   0x1   :  { %11 = vsyncpa [#allocation6], 0 }
   0x2   :  { %12 = vsyncpa [#allocation4], 0 }
   0x3   :  { %13 = vsyncpa [#allocation10], 0  ;;  %s2592_s15 = smov [#allocation5]   ;;  %s2593_s17 = smov [#allocation2]  }
   0x4   :  { %s31_s16 = sshll.u32 %s2592_s15, 4  ;;  %s19_s18 = sshll.u32 %s2593_s17, 4  ;;  %s32_s16 = int_to_ptr.vmem [resolvable:$true] %s31_s16  ;;  %s2627_s18 = int_to_ptr.vmem [resolvable:$true] %s19_s18 }
   0x5   :  { %s2474_s21 = scalar_lea.hbm %s4065_s1, 4096 }
   0x6   :  { %p2475_p0 = scmp.ne.s32.totalorder %s4065_s1, %s2474_s21  ;;  %p2478_p1 = scmp.lt.u32.totalorder %s2474_s21, %s4065_s1 }
   0x8   :  { %p2480_p2 = pnand %p2478_p1, %p2475_p0 }
   0xa   :  { %2483 = shalt.err (!%p2480_p2)
}
   0xb   :  { %s2484_s26 = scalar_lea.vmem %s32_s16, 4096  ;;  %p2489_p4 = scmp.lt.s32.totalorder %s32_s16, %s32_s16 }
   0xc   :  { %p2485_p3 = scmp.ne.s32.totalorder %s32_s16, %s2484_s26  ;;  %p2490_p5 = scmp.lt.s32.totalorder %s2484_s26, %s2484_s26 }
   0xe   :  { %p2491_p6 = por %p2490_p5, %p2489_p4 }
  0x10   :  { %p2492_p7 = pnand %p2491_p6, %p2485_p3 }
  0x12   :  { %2495 = shalt.err (!%p2492_p7)
}
  0x13   :  { %s2594_s27 = smov 128   ;;  %s2595_s28 = smov 8  }
  0x14   :  { %37 = dma.hbm_to_vmem [thread:$0]  %s4065_s1, 4096, %s32_s16, [#allocation6], %s2594_s27, %s2594_s27, %s2595_s28  }
  0x15   :  { %s2496_s7 = scalar_lea.hbm %s4064_s0, 4096 }
  0x16   :  { %p2497_p8 = scmp.ne.s32.totalorder %s4064_s0, %s2496_s7  ;;  %p2500_p9 = scmp.lt.u32.totalorder %s2496_s7, %s4064_s0 }
  0x18   :  { %p2502_p10 = pnand %p2500_p9, %p2497_p8 }
  0x1a   :  { %2505 = shalt.err (!%p2502_p10)
}
  0x1b   :  { %s2506_s12 = scalar_lea.vmem %s2627_s18, 4096  ;;  %p2511_p12 = scmp.lt.s32.totalorder %s2627_s18, %s2627_s18 }
  0x1c   :  { %p2507_p11 = scmp.ne.s32.totalorder %s2627_s18, %s2506_s12  ;;  %p2512_p13 = scmp.lt.s32.totalorder %s2506_s12, %s2506_s12 }
  0x1e   :  { %p2513_p0 = por %p2512_p13, %p2511_p12 }
  0x20   :  { %p2514_p1 = pnand %p2513_p0, %p2507_p11 }
  0x22   :  { %2517 = shalt.err (!%p2514_p1)
}
  0x23   :  { %25 = dma.hbm_to_vmem [thread:$0]  %s4064_s0, 4096, %s2627_s18, [#allocation3], %s2594_s27, %s2594_s27, %s2595_s28  }
  0x24   :  { %s2596_s14 = smov [#allocation7]   ;;  %s2518_s19 = scalar_lea.hbm %s4066_s2, 13568 }
  0x25   :  { %s43_s15 = sshll.u32 %s2596_s14, 4  ;;  %p2519_p2 = scmp.ne.s32.totalorder %s4066_s2, %s2518_s19  ;;  %s44_s15 = int_to_ptr.vmem [resolvable:$true] %s43_s15 }
  0x26   :  { %p2522_p3 = scmp.lt.u32.totalorder %s2518_s19, %s4066_s2 }
  0x28   :  { %p2524_p4 = pnand %p2522_p3, %p2519_p2 }
  0x2a   :  { %2527 = shalt.err (!%p2524_p4)
}
  0x2b   :  { %s2528_s24 = scalar_lea.vmem %s44_s15, 13568  ;;  %p2533_p6 = scmp.lt.s32.totalorder %s44_s15, %s44_s15 }
  0x2c   :  { %p2529_p5 = scmp.ne.s32.totalorder %s44_s15, %s2528_s24  ;;  %p2534_p7 = scmp.lt.s32.totalorder %s2528_s24, %s2528_s24 }
  0x2e   :  { %p2535_p8 = por %p2534_p7, %p2533_p6 }
  0x30   :  { %p2536_p9 = pnand %p2535_p8, %p2529_p5 }
  0x32   :  { %2539 = shalt.err (!%p2536_p9)
}
  0x33   :  { %s2597_s0 = smov 256   ;;  %s2598_s18 = smov 16  }
  0x34   :  { %49 = dma.hbm_to_vmem [thread:$0]  %s4066_s2, 13568, %s44_s15, [#allocation6], %s2597_s0, %s2597_s0, %s2598_s18  }
  0x35   :  { %2584 = dma.done.wait [#allocation3], 4096  }
  0x36   :  { %2585 = vsyncadd [#allocation3], 4294963200 }
  0x37   :  { %2586 = dma.done.wait [#allocation6], 17664  }
  0x38   :  { %2587 = vsyncadd [#allocation6], 4294949632  ;;  %v4069_v0 = vmov 0.0   ;;  %v124_v1 = vld [vmem:[#allocation7 + $0x208] sm:$0xff]  ;;  %v126_v2 = vld [vmem:[#allocation7 + $0x218] sm:$0xff]  ;;  %vm878_vm1 = vcmask 261120  }
  0x39   :  { %219 = vmatprep.mubr.f32.mxu0 %v4069_v0  ;;  %v123_v3 = vld [vmem:[#allocation7 + $0x200] sm:$0xff]  ;;  %v2355_v4 = vpack.c.bf16 %v126_v2, %v124_v1  ;;  %v125_v5 = vld [vmem:[#allocation7 + $0x210] sm:$0xff]  ;;  %v128_v6 = vld [vmem:[#allocation7 + $0x228] sm:$0xff]  ;;  %s2600_s2 = smov [#allocation8]  }
  0x3a   :  { %v130_v7 = vld [vmem:[#allocation7 + $0x238] sm:$0xff]  ;;  %v2357_v8 = vpack.c.bf16 %v125_v5, %v123_v3  ;;  %v127_v10 = vld [vmem:[#allocation7 + $0x220] sm:$0xff]  ;;  %v129_v11 = vld [vmem:[#allocation7 + $0x230] sm:$0xff]  ;;  %s2170_s29 = sshll.u32 %s2600_s2, 4  ;;  %s2171_s29 = int_to_ptr.vmem [resolvable:$true] %s2170_s29 }
  0x3b   :  { %v2359_v9 = vpack.c.bf16 %v130_v7, %v128_v6  ;;  %v132_v12 = vld [vmem:[#allocation7 + $0x248] sm:$0xff]  ;;  %2356 = vmatprep.subr.bf16.mxu0 %v2355_v4  ;;  %v134_v13 = vld [vmem:[#allocation7 + $0x258] sm:$0xff]  ;;  %v2361_v14 = vpack.c.bf16 %v129_v11, %v127_v10  ;;  %v131_v16 = vld [vmem:[#allocation7 + $0x240] sm:$0xff]  ;;  %s2540_s30 = scalar_lea.vmem %s2171_s29, 4096  ;;  %p2545_p11 = scmp.lt.s32.totalorder %s2171_s29, %s2171_s29 }
  0x3c   :  { %2358 = vmatpush1.bf16.msra.mxu0 %v2357_v8  ;;  %v2363_v15 = vpack.c.bf16 %v134_v13, %v132_v12  ;;  %v133_v17 = vld [vmem:[#allocation7 + $0x250] sm:$0xff]  ;;  %v136_v18 = vld [vmem:[#allocation7 + $0x268] sm:$0xff]  ;;  %v138_v19 = vld [vmem:[#allocation7 + $0x278] sm:$0xff]  ;;  %p2541_p10 = scmp.ne.s32.totalorder %s2171_s29, %s2540_s30  ;;  %p2546_p12 = scmp.lt.s32.totalorder %s2540_s30, %s2540_s30 }
  0x3d   :  { %2360 = vmatprep.subr.bf16.mxu0 %v2359_v9  ;;  %v2365_v20 = vpack.c.bf16 %v133_v17, %v131_v16  ;;  %v2367_v21 = vpack.c.bf16 %v138_v19, %v136_v18  ;;  %v135_v22 = vld [vmem:[#allocation7 + $0x260] sm:$0xff]  ;;  %v137_v23 = vld [vmem:[#allocation7 + $0x270] sm:$0xff]  ;;  %v140_v24 = vld [vmem:[#allocation7 + $0x288] sm:$0xff] }
  0x3e   :  { %v142_v25 = vld [vmem:[#allocation7 + $0x298] sm:$0xff]  ;;  %v2369_v26 = vpack.c.bf16 %v137_v23, %v135_v22  ;;  %v139_v28 = vld [vmem:[#allocation7 + $0x280] sm:$0xff]  ;;  %v141_v29 = vld [vmem:[#allocation7 + $0x290] sm:$0xff]  ;;  %p2547_p13 = por %p2546_p12, %p2545_p11 }
  0x3f   :  { %v2371_v27 = vpack.c.bf16 %v142_v25, %v140_v24  ;;  %v144_v30 = vld [vmem:[#allocation7 + $0x2a8] sm:$0xff]  ;;  %v146_v31 = vld [vmem:[#allocation7 + $0x2b8] sm:$0xff]  ;;  %v2373_v32 = vpack.c.bf16 %v141_v29, %v139_v28  ;;  %v143_v34 = vld [vmem:[#allocation7 + $0x2a0] sm:$0xff] }
  0x40   :  { %2362 = vmatpush1.bf16.msra.mxu0 %v2361_v14  ;;  %v2375_v33 = vpack.c.bf16 %v146_v31, %v144_v30  ;;  %v145_v35 = vld [vmem:[#allocation7 + $0x2b0] sm:$0xff]  ;;  %v148_v36 = vld [vmem:[#allocation7 + $0x2c8] sm:$0xff]  ;;  %v150_v37 = vld [vmem:[#allocation7 + $0x2d8] sm:$0xff]  ;;  %p2548_p0 = pnand %p2547_p13, %p2541_p10 }
  0x41   :  { %2364 = vmatprep.subr.bf16.mxu0 %v2363_v15  ;;  %v2377_v38 = vpack.c.bf16 %v145_v35, %v143_v34  ;;  %v2379_v39 = vpack.c.bf16 %v150_v37, %v148_v36  ;;  %v147_v40 = vld [vmem:[#allocation7 + $0x2c0] sm:$0xff]  ;;  %v149_v41 = vld [vmem:[#allocation7 + $0x2d0] sm:$0xff]  ;;  %v152_v42 = vld [vmem:[#allocation7 + $0x2e8] sm:$0xff] }
  0x42   :  { %v154_v43 = vld [vmem:[#allocation7 + $0x2f8] sm:$0xff]  ;;  %v2381_v44 = vpack.c.bf16 %v149_v41, %v147_v40  ;;  %v151_v46 = vld [vmem:[#allocation7 + $0x2e0] sm:$0xff]  ;;  %v153_v47 = vld [vmem:[#allocation7 + $0x2f0] sm:$0xff] }
  0x43   :  { %v2383_v45 = vpack.c.bf16 %v154_v43, %v152_v42  ;;  %v2385_v48 = vpack.c.bf16 %v153_v47, %v151_v46  ;;  %v91_v49 = vld [vmem:[#allocation5] sm:$0xff]  ;;  %v480_v50 = vld [vmem:[#allocation7 + $0x8] sm:$0xff]  ;;  %v482_v51 = vld [vmem:[#allocation7 + $0x18] sm:$0xff] }
  0x44   :  { %2366 = vmatpush1.bf16.msra.mxu0 %v2365_v20  ;;  %v479_v52 = vld [vmem:[#allocation7] sm:$0xff]  ;;  %v2387_v53 = vpack.c.bf16 %v482_v51, %v480_v50  ;;  %v481_v54 = vld [vmem:[#allocation7 + $0x10] sm:$0xff]  ;;  %v484_v55 = vld [vmem:[#allocation7 + $0x28] sm:$0xff] }
  0x45   :  { %2368 = vmatprep.subr.bf16.mxu0 %v2367_v21  ;;  %v486_v56 = vld [vmem:[#allocation7 + $0x38] sm:$0xff]  ;;  %v2389_v57 = vpack.c.bf16 %v481_v54, %v479_v52  ;;  %v483_v59 = vld [vmem:[#allocation7 + $0x20] sm:$0xff]  ;;  %v485_v60 = vld [vmem:[#allocation7 + $0x30] sm:$0xff] }
  0x46   :  { %v2391_v58 = vpack.c.bf16 %v486_v56, %v484_v55  ;;  %v488_v61 = vld [vmem:[#allocation7 + $0x48] sm:$0xff]  ;;  %2388 = vmatprep.subr.bf16.mxu1 %v2387_v53  ;;  %v490_v62 = vld [vmem:[#allocation7 + $0x58] sm:$0xff]  ;;  %v2393_v63 = vpack.c.bf16 %v485_v60, %v483_v59  ;;  %v487_v3 = vld [vmem:[#allocation7 + $0x40] sm:$0xff] }
  0x47   :  { %2390 = vmatpush1.bf16.msra.mxu1 %v2389_v57  ;;  %v92_v1 = vld [vmem:[#allocation5 + $0x8] sm:$0xff]  ;;  %v2395_v2 = vpack.c.bf16 %v490_v62, %v488_v61  ;;  %v489_v4 = vld [vmem:[#allocation7 + $0x50] sm:$0xff]  ;;  %v494_v6 = vld [vmem:[#allocation7 + $0x78] sm:$0xff] }
  0x48   :  { %2370 = vmatpush1.bf16.msra.mxu0 %v2369_v26  ;;  %2392 = vmatprep.subr.bf16.mxu1 %v2391_v58  ;;  %v492_v5 = vld [vmem:[#allocation7 + $0x68] sm:$0xff]  ;;  %v2397_v7 = vpack.c.bf16 %v489_v4, %v487_v3  ;;  %v93_v8 = vld [vmem:[#allocation5 + $0x10] sm:$0xff]  ;;  %v491_v10 = vld [vmem:[#allocation7 + $0x60] sm:$0xff] }
  0x49   :  { %2372 = vmatprep.subr.bf16.mxu0 %v2371_v27  ;;  %v2399_v9 = vpack.c.bf16 %v494_v6, %v492_v5  ;;  %v493_v11 = vld [vmem:[#allocation7 + $0x70] sm:$0xff]  ;;  %v496_v12 = vld [vmem:[#allocation7 + $0x88] sm:$0xff]  ;;  %v498_v13 = vld [vmem:[#allocation7 + $0x98] sm:$0xff] }
  0x4a   :  { %v2401_v14 = vpack.c.bf16 %v493_v11, %v491_v10  ;;  %v94_v15 = vld [vmem:[#allocation5 + $0x18] sm:$0xff]  ;;  %v2403_v16 = vpack.c.bf16 %v498_v13, %v496_v12  ;;  %v495_v17 = vld [vmem:[#allocation7 + $0x80] sm:$0xff]  ;;  %v497_v18 = vld [vmem:[#allocation7 + $0x90] sm:$0xff] }
  0x4b   :  { %2394 = vmatpush1.bf16.msra.mxu1 %v2393_v63  ;;  %v500_v19 = vld [vmem:[#allocation7 + $0xa8] sm:$0xff]  ;;  %v502_v20 = vld [vmem:[#allocation7 + $0xb8] sm:$0xff]  ;;  %v2405_v21 = vpack.c.bf16 %v497_v18, %v495_v17  ;;  %v95_v22 = vld [vmem:[#allocation5 + $0x20] sm:$0xff] }
  0x4c   :  { %2374 = vmatpush1.bf16.msra.mxu0 %v2373_v32  ;;  %2396 = vmatprep.subr.bf16.mxu1 %v2395_v2  ;;  %v2407_v23 = vpack.c.bf16 %v502_v20, %v500_v19  ;;  %v499_v24 = vld [vmem:[#allocation7 + $0xa0] sm:$0xff]  ;;  %v501_v25 = vld [vmem:[#allocation7 + $0xb0] sm:$0xff]  ;;  %v504_v26 = vld [vmem:[#allocation7 + $0xc8] sm:$0xff] }
  0x4d   :  { %2376 = vmatprep.subr.bf16.mxu0 %v2375_v33  ;;  %v506_v27 = vld [vmem:[#allocation7 + $0xd8] sm:$0xff]  ;;  %v2409_v28 = vpack.c.bf16 %v501_v25, %v499_v24  ;;  %v96_v29 = vld [vmem:[#allocation5 + $0x28] sm:$0xff]  ;;  %v503_v31 = vld [vmem:[#allocation7 + $0xc0] sm:$0xff] }
  0x4e   :  { %v2411_v30 = vpack.c.bf16 %v506_v27, %v504_v26  ;;  %v505_v32 = vld [vmem:[#allocation7 + $0xd0] sm:$0xff]  ;;  %v508_v33 = vld [vmem:[#allocation7 + $0xe8] sm:$0xff]  ;;  %v510_v34 = vld [vmem:[#allocation7 + $0xf8] sm:$0xff] }
  0x4f   :  { %2398 = vmatpush1.bf16.msra.mxu1 %v2397_v7  ;;  %v2413_v35 = vpack.c.bf16 %v505_v32, %v503_v31  ;;  %v97_v36 = vld [vmem:[#allocation5 + $0x30] sm:$0xff]  ;;  %v2415_v37 = vpack.c.bf16 %v510_v34, %v508_v33  ;;  %v512_v40 = vld [vmem:[#allocation7 + $0x108] sm:$0xff]  ;;  %v514_v41 = vld [vmem:[#allocation7 + $0x118] sm:$0xff] }
  0x50   :  { %2378 = vmatpush1.bf16.msra.mxu0 %v2377_v38  ;;  %2400 = vmatprep.subr.bf16.mxu1 %v2399_v9  ;;  %v507_v38 = vld [vmem:[#allocation7 + $0xe0] sm:$0xff]  ;;  %v98_v43 = vld [vmem:[#allocation5 + $0x38] sm:$0xff]  ;;  %v513_v46 = vld [vmem:[#allocation7 + $0x110] sm:$0xff] }
  0x51   :  { %2380 = vmatprep.subr.bf16.mxu0 %v2379_v39  ;;  %v509_v39 = vld [vmem:[#allocation7 + $0xf0] sm:$0xff]  ;;  %v516_v47 = vld [vmem:[#allocation7 + $0x128] sm:$0xff]  ;;  %v99_v50 = vld [vmem:[#allocation5 + $0x40] sm:$0xff] }
  0x52   :  { %v2417_v42 = vpack.c.bf16 %v509_v39, %v507_v38  ;;  %v515_v52 = vld [vmem:[#allocation7 + $0x120] sm:$0xff]  ;;  %v517_v53 = vld [vmem:[#allocation7 + $0x130] sm:$0xff]  ;;  %v520_v54 = vld [vmem:[#allocation7 + $0x148] sm:$0xff] }
  0x53   :  { %2402 = vmatpush1.bf16.msra.mxu1 %v2401_v14  ;;  %v522_v55 = vld [vmem:[#allocation7 + $0x158] sm:$0xff]  ;;  %v2425_v56 = vpack.c.bf16 %v517_v53, %v515_v52  ;;  %v100_v57 = vld [vmem:[#allocation5 + $0x48] sm:$0xff]  ;;  %v519_v59 = vld [vmem:[#allocation7 + $0x140] sm:$0xff] }
  0x54   :  { %2382 = vmatpush1.bf16.msra.mxu0 %v2381_v44  ;;  %2404 = vmatprep.subr.bf16.mxu1 %v2403_v16  ;;  %v2419_v44 = vpack.c.bf16 %v514_v41, %v512_v40  ;;  %v2427_v58 = vpack.c.bf16 %v522_v55, %v520_v54  ;;  %v521_v60 = vld [vmem:[#allocation7 + $0x150] sm:$0xff]  ;;  %v524_v61 = vld [vmem:[#allocation7 + $0x168] sm:$0xff]  ;;  %v526_v62 = vld [vmem:[#allocation7 + $0x178] sm:$0xff] }
  0x55   :  { %2384 = vmatprep.subr.bf16.mxu0 %v2383_v45  ;;  %v511_v45 = vld [vmem:[#allocation7 + $0x100] sm:$0xff]  ;;  %v2429_v63 = vpack.c.bf16 %v521_v60, %v519_v59  ;;  %v2431_v2 = vpack.c.bf16 %v526_v62, %v524_v61  ;;  %v525_v4 = vld [vmem:[#allocation7 + $0x170] sm:$0xff]  ;;  %v528_v5 = vld [vmem:[#allocation7 + $0x188] sm:$0xff] }
  0x56   :  { %v523_v3 = vld [vmem:[#allocation7 + $0x160] sm:$0xff]  ;;  %v530_v6 = vld [vmem:[#allocation7 + $0x198] sm:$0xff]  ;;  %v529_v11 = vld [vmem:[#allocation7 + $0x190] sm:$0xff] }
  0x57   :  { %2406 = vmatpush1.bf16.msra.mxu1 %v2405_v21  ;;  %v2433_v7 = vpack.c.bf16 %v525_v4, %v523_v3  ;;  %v2435_v9 = vpack.c.bf16 %v530_v6, %v528_v5  ;;  %v527_v10 = vld [vmem:[#allocation7 + $0x180] sm:$0xff]  ;;  %v532_v12 = vld [vmem:[#allocation7 + $0x1a8] sm:$0xff]  ;;  %v534_v13 = vld [vmem:[#allocation7 + $0x1b8] sm:$0xff] }
  0x58   :  { %2386 = vmatpush1.bf16.msra.mxu0 %v2385_v48  ;;  %2408 = vmatprep.subr.bf16.mxu1 %v2407_v23  ;;  %v518_v48 = vld [vmem:[#allocation7 + $0x138] sm:$0xff]  ;;  %v2437_v14 = vpack.c.bf16 %v529_v11, %v527_v10  ;;  %v2439_v16 = vpack.c.bf16 %v534_v13, %v532_v12  ;;  %v531_v17 = vld [vmem:[#allocation7 + $0x1a0] sm:$0xff]  ;;  %v533_v18 = vld [vmem:[#allocation7 + $0x1b0] sm:$0xff] }
  0x59   :  { %v2423_v51 = vpack.c.bf16 %v518_v48, %v516_v47  ;;  %v536_v19 = vld [vmem:[#allocation7 + $0x1c8] sm:$0xff]  ;;  %v538_v20 = vld [vmem:[#allocation7 + $0x1d8] sm:$0xff]  ;;  %v2441_v21 = vpack.c.bf16 %v533_v18, %v531_v17  ;;  %v535_v24 = vld [vmem:[#allocation7 + $0x1c0] sm:$0xff] }
  0x5a   :  { %v2443_v23 = vpack.c.bf16 %v538_v20, %v536_v19  ;;  %v537_v25 = vld [vmem:[#allocation7 + $0x1d0] sm:$0xff]  ;;  %v110_v32 = vld [vmem:[#allocation5 + $0x98] sm:$0xff]  ;;  %v111_v33 = vld [vmem:[#allocation5 + $0xa0] sm:$0xff] }
  0x5b   :  { %220 = vmatmul.mubr.f32.vlgmr.msra.gmra.mrb[0].mxu0 %v91_v49  ;;  %2410 = vmatpush1.bf16.msra.mxu1 %v2409_v28  ;;  %v2421_v49 = vpack.c.bf16 %v513_v46, %v511_v45  ;;  %v2445_v26 = vpack.c.bf16 %v537_v25, %v535_v24  ;;  %v105_v27 = vld [vmem:[#allocation5 + $0x70] sm:$0xff]  ;;  %v106_v28 = vld [vmem:[#allocation5 + $0x78] sm:$0xff]  ;;  %v112_v34 = vld [vmem:[#allocation5 + $0xa8] sm:$0xff] }
  0x5c   :  { %225 = vmatprep.mubr.f32.mxu0 %v4069_v0  ;;  %2412 = vmatprep.subr.bf16.mxu1 %v2411_v30  ;;  %v108_v30 = vld [vmem:[#allocation5 + $0x88] sm:$0xff]  ;;  %v109_v31 = vld [vmem:[#allocation5 + $0x90] sm:$0xff]  ;;  %v539_v38 = vld [vmem:[#allocation7 + $0x1e0] sm:$0xff] }
  0x5d   :  { %v541_v39 = vld [vmem:[#allocation7 + $0x1f0] sm:$0xff]  ;;  %v118_v46 = vld [vmem:[#allocation5 + $0xd8] sm:$0xff]  ;;  %v119_v47 = vld [vmem:[#allocation5 + $0xe0] sm:$0xff] }
  0x5e   :  { %v2449_v40 = vpack.c.bf16 %v541_v39, %v539_v38  ;;  %v113_v41 = vld [vmem:[#allocation5 + $0xb0] sm:$0xff]  ;;  %v120_v48 = vld [vmem:[#allocation5 + $0xe8] sm:$0xff]  ;;  %v63_v13 = vld [vmem:[#allocation2 + $0x20] sm:$0xff] }
  0x5f   :  { %226 = vmatmul.mubr.f32.gmra.mrb[2].mxu0 %v92_v1  ;;  %2414 = vmatpush1.bf16.msra.mxu1 %v2413_v35  ;;  %v101_v1 = vld [vmem:[#allocation5 + $0x50] sm:$0xff]  ;;  %v540_v35 = vld [vmem:[#allocation7 + $0x1e8] sm:$0xff] }
  0x60   :  { %231 = vmatprep.mubr.f32.mxu0 %v4069_v0  ;;  %2416 = vmatprep.subr.bf16.mxu1 %v2415_v37  ;;  %v117_v45 = vld [vmem:[#allocation5 + $0xd0] sm:$0xff]  ;;  %v60_v61 = vld [vmem:[#allocation2 + $0x8] sm:$0xff] }
  0x61   :  { %v61_v3 = vld [vmem:[#allocation2 + $0x10] sm:$0xff]  ;;  %v64_v18 = vld [vmem:[#allocation2 + $0x28] sm:$0xff] }
  0x62   :  { %v68_v38 = vld [vmem:[#allocation2 + $0x48] sm:$0xff] }
  0x63   :  { %232 = vmatmul.mubr.f32.gmra.mrb[4].mxu0 %v93_v8  ;;  %2418 = vmatpush1.bf16.msra.mxu1 %v2417_v42  ;;  %v102_v8 = vld [vmem:[#allocation5 + $0x58] sm:$0xff] }
  0x64   :  { %237 = vmatprep.mubr.f32.mxu0 %v4069_v0  ;;  %2420 = vmatprep.subr.bf16.mxu1 %v2419_v44  ;;  %v114_v42 = vld [vmem:[#allocation5 + $0xb8] sm:$0xff]  ;;  %v116_v44 = vld [vmem:[#allocation5 + $0xc8] sm:$0xff] }
  0x67   :  { %238 = vmatmul.mubr.f32.gmra.mrb[6].mxu0 %v94_v15  ;;  %2422 = vmatpush1.bf16.msra.mxu1 %v2421_v49  ;;  %v103_v15 = vld [vmem:[#allocation5 + $0x60] sm:$0xff]  ;;  %v121_v49 = vld [vmem:[#allocation5 + $0xf0] sm:$0xff] }
  0x68   :  { %243 = vmatprep.mubr.f32.mxu0 %v4069_v0  ;;  %2424 = vmatprep.subr.bf16.mxu1 %v2423_v51  ;;  %v2708_v51 = vld [vmem:[#allocation7 + $0x301] ss:$0 sm:$0xff] }
  0x6b   :  { %244 = vmatmul.mubr.f32.gmra.mrb[8].mxu0 %v95_v22  ;;  %2426 = vmatpush1.bf16.msra.mxu1 %v2425_v56  ;;  %v104_v22 = vld [vmem:[#allocation5 + $0x68] sm:$0xff]  ;;  %v59_v56 = vld [vmem:[#allocation2] sm:$0xff] }
  0x6c   :  { %249 = vmatprep.mubr.f32.mxu0 %v4069_v0  ;;  %2428 = vmatprep.subr.bf16.mxu1 %v2427_v58 }
  0x6f   :  { %250 = vmatmul.mubr.f32.gmra.mrb[10].mxu0 %v96_v29  ;;  %2430 = vmatpush1.bf16.msra.mxu1 %v2429_v63  ;;  %v107_v29 = vld [vmem:[#allocation5 + $0x80] sm:$0xff] }
  0x70   :  { %255 = vmatprep.mubr.f32.mxu0 %v4069_v0  ;;  %2432 = vmatprep.subr.bf16.mxu1 %v2431_v2 }
  0x73   :  { %256 = vmatmul.mubr.f32.gmra.mrb[12].mxu0 %v97_v36  ;;  %2434 = vmatpush1.bf16.msra.mxu1 %v2433_v7  ;;  %v542_v36 = vld [vmem:[#allocation7 + $0x1f8] sm:$0xff] }
  0x74   :  { %261 = vmatprep.mubr.f32.mxu0 %v4069_v0  ;;  %2436 = vmatprep.subr.bf16.mxu1 %v2435_v9  ;;  %v2447_v37 = vpack.c.bf16 %v542_v36, %v540_v35 }
  0x77   :  { %262 = vmatmul.mubr.f32.gmra.mrb[14].mxu0 %v98_v43  ;;  %2438 = vmatpush1.bf16.msra.mxu1 %v2437_v14  ;;  %v115_v43 = vld [vmem:[#allocation5 + $0xc0] sm:$0xff] }
  0x78   :  { %267 = vmatprep.mubr.f32.mxu0 %v4069_v0  ;;  %2440 = vmatprep.subr.bf16.mxu1 %v2439_v16 }
  0x7b   :  { %268 = vmatmul.mubr.f32.gmra.mrb[16].mxu0 %v99_v50  ;;  %2442 = vmatpush1.bf16.msra.mxu1 %v2441_v21  ;;  %v122_v50 = vld [vmem:[#allocation5 + $0xf8] sm:$0xff] }
  0x7c   :  { %273 = vmatprep.mubr.f32.mxu0 %v4069_v0  ;;  %2444 = vmatprep.subr.bf16.mxu1 %v2443_v23  ;;  %v65_v23 = vld [vmem:[#allocation2 + $0x30] sm:$0xff] }
  0x7f   :  { %274 = vmatmul.mubr.f32.gmra.mrb[18].mxu0 %v100_v57  ;;  %2446 = vmatpush1.bf16.msra.mxu1 %v2445_v26 }
  0x80   :  { %279 = vmatprep.mubr.f32.mxu0 %v4069_v0  ;;  %2448 = vmatprep.subr.bf16.mxu1 %v2447_v37 }
  0x83   :  { %280 = vmatmul.mubr.f32.gmra.mrb[20].mxu0 %v101_v1  ;;  %2450 = vmatpush1.bf16.msra.mxu1 %v2449_v40 }
  0x84   :  { %285 = vmatprep.mubr.f32.mxu0 %v4069_v0 }
  0x87   :  { %286 = vmatmul.mubr.f32.gmra.mrb[22].mxu0 %v102_v8  ;;  %v62_v8 = vld [vmem:[#allocation2 + $0x18] sm:$0xff] }
  0x88   :  { %291 = vmatprep.mubr.f32.mxu0 %v4069_v0 }
  0x8b   :  { %292 = vmatmul.mubr.f32.gmra.mrb[24].mxu0 %v103_v15 }
  0x8c   :  { %297 = vmatprep.mubr.f32.mxu0 %v4069_v0 }
  0x8f   :  { %298 = vmatmul.mubr.f32.gmra.mrb[26].mxu0 %v104_v22 }
  0x90   :  { %303 = vmatprep.mubr.f32.mxu0 %v4069_v0 }
  0x93   :  { %304 = vmatmul.mubr.f32.gmra.mrb[28].mxu0 %v105_v27 }
  0x94   :  { %309 = vmatprep.mubr.f32.mxu0 %v4069_v0 }
  0x97   :  { %310 = vmatmul.mubr.f32.gmra.mrb[30].mxu0 %v106_v28  ;;  %v66_v28 = vld [vmem:[#allocation2 + $0x38] sm:$0xff] }
  0x98   :  { %315 = vmatprep.mubr.f32.mxu0 %v4069_v0 }
  0x9b   :  { %316 = vmatmul.mubr.f32.gmra.mrb[32].mxu0 %v107_v29 }
  0x9c   :  { %321 = vmatprep.mubr.f32.mxu0 %v4069_v0 }
  0x9f   :  { %322 = vmatmul.mubr.f32.gmra.mrb[34].mxu0 %v108_v30 }
  0xa0   :  { %327 = vmatprep.mubr.f32.mxu0 %v4069_v0 }
  0xa3   :  { %328 = vmatmul.mubr.f32.gmra.mrb[36].mxu0 %v109_v31 }
  0xa4   :  { %333 = vmatprep.mubr.f32.mxu0 %v4069_v0 }
  0xa7   :  { %334 = vmatmul.mubr.f32.gmra.mrb[38].mxu0 %v110_v32 }
  0xa8   :  { %339 = vmatprep.mubr.f32.mxu0 %v4069_v0 }
  0xab   :  { %340 = vmatmul.mubr.f32.gmra.mrb[40].mxu0 %v111_v33  ;;  %v67_v33 = vld [vmem:[#allocation2 + $0x40] sm:$0xff] }
  0xac   :  { %345 = vmatprep.mubr.f32.mxu0 %v4069_v0 }
  0xaf   :  { %346 = vmatmul.mubr.f32.gmra.mrb[42].mxu0 %v112_v34 }
  0xb0   :  { %351 = vmatprep.mubr.f32.mxu0 %v4069_v0 }
  0xb3   :  { %352 = vmatmul.mubr.f32.gmra.mrb[44].mxu0 %v113_v41 }
  0xb4   :  { %357 = vmatprep.mubr.f32.mxu0 %v4069_v0 }
  0xb7   :  { %358 = vmatmul.mubr.f32.gmra.mrb[46].mxu0 %v114_v42 }
  0xb8   :  { %363 = vmatprep.mubr.f32.mxu0 %v4069_v0 }
  0xbb   :  { %364 = vmatmul.mubr.f32.gmra.mrb[48].mxu0 %v115_v43  ;;  %v69_v43 = vld [vmem:[#allocation2 + $0x50] sm:$0xff] }
  0xbc   :  { %369 = vmatprep.mubr.f32.mxu0 %v4069_v0 }
  0xbf   :  { %370 = vmatmul.mubr.f32.gmra.mrb[50].mxu0 %v116_v44 }
  0xc0   :  { %375 = vmatprep.mubr.f32.mxu0 %v4069_v0 }
  0xc3   :  { %376 = vmatmul.mubr.f32.gmra.mrb[52].mxu0 %v117_v45 }
  0xc4   :  { %381 = vmatprep.mubr.f32.mxu0 %v4069_v0 }
  0xc7   :  { %382 = vmatmul.mubr.f32.gmra.mrb[54].mxu0 %v118_v46 }
  0xc8   :  { %387 = vmatprep.mubr.f32.mxu0 %v4069_v0 }
  0xcb   :  { %388 = vmatmul.mubr.f32.gmra.mrb[56].mxu0 %v119_v47 }
  0xcc   :  { %393 = vmatprep.mubr.f32.mxu0 %v4069_v0 }
  0xcf   :  { %394 = vmatmul.mubr.f32.gmra.mrb[58].mxu0 %v120_v48  ;;  %v70_v48 = vld [vmem:[#allocation2 + $0x58] sm:$0xff] }
  0xd0   :  { %399 = vmatprep.mubr.f32.mxu0 %v4069_v0 }
  0xd3   :  { %400 = vmatmul.mubr.f32.gmra.mrb[60].mxu0 %v121_v49 }
  0xd4   :  { %405 = vmatprep.mubr.f32.mxu0 %v4069_v0 }
  0xd7   :  { %406 = vmatmul.mubr.f32.gmra.mrb[62].mxu0 %v122_v50 }
 0x12e   :  { %v221_v52 = vpop.f32.mrb[0].mxu0 }
 0x12f   :  { %v2710_v53 = vpop.f32.mrb[1].mxu0  ;;  %v413_v54 = vadd.f32 %v2708_v51, %v221_v52 }
 0x131   :  { %v445_v55 = vmax.f32 %v413_v54, 0.0 }
 0x132   :  { %v227_v57 = vpop.f32.mrb[2].mxu0 }
 0x133   :  { %v414_v58 = vadd.f32 %v2708_v51, %v227_v57  ;;  %v2714_v59 = vpop.f32.mrb[3].mxu0  ;;  %618 = vmatprep.mubr.f32.mxu1 %v445_v55  ;;  %v71_v55 = vld [vmem:[#allocation2 + $0x60] sm:$0xff] }
 0x134   :  { %619 = vmatmul.mubr.f32.vlgmr.msra.gmra.mrb[0].mxu1 %v59_v56 }
 0x135   :  { %v446_v60 = vmax.f32 %v414_v58, 0.0 }
 0x136   :  { %v233_v62 = vpop.f32.mrb[4].mxu0 }
 0x137   :  { %v415_v63 = vadd.f32 %v2708_v51, %v233_v62  ;;  %v2717_v1 = vpop.f32.mrb[5].mxu0  ;;  %624 = vmatprep.mubr.f32.mxu1 %v446_v60 }
 0x138   :  { %625 = vmatmul.mubr.f32.gmra.mrb[2].mxu1 %v60_v61  ;;  %v72_v61 = vld [vmem:[#allocation2 + $0x68] sm:$0xff] }
 0x139   :  { %v447_v2 = vmax.f32 %v415_v63, 0.0 }
 0x13a   :  { %v239_v4 = vpop.f32.mrb[6].mxu0 }
 0x13b   :  { %v416_v5 = vadd.f32 %v2708_v51, %v239_v4  ;;  %v2720_v6 = vpop.f32.mrb[7].mxu0  ;;  %630 = vmatprep.mubr.f32.mxu1 %v447_v2  ;;  %v73_v4 = vld [vmem:[#allocation2 + $0x70] sm:$0xff] }
 0x13c   :  { %631 = vmatmul.mubr.f32.gmra.mrb[4].mxu1 %v61_v3 }
 0x13d   :  { %v448_v7 = vmax.f32 %v416_v5, 0.0 }
 0x13e   :  { %v245_v9 = vpop.f32.mrb[8].mxu0 }
 0x13f   :  { %v417_v10 = vadd.f32 %v2708_v51, %v245_v9  ;;  %v2723_v11 = vpop.f32.mrb[9].mxu0  ;;  %636 = vmatprep.mubr.f32.mxu1 %v448_v7 }
 0x140   :  { %637 = vmatmul.mubr.f32.gmra.mrb[6].mxu1 %v62_v8 }
 0x141   :  { %v449_v12 = vmax.f32 %v417_v10, 0.0  ;;  %v74_v10 = vld [vmem:[#allocation2 + $0x78] sm:$0xff] }
 0x142   :  { %v251_v14 = vpop.f32.mrb[10].mxu0 }
 0x143   :  { %v418_v15 = vadd.f32 %v2708_v51, %v251_v14  ;;  %v2726_v16 = vpop.f32.mrb[11].mxu0  ;;  %642 = vmatprep.mubr.f32.mxu1 %v449_v12 }
 0x144   :  { %643 = vmatmul.mubr.f32.gmra.mrb[8].mxu1 %v63_v13 }
 0x145   :  { %v450_v17 = vmax.f32 %v418_v15, 0.0 }
 0x146   :  { %v257_v19 = vpop.f32.mrb[12].mxu0 }
 0x147   :  { %v419_v20 = vadd.f32 %v2708_v51, %v257_v19  ;;  %v2729_v21 = vpop.f32.mrb[13].mxu0  ;;  %648 = vmatprep.mubr.f32.mxu1 %v450_v17  ;;  %v75_v17 = vld [vmem:[#allocation2 + $0x80] sm:$0xff] }
 0x148   :  { %649 = vmatmul.mubr.f32.gmra.mrb[10].mxu1 %v64_v18 }
 0x149   :  { %v451_v22 = vmax.f32 %v419_v20, 0.0 }
 0x14a   :  { %v263_v24 = vpop.f32.mrb[14].mxu0 }
 0x14b   :  { %v420_v25 = vadd.f32 %v2708_v51, %v263_v24  ;;  %v2732_v26 = vpop.f32.mrb[15].mxu0  ;;  %654 = vmatprep.mubr.f32.mxu1 %v451_v22 }
 0x14c   :  { %655 = vmatmul.mubr.f32.gmra.mrb[12].mxu1 %v65_v23  ;;  %v76_v23 = vld [vmem:[#allocation2 + $0x88] sm:$0xff] }
 0x14d   :  { %v452_v27 = vmax.f32 %v420_v25, 0.0 }
 0x14e   :  { %v269_v29 = vpop.f32.mrb[16].mxu0 }
 0x14f   :  { %v421_v30 = vadd.f32 %v2708_v51, %v269_v29  ;;  %v2735_v31 = vpop.f32.mrb[17].mxu0  ;;  %660 = vmatprep.mubr.f32.mxu1 %v452_v27  ;;  %v77_v29 = vld [vmem:[#allocation2 + $0x90] sm:$0xff] }
 0x150   :  { %661 = vmatmul.mubr.f32.gmra.mrb[14].mxu1 %v66_v28 }
 0x151   :  { %v453_v32 = vmax.f32 %v421_v30, 0.0 }
 0x152   :  { %v275_v34 = vpop.f32.mrb[18].mxu0 }
 0x153   :  { %v422_v35 = vadd.f32 %v2708_v51, %v275_v34  ;;  %v2738_v36 = vpop.f32.mrb[19].mxu0  ;;  %666 = vmatprep.mubr.f32.mxu1 %v453_v32 }
 0x154   :  { %667 = vmatmul.mubr.f32.gmra.mrb[16].mxu1 %v67_v33 }
 0x155   :  { %v454_v37 = vmax.f32 %v422_v35, 0.0  ;;  %v78_v35 = vld [vmem:[#allocation2 + $0x98] sm:$0xff] }
 0x156   :  { %v281_v39 = vpop.f32.mrb[20].mxu0 }
 0x157   :  { %v423_v40 = vadd.f32 %v2708_v51, %v281_v39  ;;  %v2741_v41 = vpop.f32.mrb[21].mxu0  ;;  %672 = vmatprep.mubr.f32.mxu1 %v454_v37 }
 0x158   :  { %673 = vmatmul.mubr.f32.gmra.mrb[18].mxu1 %v68_v38 }
 0x159   :  { %v455_v42 = vmax.f32 %v423_v40, 0.0 }
 0x15a   :  { %v287_v44 = vpop.f32.mrb[22].mxu0 }
 0x15b   :  { %v424_v45 = vadd.f32 %v2708_v51, %v287_v44  ;;  %v2744_v46 = vpop.f32.mrb[23].mxu0  ;;  %678 = vmatprep.mubr.f32.mxu1 %v455_v42  ;;  %v79_v42 = vld [vmem:[#allocation2 + $0xa0] sm:$0xff] }
 0x15c   :  { %679 = vmatmul.mubr.f32.gmra.mrb[20].mxu1 %v69_v43 }
 0x15d   :  { %v456_v47 = vmax.f32 %v424_v45, 0.0 }
 0x15e   :  { %v293_v49 = vpop.f32.mrb[24].mxu0 }
 0x15f   :  { %v425_v50 = vadd.f32 %v2708_v51, %v293_v49  ;;  %v2747_v52 = vpop.f32.mrb[25].mxu0  ;;  %684 = vmatprep.mubr.f32.mxu1 %v456_v47 }
 0x160   :  { %685 = vmatmul.mubr.f32.gmra.mrb[22].mxu1 %v70_v48  ;;  %v80_v48 = vld [vmem:[#allocation2 + $0xa8] sm:$0xff] }
 0x161   :  { %v457_v54 = vmax.f32 %v425_v50, 0.0 }
 0x162   :  { %v299_v56 = vpop.f32.mrb[26].mxu0 }
 0x163   :  { %v426_v57 = vadd.f32 %v2708_v51, %v299_v56  ;;  %v2750_v58 = vpop.f32.mrb[27].mxu0  ;;  %690 = vmatprep.mubr.f32.mxu1 %v457_v54  ;;  %v81_v56 = vld [vmem:[#allocation2 + $0xb0] sm:$0xff] }
 0x164   :  { %691 = vmatmul.mubr.f32.gmra.mrb[24].mxu1 %v71_v55 }
 0x165   :  { %v458_v60 = vmax.f32 %v426_v57, 0.0 }
 0x166   :  { %v305_v62 = vpop.f32.mrb[28].mxu0 }
 0x167   :  { %v427_v63 = vadd.f32 %v2708_v51, %v305_v62  ;;  %v2753_v2 = vpop.f32.mrb[29].mxu0  ;;  %696 = vmatprep.mubr.f32.mxu1 %v458_v60 }
 0x168   :  { %697 = vmatmul.mubr.f32.gmra.mrb[26].mxu1 %v72_v61 }
 0x169   :  { %v459_v3 = vmax.f32 %v427_v63, 0.0  ;;  %v82_v63 = vld [vmem:[#allocation2 + $0xb8] sm:$0xff] }
 0x16a   :  { %v311_v5 = vpop.f32.mrb[30].mxu0 }
 0x16b   :  { %v428_v7 = vadd.f32 %v2708_v51, %v311_v5  ;;  %v2756_v8 = vpop.f32.mrb[31].mxu0  ;;  %702 = vmatprep.mubr.f32.mxu1 %v459_v3 }
 0x16c   :  { %703 = vmatmul.mubr.f32.gmra.mrb[28].mxu1 %v73_v4 }
 0x16d   :  { %v460_v9 = vmax.f32 %v428_v7, 0.0 }
 0x16e   :  { %v317_v12 = vpop.f32.mrb[32].mxu0 }
 0x16f   :  { %v429_v13 = vadd.f32 %v2708_v51, %v317_v12  ;;  %v2759_v14 = vpop.f32.mrb[33].mxu0  ;;  %708 = vmatprep.mubr.f32.mxu1 %v460_v9  ;;  %v83_v9 = vld [vmem:[#allocation2 + $0xc0] sm:$0xff] }
 0x170   :  { %709 = vmatmul.mubr.f32.gmra.mrb[30].mxu1 %v74_v10 }
 0x171   :  { %v461_v15 = vmax.f32 %v429_v13, 0.0 }
 0x172   :  { %v323_v18 = vpop.f32.mrb[34].mxu0 }
 0x173   :  { %v430_v19 = vadd.f32 %v2708_v51, %v323_v18  ;;  %v2762_v20 = vpop.f32.mrb[35].mxu0  ;;  %714 = vmatprep.mubr.f32.mxu1 %v461_v15 }
 0x174   :  { %715 = vmatmul.mubr.f32.gmra.mrb[32].mxu1 %v75_v17  ;;  %v84_v17 = vld [vmem:[#allocation2 + $0xc8] sm:$0xff] }
 0x175   :  { %v462_v22 = vmax.f32 %v430_v19, 0.0 }
 0x176   :  { %v329_v24 = vpop.f32.mrb[36].mxu0 }
 0x177   :  { %v431_v25 = vadd.f32 %v2708_v51, %v329_v24  ;;  %v2765_v27 = vpop.f32.mrb[37].mxu0  ;;  %720 = vmatprep.mubr.f32.mxu1 %v462_v22  ;;  %v85_v24 = vld [vmem:[#allocation2 + $0xd0] sm:$0xff] }
 0x178   :  { %721 = vmatmul.mubr.f32.gmra.mrb[34].mxu1 %v76_v23 }
 0x179   :  { %v463_v28 = vmax.f32 %v431_v25, 0.0 }
 0x17a   :  { %v335_v30 = vpop.f32.mrb[38].mxu0 }
 0x17b   :  { %v432_v32 = vadd.f32 %v2708_v51, %v335_v30  ;;  %v2768_v33 = vpop.f32.mrb[39].mxu0  ;;  %726 = vmatprep.mubr.f32.mxu1 %v463_v28 }
 0x17c   :  { %727 = vmatmul.mubr.f32.gmra.mrb[36].mxu1 %v77_v29 }
 0x17d   :  { %v464_v34 = vmax.f32 %v432_v32, 0.0  ;;  %v86_v32 = vld [vmem:[#allocation2 + $0xd8] sm:$0xff] }
 0x17e   :  { %v341_v37 = vpop.f32.mrb[40].mxu0 }
 0x17f   :  { %v433_v38 = vadd.f32 %v2708_v51, %v341_v37  ;;  %v2771_v39 = vpop.f32.mrb[41].mxu0  ;;  %732 = vmatprep.mubr.f32.mxu1 %v464_v34 }
 0x180   :  { %733 = vmatmul.mubr.f32.gmra.mrb[38].mxu1 %v78_v35 }
 0x181   :  { %v465_v40 = vmax.f32 %v433_v38, 0.0 }
 0x182   :  { %v347_v43 = vpop.f32.mrb[42].mxu0 }
 0x183   :  { %v434_v44 = vadd.f32 %v2708_v51, %v347_v43  ;;  %v2774_v45 = vpop.f32.mrb[43].mxu0  ;;  %738 = vmatprep.mubr.f32.mxu1 %v465_v40  ;;  %v87_v40 = vld [vmem:[#allocation2 + $0xe0] sm:$0xff] }
 0x184   :  { %739 = vmatmul.mubr.f32.gmra.mrb[40].mxu1 %v79_v42 }
 0x185   :  { %v466_v47 = vmax.f32 %v434_v44, 0.0 }
 0x186   :  { %v353_v49 = vpop.f32.mrb[44].mxu0 }
 0x187   :  { %v435_v50 = vadd.f32 %v2708_v51, %v353_v49  ;;  %v2777_v54 = vpop.f32.mrb[45].mxu0  ;;  %744 = vmatprep.mubr.f32.mxu1 %v466_v47 }
 0x188   :  { %745 = vmatmul.mubr.f32.gmra.mrb[42].mxu1 %v80_v48  ;;  %v88_v48 = vld [vmem:[#allocation2 + $0xe8] sm:$0xff] }
 0x189   :  { %v467_v55 = vmax.f32 %v435_v50, 0.0 }
 0x18a   :  { %v359_v57 = vpop.f32.mrb[46].mxu0 }
 0x18b   :  { %v436_v60 = vadd.f32 %v2708_v51, %v359_v57  ;;  %v2780_v61 = vpop.f32.mrb[47].mxu0  ;;  %750 = vmatprep.mubr.f32.mxu1 %v467_v55  ;;  %v89_v57 = vld [vmem:[#allocation2 + $0xf0] sm:$0xff] }
 0x18c   :  { %751 = vmatmul.mubr.f32.gmra.mrb[44].mxu1 %v81_v56 }
 0x18d   :  { %v468_v62 = vmax.f32 %v436_v60, 0.0 }
 0x18e   :  { %v365_v3 = vpop.f32.mrb[48].mxu0 }
 0x18f   :  { %v437_v4 = vadd.f32 %v2708_v51, %v365_v3  ;;  %v2783_v5 = vpop.f32.mrb[49].mxu0  ;;  %756 = vmatprep.mubr.f32.mxu1 %v468_v62 }
 0x190   :  { %757 = vmatmul.mubr.f32.gmra.mrb[46].mxu1 %v82_v63 }
 0x191   :  { %v469_v7 = vmax.f32 %v437_v4, 0.0  ;;  %v90_v4 = vld [vmem:[#allocation2 + $0xf8] sm:$0xff] }
 0x192   :  { %v371_v10 = vpop.f32.mrb[50].mxu0 }
 0x193   :  { %v438_v12 = vadd.f32 %v2708_v51, %v371_v10  ;;  %v2786_v13 = vpop.f32.mrb[51].mxu0  ;;  %762 = vmatprep.mubr.f32.mxu1 %v469_v7  ;;  %v544_v7 = vlaneseq }
 0x194   :  { %763 = vmatmul.mubr.f32.gmra.mrb[48].mxu1 %v83_v9 }
 0x195   :  { %v470_v15 = vmax.f32 %v438_v12, 0.0  ;;  %v2806_v9 = vshrl.u32 %v544_v7, 7  ;;  %v478_v12 = vld [vmem:[#allocation7 + $0x300] ss:$8 sm:$0x3] }
 0x196   :  { %v377_v18 = vpop.f32.mrb[52].mxu0 }
 0x197   :  { %v439_v19 = vadd.f32 %v2708_v51, %v377_v18  ;;  %v2789_v22 = vpop.f32.mrb[53].mxu0  ;;  %768 = vmatprep.mubr.f32.mxu1 %v470_v15  ;;  %4115 = vst [vmem:[#allocation15_spill] sm:$0xff] %v2806_v9  ;;  %v546_v10 = vsub.s32 0, %v2806_v9 }
 0x198   :  { %769 = vmatmul.mubr.f32.gmra.mrb[50].mxu1 %v84_v17  ;;  %v2811_v17 = vand.u32 127, %v544_v7 }
 0x199   :  { %v471_v23 = vmax.f32 %v439_v19, 0.0  ;;  %v2809_v15 = vrot.slane %v478_v12, %v546_v10 }
 0x19a   :  { %v383_v25 = vpop.f32.mrb[54].mxu0  ;;  %4116 = vst [vmem:[#allocation16_spill] sm:$0xff] %v2811_v17  ;;  %vm845_vm0 = vcmp.ge.s32.totalorder %v2811_v17, 1 }
 0x19b   :  { %v440_v28 = vadd.f32 %v2708_v51, %v383_v25  ;;  %v2792_v29 = vpop.f32.mrb[55].mxu0  ;;  %774 = vmatprep.mubr.f32.mxu1 %v471_v23 }
 0x19c   :  { %775 = vmatmul.mubr.f32.gmra.mrb[52].mxu1 %v85_v24 }
 0x19d   :  { %v472_v30 = vmax.f32 %v440_v28, 0.0 }
 0x19e   :  { %v389_v34 = vpop.f32.mrb[56].mxu0 }
 0x19f   :  { %v441_v35 = vadd.f32 %v2708_v51, %v389_v34  ;;  %v2795_v37 = vpop.f32.mrb[57].mxu0  ;;  %780 = vmatprep.mubr.f32.mxu1 %v472_v30 }
 0x1a0   :  { %781 = vmatmul.mubr.f32.gmra.mrb[54].mxu1 %v86_v32 }
 0x1a1   :  { %v473_v38 = vmax.f32 %v441_v35, 0.0 }
 0x1a2   :  { %v395_v42 = vpop.f32.mrb[58].mxu0 }
 0x1a3   :  { %v442_v43 = vadd.f32 %v2708_v51, %v395_v42  ;;  %v2798_v44 = vpop.f32.mrb[59].mxu0  ;;  %786 = vmatprep.mubr.f32.mxu1 %v473_v38 }
 0x1a4   :  { %787 = vmatmul.mubr.f32.gmra.mrb[56].mxu1 %v87_v40 }
 0x1a5   :  { %v474_v47 = vmax.f32 %v442_v43, 0.0 }
 0x1a6   :  { %v401_v49 = vpop.f32.mrb[60].mxu0 }
 0x1a7   :  { %v443_v50 = vadd.f32 %v2708_v51, %v401_v49  ;;  %v2801_v55 = vpop.f32.mrb[61].mxu0  ;;  %792 = vmatprep.mubr.f32.mxu1 %v474_v47 }
 0x1a8   :  { %793 = vmatmul.mubr.f32.gmra.mrb[58].mxu1 %v88_v48 }
 0x1a9   :  { %v475_v56 = vmax.f32 %v443_v50, 0.0 }
 0x1aa   :  { %v407_v60 = vpop.f32.mrb[62].mxu0 }
 0x1ab   :  { %v444_v62 = vadd.f32 %v2708_v51, %v407_v60  ;;  %v2804_v63 = vpop.f32.mrb[63].mxu0  ;;  %798 = vmatprep.mubr.f32.mxu1 %v475_v56 }
 0x1ac   :  { %799 = vmatmul.mubr.f32.gmra.mrb[60].mxu1 %v89_v57 }
 0x1ad   :  { %v476_v3 = vmax.f32 %v444_v62, 0.0 }
 0x1af   :  { %804 = vmatprep.mubr.f32.mxu1 %v476_v3 }
 0x1b0   :  { %805 = vmatmul.mubr.f32.gmra.mrb[62].mxu1 %v90_v4 }
 0x207   :  { %v620_v18 = vpop.f32.mrb[0].mxu1 }
 0x208   :  { %v621_v51 = vadd.f32 %v620_v18, %v2809_v15  ;;  %v2814_v19 = vpop.f32.mrb[1].mxu1 }
 0x209   :  { %4117 = vst [vmem:[#allocation17_spill] sm:$0xff] %v2814_v19 }
 0x20a   :  { %v2818_v23 = vadd.f32 %v621_v51, %v2710_v53 }
 0x20b   :  { %v626_v24 = vpop.f32.mrb[2].mxu1 }
 0x20c   :  { %4118 = vst [vmem:[#allocation18_spill] sm:$0xff] %v2818_v23  ;;  %v627_v25 = vadd.f32 %v626_v24, %v2809_v15  ;;  %v2821_v28 = vpop.f32.mrb[3].mxu1  ;;  %v2826_v30 = vsel %vm845_vm0, %v2818_v23, -3.4028235e+38 }
 0x20d   :  { %4119 = vst [vmem:[#allocation19_spill] sm:$0xff] %v2821_v28  ;;  %v879_v32 = vsel %vm878_vm1, %v2826_v30, -inf }
 0x20e   :  { %v2831_v34 = vadd.f32 %v627_v25, %v2714_v59  ;;  %880 = vmax.xlane.f32.xlu0 %v879_v32 }
 0x20f   :  { %v632_v53 = vpop.f32.mrb[4].mxu1 }
 0x210   :  { %4120 = vst [vmem:[#allocation20_spill] sm:$0xff] %v2831_v34  ;;  %v633_v35 = vadd.f32 %v632_v53, %v2809_v15  ;;  %v2834_v38 = vpop.f32.mrb[5].mxu1  ;;  %v2839_v40 = vsel %vm845_vm0, %v2831_v34, -3.4028235e+38 }
 0x211   :  { %4121 = vst [vmem:[#allocation21_spill] sm:$0xff] %v2834_v38  ;;  %v882_v42 = vsel %vm878_vm1, %v2839_v40, -inf }
 0x212   :  { %v2844_v43 = vadd.f32 %v633_v35, %v2717_v1  ;;  %883 = vmax.xlane.f32.xlu0 %v882_v42 }
 0x213   :  { %v638_v59 = vpop.f32.mrb[6].mxu1 }
 0x214   :  { %4122 = vst [vmem:[#allocation22_spill] sm:$0xff] %v2844_v43  ;;  %v639_v47 = vadd.f32 %v638_v59, %v2809_v15  ;;  %v2847_v48 = vpop.f32.mrb[7].mxu1  ;;  %v2852_v49 = vsel %vm845_vm0, %v2844_v43, -3.4028235e+38 }
 0x215   :  { %4123 = vst [vmem:[#allocation23_spill] sm:$0xff] %v2847_v48  ;;  %v885_v50 = vsel %vm878_vm1, %v2852_v49, -inf }
 0x216   :  { %v2857_v56 = vadd.f32 %v639_v47, %v2720_v6  ;;  %886 = vmax.xlane.f32.xlu1 %v885_v50 }
 0x217   :  { %v644_v1 = vpop.f32.mrb[8].mxu1 }
 0x218   :  { %4124 = vst [vmem:[#allocation24_spill] sm:$0xff] %v2857_v56  ;;  %v645_v57 = vadd.f32 %v644_v1, %v2809_v15  ;;  %v2860_v60 = vpop.f32.mrb[9].mxu1  ;;  %v2865_v62 = vsel %vm845_vm0, %v2857_v56, -3.4028235e+38 }
 0x219   :  { %4125 = vst [vmem:[#allocation25_spill] sm:$0xff] %v2860_v60  ;;  %v888_v3 = vsel %vm878_vm1, %v2865_v62, -inf }
 0x21a   :  { %v2870_v4 = vadd.f32 %v645_v57, %v2723_v11  ;;  %889 = vmax.xlane.f32.xlu1 %v888_v3 }
 0x21b   :  { %v650_v6 = vpop.f32.mrb[10].mxu1 }
 0x21c   :  { %4126 = vst [vmem:[#allocation26_spill] sm:$0xff] %v2870_v4  ;;  %v651_v7 = vadd.f32 %v650_v6, %v2809_v15  ;;  %v2873_v10 = vpop.f32.mrb[11].mxu1  ;;  %v2878_v12 = vsel %vm845_vm0, %v2870_v4, -3.4028235e+38 }
 0x21d   :  { %4127 = vst [vmem:[#allocation27_spill] sm:$0xff] %v2873_v10  ;;  %v891_v18 = vsel %vm878_vm1, %v2878_v12, -inf }
 0x21e   :  { %v2883_v51 = vadd.f32 %v651_v7, %v2726_v16  ;;  %892 = vmax.xlane.f32.xlu0 %v891_v18 }
 0x21f   :  { %v656_v11 = vpop.f32.mrb[12].mxu1 }
 0x220   :  { %4128 = vst [vmem:[#allocation28_spill] sm:$0xff] %v2883_v51  ;;  %v657_v24 = vadd.f32 %v656_v11, %v2809_v15  ;;  %v2886_v25 = vpop.f32.mrb[13].mxu1  ;;  %v2891_v32 = vsel %vm845_vm0, %v2883_v51, -3.4028235e+38 }
 0x221   :  { %4129 = vst [vmem:[#allocation29_spill] sm:$0xff] %v2886_v25  ;;  %v894_v53 = vsel %vm878_vm1, %v2891_v32, -inf }
 0x222   :  { %v2896_v35 = vadd.f32 %v657_v24, %v2729_v21  ;;  %895 = vmax.xlane.f32.xlu1 %v894_v53 }
 0x223   :  { %v662_v16 = vpop.f32.mrb[14].mxu1 }
 0x224   :  { %4130 = vst [vmem:[#allocation30_spill] sm:$0xff] %v2896_v35  ;;  %v663_v42 = vadd.f32 %v662_v16, %v2809_v15  ;;  %v2899_v59 = vpop.f32.mrb[15].mxu1  ;;  %v2904_v47 = vsel %vm845_vm0, %v2896_v35, -3.4028235e+38 }
 0x225   :  { %4131 = vst [vmem:[#allocation31_spill] sm:$0xff] %v2899_v59  ;;  %v897_v50 = vsel %vm878_vm1, %v2904_v47, -inf }
 0x226   :  { %v2909_v1 = vadd.f32 %v663_v42, %v2732_v26  ;;  %898 = vmax.xlane.f32.xlu0 %v897_v50 }
 0x227   :  { %v668_v21 = vpop.f32.mrb[16].mxu1 }
 0x228   :  { %4132 = vst [vmem:[#allocation32_spill] sm:$0xff] %v2909_v1  ;;  %v669_v57 = vadd.f32 %v668_v21, %v2809_v15  ;;  %v2912_v3 = vpop.f32.mrb[17].mxu1  ;;  %v2917_v6 = vsel %vm845_vm0, %v2909_v1, -3.4028235e+38 }
 0x229   :  { %4133 = vst [vmem:[#allocation33_spill] sm:$0xff] %v2912_v3  ;;  %v900_v7 = vsel %vm878_vm1, %v2917_v6, -inf }
 0x22a   :  { %v2922_v18 = vadd.f32 %v669_v57, %v2735_v31  ;;  %901 = vmax.xlane.f32.xlu1 %v900_v7 }
 0x22b   :  { %v674_v26 = vpop.f32.mrb[18].mxu1 }
 0x22c   :  { %4134 = vst [vmem:[#allocation34_spill] sm:$0xff] %v2922_v18  ;;  %v675_v11 = vadd.f32 %v674_v26, %v2809_v15  ;;  %v2925_v24 = vpop.f32.mrb[19].mxu1  ;;  %v2930_v53 = vsel %vm845_vm0, %v2922_v18, -3.4028235e+38 }
 0x22d   :  { %4135 = vst [vmem:[#allocation35_spill] sm:$0xff] %v2925_v24  ;;  %v903_v16 = vsel %vm878_vm1, %v2930_v53, -inf }
 0x22e   :  { %v2935_v42 = vadd.f32 %v675_v11, %v2738_v36  ;;  %904 = vmax.xlane.f32.xlu0 %v903_v16 }
 0x22f   :  { %v680_v31 = vpop.f32.mrb[20].mxu1 }
 0x230   :  { %4136 = vst [vmem:[#allocation36_spill] sm:$0xff] %v2935_v42  ;;  %v681_v50 = vadd.f32 %v680_v31, %v2809_v15  ;;  %v2938_v21 = vpop.f32.mrb[21].mxu1  ;;  %v2943_v57 = vsel %vm845_vm0, %v2935_v42, -3.4028235e+38 }
 0x231   :  { %4137 = vst [vmem:[#allocation37_spill] sm:$0xff] %v2938_v21  ;;  %v906_v7 = vsel %vm878_vm1, %v2943_v57, -inf }
 0x232   :  { %v2948_v26 = vadd.f32 %v681_v50, %v2741_v41  ;;  %907 = vmax.xlane.f32.xlu1 %v906_v7 }
 0x233   :  { %v686_v36 = vpop.f32.mrb[22].mxu1 }
 0x234   :  { %4138 = vst [vmem:[#allocation38_spill] sm:$0xff] %v2948_v26  ;;  %v687_v11 = vadd.f32 %v686_v36, %v2809_v15  ;;  %v2951_v16 = vpop.f32.mrb[23].mxu1  ;;  %v2956_v31 = vsel %vm845_vm0, %v2948_v26, -3.4028235e+38 }
 0x235   :  { %4139 = vst [vmem:[#allocation39_spill] sm:$0xff] %v2951_v16  ;;  %v909_v0 = vsel %vm878_vm1, %v2956_v31, -inf }
 0x236   :  { %v2961_v21 = vadd.f32 %v687_v11, %v2744_v46  ;;  %910 = vmax.xlane.f32.xlu0 %v909_v0 }
 0x237   :  { %v692_v41 = vpop.f32.mrb[24].mxu1 }
 0x238   :  { %4140 = vst [vmem:[#allocation40_spill] sm:$0xff] %v2961_v21  ;;  %v693_v50 = vadd.f32 %v692_v41, %v2809_v15  ;;  %v2964_v7 = vpop.f32.mrb[25].mxu1  ;;  %v2969_v36 = vsel %vm845_vm0, %v2961_v21, -3.4028235e+38 }
 0x239   :  { %4141 = vst [vmem:[#allocation41_spill] sm:$0xff] %v2964_v7  ;;  %v912_v16 = vsel %vm878_vm1, %v2969_v36, -inf }
 0x23a   :  { %v2974_v3 = vadd.f32 %v693_v50, %v2747_v52  ;;  %913 = vmax.xlane.f32.xlu1 %v912_v16 }
 0x23b   :  { %v698_v46 = vpop.f32.mrb[26].mxu1 }
 0x23c   :  { %4142 = vst [vmem:[#allocation42_spill] sm:$0xff] %v2974_v3  ;;  %v699_v0 = vadd.f32 %v698_v46, %v2809_v15  ;;  %v2977_v11 = vpop.f32.mrb[27].mxu1  ;;  %v2982_v41 = vsel %vm845_vm0, %v2974_v3, -3.4028235e+38 }
 0x23d   :  { %4143 = vst [vmem:[#allocation43_spill] sm:$0xff] %v2977_v11  ;;  %v915_v7 = vsel %vm878_vm1, %v2982_v41, -inf }
 0x23e   :  { %v2987_v24 = vadd.f32 %v699_v0, %v2750_v58  ;;  %916 = vmax.xlane.f32.xlu0 %v915_v7 }
 0x23f   :  { %v704_v52 = vpop.f32.mrb[28].mxu1 }
 0x240   :  { %4144 = vst [vmem:[#allocation44_spill] sm:$0xff] %v2987_v24  ;;  %v705_v16 = vadd.f32 %v704_v52, %v2809_v15  ;;  %v2990_v50 = vpop.f32.mrb[29].mxu1  ;;  %v2995_v46 = vsel %vm845_vm0, %v2987_v24, -3.4028235e+38 }
 0x241   :  { %4145 = vst [vmem:[#allocation45_spill] sm:$0xff] %v2990_v50  ;;  %v918_v11 = vsel %vm878_vm1, %v2995_v46, -inf }
 0x242   :  { %v3000_v25 = vadd.f32 %v705_v16, %v2753_v2  ;;  %919 = vmax.xlane.f32.xlu1 %v918_v11 }
 0x243   :  { %v710_v58 = vpop.f32.mrb[30].mxu1 }
 0x244   :  { %4146 = vst [vmem:[#allocation46_spill] sm:$0xff] %v3000_v25  ;;  %v711_v7 = vadd.f32 %v710_v58, %v2809_v15  ;;  %v3003_v0 = vpop.f32.mrb[31].mxu1  ;;  %v3008_v52 = vsel %vm845_vm0, %v3000_v25, -3.4028235e+38 }
 0x245   :  { %4147 = vst [vmem:[#allocation47_spill] sm:$0xff] %v3003_v0  ;;  %v921_v50 = vsel %vm878_vm1, %v3008_v52, -inf }
 0x246   :  { %v3013_v59 = vadd.f32 %v711_v7, %v2756_v8  ;;  %922 = vmax.xlane.f32.xlu0 %v921_v50 }
 0x247   :  { %v716_v2 = vpop.f32.mrb[32].mxu1 }
 0x248   :  { %4148 = vst [vmem:[#allocation48_spill] sm:$0xff] %v3013_v59  ;;  %v717_v11 = vadd.f32 %v716_v2, %v2809_v15  ;;  %v3016_v16 = vpop.f32.mrb[33].mxu1  ;;  %v3021_v58 = vsel %vm845_vm0, %v3013_v59, -3.4028235e+38 }
 0x249   :  { %4149 = vst [vmem:[#allocation49_spill] sm:$0xff] %v3016_v16  ;;  %v924_v0 = vsel %vm878_vm1, %v3021_v58, -inf }
 0x24a   :  { %v3026_v60 = vadd.f32 %v717_v11, %v2759_v14  ;;  %925 = vmax.xlane.f32.xlu1 %v924_v0 }
 0x24b   :  { %v722_v8 = vpop.f32.mrb[34].mxu1 }
 0x24c   :  { %4150 = vst [vmem:[#allocation50_spill] sm:$0xff] %v3026_v60  ;;  %v723_v50 = vadd.f32 %v722_v8, %v2809_v15  ;;  %v3029_v7 = vpop.f32.mrb[35].mxu1  ;;  %v3034_v2 = vsel %vm845_vm0, %v3026_v60, -3.4028235e+38 }
 0x24d   :  { %4151 = vst [vmem:[#allocation51_spill] sm:$0xff] %v3029_v7  ;;  %v927_v16 = vsel %vm878_vm1, %v3034_v2, -inf }
 0x24e   :  { %v3039_v10 = vadd.f32 %v723_v50, %v2762_v20  ;;  %928 = vmax.xlane.f32.xlu0 %v927_v16 }
 0x24f   :  { %v728_v14 = vpop.f32.mrb[36].mxu1 }
 0x250   :  { %4152 = vst [vmem:[#allocation52_spill] sm:$0xff] %v3039_v10  ;;  %v729_v0 = vadd.f32 %v728_v14, %v2809_v15  ;;  %v3042_v11 = vpop.f32.mrb[37].mxu1  ;;  %v3047_v8 = vsel %vm845_vm0, %v3039_v10, -3.4028235e+38 }
 0x251   :  { %4153 = vst [vmem:[#allocation53_spill] sm:$0xff] %v3042_v11  ;;  %v930_v7 = vsel %vm878_vm1, %v3047_v8, -inf }
 0x252   :  { %v3052_v38 = vadd.f32 %v729_v0, %v2765_v27  ;;  %931 = vmax.xlane.f32.xlu0 %v930_v7 }
 0x253   :  { %v734_v20 = vpop.f32.mrb[38].mxu1 }
 0x254   :  { %4154 = vst [vmem:[#allocation54_spill] sm:$0xff] %v3052_v38  ;;  %v735_v16 = vadd.f32 %v734_v20, %v2809_v15  ;;  %v3055_v50 = vpop.f32.mrb[39].mxu1  ;;  %v3060_v14 = vsel %vm845_vm0, %v3052_v38, -3.4028235e+38 }
 0x255   :  { %4155 = vst [vmem:[#allocation55_spill] sm:$0xff] %v3055_v50  ;;  %v933_v11 = vsel %vm878_vm1, %v3060_v14, -inf }
 0x256   :  { %v3065_v48 = vadd.f32 %v735_v16, %v2768_v33  ;;  %934 = vmax.xlane.f32.xlu0 %v933_v11 }
 0x257   :  { %v740_v27 = vpop.f32.mrb[40].mxu1 }
 0x258   :  { %4156 = vst [vmem:[#allocation56_spill] sm:$0xff] %v3065_v48  ;;  %v741_v7 = vadd.f32 %v740_v27, %v2809_v15  ;;  %v3068_v0 = vpop.f32.mrb[41].mxu1  ;;  %v3073_v20 = vsel %vm845_vm0, %v3065_v48, -3.4028235e+38 }
 0x259   :  { %4157 = vst [vmem:[#allocation57_spill] sm:$0xff] %v3068_v0  ;;  %v936_v50 = vsel %vm878_vm1, %v3073_v20, -inf }
 0x25a   :  { %v3078_v19 = vadd.f32 %v741_v7, %v2771_v39  ;;  %937 = vmax.xlane.f32.xlu0 %v936_v50 }
 0x25b   :  { %v746_v33 = vpop.f32.mrb[42].mxu1 }
 0x25c   :  { %4158 = vst [vmem:[#allocation58_spill] sm:$0xff] %v3078_v19  ;;  %v747_v11 = vadd.f32 %v746_v33, %v2809_v15  ;;  %v3081_v16 = vpop.f32.mrb[43].mxu1  ;;  %v3086_v27 = vsel %vm845_vm0, %v3078_v19, -3.4028235e+38 }
 0x25d   :  { %4159 = vst [vmem:[#allocation59_spill] sm:$0xff] %v3081_v16  ;;  %v939_v0 = vsel %vm878_vm1, %v3086_v27, -inf }
 0x25e   :  { %v3091_v28 = vadd.f32 %v747_v11, %v2774_v45  ;;  %940 = vmax.xlane.f32.xlu0 %v939_v0 }
 0x25f   :  { %v752_v39 = vpop.f32.mrb[44].mxu1 }
 0x260   :  { %4160 = vst [vmem:[#allocation60_spill] sm:$0xff] %v3091_v28  ;;  %v753_v50 = vadd.f32 %v752_v39, %v2809_v15  ;;  %v3094_v7 = vpop.f32.mrb[45].mxu1  ;;  %v3099_v33 = vsel %vm845_vm0, %v3091_v28, -3.4028235e+38 }
 0x261   :  { %4161 = vst [vmem:[#allocation61_spill] sm:$0xff] %v3094_v7  ;;  %v942_v16 = vsel %vm878_vm1, %v3099_v33, -inf }
 0x262   :  { %v3104_v9 = vadd.f32 %v753_v50, %v2777_v54  ;;  %943 = vmax.xlane.f32.xlu0 %v942_v16 }
 0x263   :  { %v758_v45 = vpop.f32.mrb[46].mxu1 }
 0x264   :  { %4162 = vst [vmem:[#allocation62_spill] sm:$0xff] %v3104_v9  ;;  %v759_v0 = vadd.f32 %v758_v45, %v2809_v15  ;;  %v3107_v11 = vpop.f32.mrb[47].mxu1  ;;  %v3112_v39 = vsel %vm845_vm0, %v3104_v9, -3.4028235e+38 }
 0x265   :  { %4163 = vst [vmem:[#allocation63_spill] sm:$0xff] %v3107_v11  ;;  %v945_v7 = vsel %vm878_vm1, %v3112_v39, -inf }
 0x266   :  { %v3117_v28 = vadd.f32 %v759_v0, %v2780_v61  ;;  %946 = vmax.xlane.f32.xlu0 %v945_v7 }
 0x267   :  { %v764_v54 = vpop.f32.mrb[48].mxu1 }
 0x268   :  { %4164 = vst [vmem:[#allocation64_spill] sm:$0xff] %v3117_v28  ;;  %v765_v16 = vadd.f32 %v764_v54, %v2809_v15  ;;  %v3120_v50 = vpop.f32.mrb[49].mxu1  ;;  %v3125_v45 = vsel %vm845_vm0, %v3117_v28, -3.4028235e+38 }
 0x269   :  { %4165 = vst [vmem:[#allocation65_spill] sm:$0xff] %v3120_v50  ;;  %v948_v11 = vsel %vm878_vm1, %v3125_v45, -inf }
 0x26a   :  { %v3130_v9 = vadd.f32 %v765_v16, %v2783_v5  ;;  %949 = vmax.xlane.f32.xlu0 %v948_v11 }
 0x26b   :  { %v770_v61 = vpop.f32.mrb[50].mxu1 }
 0x26c   :  { %4166 = vst [vmem:[#allocation66_spill] sm:$0xff] %v3130_v9  ;;  %v771_v7 = vadd.f32 %v770_v61, %v2809_v15  ;;  %v3133_v0 = vpop.f32.mrb[51].mxu1  ;;  %v3138_v54 = vsel %vm845_vm0, %v3130_v9, -3.4028235e+38 }
 0x26d   :  { %4167 = vst [vmem:[#allocation67_spill] sm:$0xff] %v3133_v0  ;;  %v951_v50 = vsel %vm878_vm1, %v3138_v54, -inf }
 0x26e   :  { %v3143_v28 = vadd.f32 %v771_v7, %v2786_v13  ;;  %952 = vmax.xlane.f32.xlu1 %v951_v50 }
 0x26f   :  { %v776_v5 = vpop.f32.mrb[52].mxu1 }
 0x270   :  { %4168 = vst [vmem:[#allocation68_spill] sm:$0xff] %v3143_v28  ;;  %v777_v11 = vadd.f32 %v776_v5, %v2809_v15  ;;  %v3146_v16 = vpop.f32.mrb[53].mxu1  ;;  %v3151_v61 = vsel %vm845_vm0, %v3143_v28, -3.4028235e+38 }
 0x271   :  { %4169 = vst [vmem:[#allocation69_spill] sm:$0xff] %v3146_v16  ;;  %v954_v0 = vsel %vm878_vm1, %v3151_v61, -inf }
 0x272   :  { %v3156_v9 = vadd.f32 %v777_v11, %v2789_v22  ;;  %955 = vmax.xlane.f32.xlu1 %v954_v0 }
 0x273   :  { %v782_v13 = vpop.f32.mrb[54].mxu1 }
 0x274   :  { %4170 = vst [vmem:[#allocation70_spill] sm:$0xff] %v3156_v9  ;;  %v783_v50 = vadd.f32 %v782_v13, %v2809_v15  ;;  %v3159_v7 = vpop.f32.mrb[55].mxu1  ;;  %v3164_v5 = vsel %vm845_vm0, %v3156_v9, -3.4028235e+38 }
 0x275   :  { %4171 = vst [vmem:[#allocation71_spill] sm:$0xff] %v3159_v7  ;;  %v957_v16 = vsel %vm878_vm1, %v3164_v5, -inf }
 0x276   :  { %v3169_v28 = vadd.f32 %v783_v50, %v2792_v29  ;;  %958 = vmax.xlane.f32.xlu1 %v957_v16 }
 0x277   :  { %v788_v22 = vpop.f32.mrb[56].mxu1 }
 0x278   :  { %4172 = vst [vmem:[#allocation72_spill] sm:$0xff] %v3169_v28  ;;  %v789_v0 = vadd.f32 %v788_v22, %v2809_v15  ;;  %v3172_v11 = vpop.f32.mrb[57].mxu1  ;;  %v3177_v13 = vsel %vm845_vm0, %v3169_v28, -3.4028235e+38 }
 0x279   :  { %4173 = vst [vmem:[#allocation73_spill] sm:$0xff] %v3172_v11  ;;  %v960_v7 = vsel %vm878_vm1, %v3177_v13, -inf }
 0x27a   :  { %v3182_v9 = vadd.f32 %v789_v0, %v2795_v37  ;;  %961 = vmax.xlane.f32.xlu1 %v960_v7 }
 0x27b   :  { %v794_v29 = vpop.f32.mrb[58].mxu1 }
 0x27c   :  { %4174 = vst [vmem:[#allocation74_spill] sm:$0xff] %v3182_v9  ;;  %v795_v16 = vadd.f32 %v794_v29, %v2809_v15  ;;  %v3185_v50 = vpop.f32.mrb[59].mxu1  ;;  %v3190_v22 = vsel %vm845_vm0, %v3182_v9, -3.4028235e+38 }
 0x27d   :  { %4175 = vst [vmem:[#allocation75_spill] sm:$0xff] %v3185_v50  ;;  %v963_v11 = vsel %vm878_vm1, %v3190_v22, -inf }
 0x27e   :  { %v3195_v28 = vadd.f32 %v795_v16, %v2798_v44  ;;  %964 = vmax.xlane.f32.xlu1 %v963_v11 }
 0x27f   :  { %v800_v37 = vpop.f32.mrb[60].mxu1 }
 0x280   :  { %4176 = vst [vmem:[#allocation76_spill] sm:$0xff] %v3195_v28  ;;  %v801_v7 = vadd.f32 %v800_v37, %v2809_v15  ;;  %v3198_v0 = vpop.f32.mrb[61].mxu1  ;;  %v3203_v29 = vsel %vm845_vm0, %v3195_v28, -3.4028235e+38 }
 0x281   :  { %4177 = vst [vmem:[#allocation77_spill] sm:$0xff] %v3198_v0  ;;  %v966_v50 = vsel %vm878_vm1, %v3203_v29, -inf }
 0x282   :  { %v3208_v9 = vadd.f32 %v801_v7, %v2801_v55  ;;  %967 = vmax.xlane.f32.xlu1 %v966_v50 }
 0x283   :  { %v806_v44 = vpop.f32.mrb[62].mxu1 }
 0x284   :  { %4178 = vst [vmem:[#allocation78_spill] sm:$0xff] %v3208_v9  ;;  %v807_v11 = vadd.f32 %v806_v44, %v2809_v15  ;;  %v3211_v16 = vpop.f32.mrb[63].mxu1  ;;  %v3216_v37 = vsel %vm845_vm0, %v3208_v9, -3.4028235e+38 }
 0x285   :  { %4179 = vst [vmem:[#allocation79_spill] sm:$0xff] %v3211_v16  ;;  %v969_v0 = vsel %vm878_vm1, %v3216_v37, -inf }
 0x286   :  { %v3221_v28 = vadd.f32 %v807_v11, %v2804_v63  ;;  %970 = vmax.xlane.f32.xlu1 %v969_v0 }
 0x288   :  { %4180 = vst [vmem:[#allocation80_spill] sm:$0xff] %v3221_v28  ;;  %v3226_v55 = vsel %vm845_vm0, %v3221_v28, -3.4028235e+38 }
 0x289   :  { %v972_v15 = vsel %vm878_vm1, %v3226_v55, -inf }
 0x28a   :  { %973 = vmax.xlane.f32.xlu1 %v972_v15 }
 0x29b   :  { %v881_v50 = vpop.xlane.xlu0 %880 }
 0x29c   :  { %vm975_vm2 = vcmp.eq.f32.partialorder %v2826_v30, %v881_v50 }
 0x29d   :  { %vm1007_vm3 = vmand %vm845_vm0, %vm975_vm2 }
 0x29e   :  { %v1039_v7 = vsel %vm1007_vm3, %v2811_v17, 32 }
 0x29f   :  { %v884_v63 = vpop.xlane.xlu0 %883  ;;  %v3235_v0 = vsel %vm878_vm1, %v1039_v7, 2147483647 }
 0x2a0   :  { %vm976_vm4 = vcmp.eq.f32.partialorder %v2839_v40, %v884_v63  ;;  %v1073_v44 = vshra.s32 %v3235_v0, 16 }
 0x2a1   :  { %vm1008_vm5 = vmand %vm845_vm0, %vm976_vm4 }
 0x2a2   :  { %v1040_v11 = vsel %vm1008_vm5, %v2811_v17, 32  ;;  %v3242_v15 = vcvt.s32.f32 %v1073_v44 }
 0x2a3   :  { %v887_v30 = vpop.xlane.xlu1 %886  ;;  %v3245_v50 = vsel %vm878_vm1, %v1040_v11, 2147483647 }
 0x2a4   :  { %vm977_vm6 = vcmp.eq.f32.partialorder %v2852_v49, %v887_v30  ;;  %1076 = vmin.xlane.f32.xlu0 %v3242_v15  ;;  %v1088_v7 = vshra.s32 %v3245_v50, 16 }
 0x2a5   :  { %vm1009_vm7 = vmand %vm845_vm0, %vm977_vm6 }
 0x2a6   :  { %v1041_v40 = vsel %vm1009_vm7, %v2811_v17, 32  ;;  %v3253_v63 = vcvt.s32.f32 %v1088_v7 }
 0x2a7   :  { %v890_v16 = vpop.xlane.xlu1 %889  ;;  %v3256_v44 = vsel %vm878_vm1, %v1041_v40, 2147483647 }
 0x2a8   :  { %vm978_vm8 = vcmp.eq.f32.partialorder %v2865_v62, %v890_v16  ;;  %1091 = vmin.xlane.f32.xlu1 %v3253_v63  ;;  %v1103_v49 = vshra.s32 %v3256_v44, 16 }
 0x2a9   :  { %vm1010_vm9 = vmand %vm845_vm0, %vm978_vm8 }
 0x2aa   :  { %v1042_v11 = vsel %vm1010_vm9, %v2811_v17, 32  ;;  %v3264_v30 = vcvt.s32.f32 %v1103_v49 }
 0x2ab   :  { %v893_v28 = vpop.xlane.xlu0 %892  ;;  %v3267_v7 = vsel %vm878_vm1, %v1042_v11, 2147483647 }
 0x2ac   :  { %vm979_vm10 = vcmp.eq.f32.partialorder %v2878_v12, %v893_v28  ;;  %1106 = vmin.xlane.f32.xlu0 %v3264_v30  ;;  %v1118_v62 = vshra.s32 %v3267_v7, 16 }
 0x2ad   :  { %vm1011_vm11 = vmand %vm845_vm0, %vm979_vm10 }
 0x2ae   :  { %v1043_v16 = vsel %vm1011_vm11, %v2811_v17, 32  ;;  %v3275_v40 = vcvt.s32.f32 %v1118_v62 }
 0x2af   :  { %v896_v9 = vpop.xlane.xlu1 %895  ;;  %v3278_v49 = vsel %vm878_vm1, %v1043_v16, 2147483647 }
 0x2b0   :  { %vm980_vm12 = vcmp.eq.f32.partialorder %v2891_v32, %v896_v9  ;;  %1121 = vmin.xlane.f32.xlu1 %v3275_v40  ;;  %v1133_v28 = vshra.s32 %v3278_v49, 16 }
 0x2b1   :  { %vm1012_vm13 = vmand %vm845_vm0, %vm980_vm12 }
 0x2b2   :  { %v1044_v12 = vsel %vm1012_vm13, %v2811_v17, 32  ;;  %v3286_v11 = vcvt.s32.f32 %v1133_v28 }
 0x2b3   :  { %v899_v19 = vpop.xlane.xlu0 %898  ;;  %v3289_v62 = vsel %vm878_vm1, %v1044_v12, 2147483647 }
 0x2b4   :  { %vm981_vm14 = vcmp.eq.f32.partialorder %v2904_v47, %v899_v19  ;;  %1136 = vmin.xlane.f32.xlu0 %v3286_v11  ;;  %v1148_v9 = vshra.s32 %v3289_v62, 16 }
 0x2b5   :  { %vm1013_vm15 = vmand %vm845_vm0, %vm981_vm14 }
 0x2b6   :  { %v1045_v32 = vsel %vm1013_vm15, %v2811_v17, 32  ;;  %v3297_v16 = vcvt.s32.f32 %v1148_v9 }
 0x2b7   :  { %v902_v48 = vpop.xlane.xlu1 %901  ;;  %v3300_v28 = vsel %vm878_vm1, %v1045_v32, 2147483647 }
 0x2b8   :  { %vm982_vm2 = vcmp.eq.f32.partialorder %v2917_v6, %v902_v48  ;;  %1151 = vmin.xlane.f32.xlu1 %v3297_v16  ;;  %v1163_v19 = vshra.s32 %v3300_v28, 16 }
 0x2b9   :  { %vm1014_vm3 = vmand %vm845_vm0, %vm982_vm2 }
 0x2ba   :  { %v1046_v47 = vsel %vm1014_vm3, %v2811_v17, 32  ;;  %v3308_v12 = vcvt.s32.f32 %v1163_v19 }
 0x2bb   :  { %v905_v38 = vpop.xlane.xlu0 %904  ;;  %v3311_v9 = vsel %vm878_vm1, %v1046_v47, 2147483647 }
 0x2bc   :  { %vm983_vm4 = vcmp.eq.f32.partialorder %v2930_v53, %v905_v38  ;;  %1166 = vmin.xlane.f32.xlu0 %v3308_v12  ;;  %v1178_v48 = vshra.s32 %v3311_v9, 16 }
 0x2bd   :  { %vm1015_vm5 = vmand %vm845_vm0, %vm983_vm4 }
 0x2be   :  { %v1047_v6 = vsel %vm1015_vm5, %v2811_v17, 32  ;;  %v3319_v32 = vcvt.s32.f32 %v1178_v48 }
 0x2bf   :  { %v908_v10 = vpop.xlane.xlu1 %907  ;;  %v3322_v19 = vsel %vm878_vm1, %v1047_v6, 2147483647 }
 0x2c0   :  { %vm984_vm6 = vcmp.eq.f32.partialorder %v2943_v57, %v908_v10  ;;  %1181 = vmin.xlane.f32.xlu1 %v3319_v32  ;;  %v1193_v38 = vshra.s32 %v3322_v19, 16 }
 0x2c1   :  { %vm1016_vm7 = vmand %vm845_vm0, %vm984_vm6 }
 0x2c2   :  { %v1048_v53 = vsel %vm1016_vm7, %v2811_v17, 32  ;;  %v3330_v47 = vcvt.s32.f32 %v1193_v38 }
 0x2c3   :  { %v911_v60 = vpop.xlane.xlu0 %910  ;;  %v3333_v48 = vsel %vm878_vm1, %v1048_v53, 2147483647 }
 0x2c4   :  { %vm985_vm8 = vcmp.eq.f32.partialorder %v2956_v31, %v911_v60  ;;  %1196 = vmin.xlane.f32.xlu0 %v3330_v47  ;;  %v1208_v10 = vshra.s32 %v3333_v48, 16 }
 0x2c5   :  { %vm1017_vm9 = vmand %vm845_vm0, %vm985_vm8 }
 0x2c6   :  { %v1049_v57 = vsel %vm1017_vm9, %v2811_v17, 32  ;;  %v3341_v6 = vcvt.s32.f32 %v1208_v10 }
 0x2c7   :  { %v914_v59 = vpop.xlane.xlu1 %913  ;;  %v3344_v38 = vsel %vm878_vm1, %v1049_v57, 2147483647 }
 0x2c8   :  { %vm986_vm10 = vcmp.eq.f32.partialorder %v2969_v36, %v914_v59  ;;  %1211 = vmin.xlane.f32.xlu1 %v3341_v6  ;;  %v1223_v60 = vshra.s32 %v3344_v38, 16 }
 0x2c9   :  { %vm1018_vm11 = vmand %vm845_vm0, %vm986_vm10 }
 0x2ca   :  { %v1050_v31 = vsel %vm1018_vm11, %v2811_v17, 32  ;;  %v3352_v53 = vcvt.s32.f32 %v1223_v60 }
 0x2cb   :  { %v917_v25 = vpop.xlane.xlu0 %916  ;;  %v3355_v10 = vsel %vm878_vm1, %v1050_v31, 2147483647 }
 0x2cc   :  { %vm987_vm12 = vcmp.eq.f32.partialorder %v2982_v41, %v917_v25  ;;  %1226 = vmin.xlane.f32.xlu0 %v3352_v53  ;;  %v1238_v59 = vshra.s32 %v3355_v10, 16 }
 0x2cd   :  { %vm1019_vm13 = vmand %vm845_vm0, %vm987_vm12 }
 0x2ce   :  { %v1051_v36 = vsel %vm1019_vm13, %v2811_v17, 32  ;;  %v3363_v57 = vcvt.s32.f32 %v1238_v59 }
 0x2cf   :  { %v920_v24 = vpop.xlane.xlu1 %919  ;;  %v3366_v60 = vsel %vm878_vm1, %v1051_v36, 2147483647 }
 0x2d0   :  { %vm988_vm14 = vcmp.eq.f32.partialorder %v2995_v46, %v920_v24  ;;  %1241 = vmin.xlane.f32.xlu1 %v3363_v57  ;;  %v1253_v25 = vshra.s32 %v3366_v60, 16 }
 0x2d1   :  { %vm1020_vm15 = vmand %vm845_vm0, %vm988_vm14 }
 0x2d2   :  { %v1052_v41 = vsel %vm1020_vm15, %v2811_v17, 32  ;;  %v3374_v31 = vcvt.s32.f32 %v1253_v25 }
 0x2d3   :  { %v923_v3 = vpop.xlane.xlu0 %922  ;;  %v3377_v59 = vsel %vm878_vm1, %v1052_v41, 2147483647 }
 0x2d4   :  { %vm989_vm2 = vcmp.eq.f32.partialorder %v3008_v52, %v923_v3  ;;  %1256 = vmin.xlane.f32.xlu0 %v3374_v31  ;;  %v1268_v24 = vshra.s32 %v3377_v59, 16 }
 0x2d5   :  { %vm1021_vm3 = vmand %vm845_vm0, %vm989_vm2 }
 0x2d6   :  { %v1053_v46 = vsel %vm1021_vm3, %v2811_v17, 32  ;;  %v3385_v36 = vcvt.s32.f32 %v1268_v24 }
 0x2d7   :  { %v926_v21 = vpop.xlane.xlu1 %925  ;;  %v3388_v25 = vsel %vm878_vm1, %v1053_v46, 2147483647 }
 0x2d8   :  { %vm990_vm4 = vcmp.eq.f32.partialorder %v3021_v58, %v926_v21  ;;  %1271 = vmin.xlane.f32.xlu1 %v3385_v36  ;;  %v1283_v3 = vshra.s32 %v3388_v25, 16 }
 0x2d9   :  { %vm1022_vm5 = vmand %vm845_vm0, %vm990_vm4 }
 0x2da   :  { %v1054_v52 = vsel %vm1022_vm5, %v2811_v17, 32  ;;  %v3396_v41 = vcvt.s32.f32 %v1283_v3 }
 0x2db   :  { %v929_v26 = vpop.xlane.xlu0 %928  ;;  %v3399_v24 = vsel %vm878_vm1, %v1054_v52, 2147483647 }
 0x2dc   :  { %vm991_vm6 = vcmp.eq.f32.partialorder %v3034_v2, %v929_v26  ;;  %1286 = vmin.xlane.f32.xlu0 %v3396_v41  ;;  %v1298_v21 = vshra.s32 %v3399_v24, 16 }
 0x2dd   :  { %vm1023_vm7 = vmand %vm845_vm0, %vm991_vm6 }
 0x2de   :  { %v1055_v58 = vsel %vm1023_vm7, %v2811_v17, 32  ;;  %v3407_v46 = vcvt.s32.f32 %v1298_v21 }
 0x2df   :  { %v932_v42 = vpop.xlane.xlu0 %931  ;;  %v3410_v3 = vsel %vm878_vm1, %v1055_v58, 2147483647 }
 0x2e0   :  { %vm992_vm8 = vcmp.eq.f32.partialorder %v3047_v8, %v932_v42  ;;  %1301 = vmin.xlane.f32.xlu1 %v3407_v46  ;;  %v1313_v26 = vshra.s32 %v3410_v3, 16 }
 0x2e1   :  { %vm1024_vm9 = vmand %vm845_vm0, %vm992_vm8 }
 0x2e2   :  { %v1056_v2 = vsel %vm1024_vm9, %v2811_v17, 32  ;;  %v3418_v52 = vcvt.s32.f32 %v1313_v26 }
 0x2e3   :  { %v935_v18 = vpop.xlane.xlu0 %934  ;;  %v3421_v21 = vsel %vm878_vm1, %v1056_v2, 2147483647 }
 0x2e4   :  { %vm993_vm10 = vcmp.eq.f32.partialorder %v3060_v14, %v935_v18  ;;  %1316 = vmin.xlane.f32.xlu0 %v3418_v52  ;;  %v1328_v42 = vshra.s32 %v3421_v21, 16 }
 0x2e5   :  { %vm1025_vm11 = vmand %vm845_vm0, %vm993_vm10 }
 0x2e6   :  { %v1057_v8 = vsel %vm1025_vm11, %v2811_v17, 32  ;;  %v3429_v58 = vcvt.s32.f32 %v1328_v42 }
 0x2e7   :  { %v938_v1 = vpop.xlane.xlu0 %937  ;;  %v3432_v26 = vsel %vm878_vm1, %v1057_v8, 2147483647 }
 0x2e8   :  { %vm994_vm12 = vcmp.eq.f32.partialorder %v3073_v20, %v938_v1  ;;  %1331 = vmin.xlane.f32.xlu0 %v3429_v58  ;;  %v1343_v18 = vshra.s32 %v3432_v26, 16 }
 0x2e9   :  { %vm1026_vm13 = vmand %vm845_vm0, %vm994_vm12 }
 0x2ea   :  { %v1058_v14 = vsel %vm1026_vm13, %v2811_v17, 32  ;;  %v3440_v2 = vcvt.s32.f32 %v1343_v18 }
 0x2eb   :  { %v941_v35 = vpop.xlane.xlu0 %940  ;;  %v3443_v42 = vsel %vm878_vm1, %v1058_v14, 2147483647 }
 0x2ec   :  { %vm995_vm14 = vcmp.eq.f32.partialorder %v3086_v27, %v941_v35  ;;  %1346 = vmin.xlane.f32.xlu0 %v3440_v2  ;;  %v1358_v1 = vshra.s32 %v3443_v42, 16 }
 0x2ed   :  { %vm1027_vm15 = vmand %vm845_vm0, %vm995_vm14 }
 0x2ee   :  { %v1059_v20 = vsel %vm1027_vm15, %v2811_v17, 32  ;;  %v3451_v8 = vcvt.s32.f32 %v1358_v1 }
 0x2ef   :  { %v944_v51 = vpop.xlane.xlu0 %943  ;;  %v3454_v18 = vsel %vm878_vm1, %v1059_v20, 2147483647 }
 0x2f0   :  { %vm996_vm2 = vcmp.eq.f32.partialorder %v3099_v33, %v944_v51  ;;  %1361 = vmin.xlane.f32.xlu0 %v3451_v8  ;;  %v1373_v35 = vshra.s32 %v3454_v18, 16 }
 0x2f1   :  { %vm1028_vm3 = vmand %vm845_vm0, %vm996_vm2 }
 0x2f2   :  { %v1060_v27 = vsel %vm1028_vm3, %v2811_v17, 32  ;;  %v3462_v14 = vcvt.s32.f32 %v1373_v35 }
 0x2f3   :  { %v947_v4 = vpop.xlane.xlu0 %946  ;;  %v3465_v1 = vsel %vm878_vm1, %v1060_v27, 2147483647 }
 0x2f4   :  { %vm997_vm4 = vcmp.eq.f32.partialorder %v3112_v39, %v947_v4  ;;  %1376 = vmin.xlane.f32.xlu0 %v3462_v14  ;;  %v1388_v51 = vshra.s32 %v3465_v1, 16 }
 0x2f5   :  { %vm1029_vm5 = vmand %vm845_vm0, %vm997_vm4 }
 0x2f6   :  { %v1061_v33 = vsel %vm1029_vm5, %v2811_v17, 32  ;;  %v3473_v20 = vcvt.s32.f32 %v1388_v51 }
 0x2f7   :  { %v950_v56 = vpop.xlane.xlu0 %949  ;;  %v3476_v35 = vsel %vm878_vm1, %v1061_v33, 2147483647 }
 0x2f8   :  { %vm998_vm6 = vcmp.eq.f32.partialorder %v3125_v45, %v950_v56  ;;  %1391 = vmin.xlane.f32.xlu0 %v3473_v20  ;;  %v1403_v4 = vshra.s32 %v3476_v35, 16 }
 0x2f9   :  { %vm1030_vm7 = vmand %vm845_vm0, %vm998_vm6 }
 0x2fa   :  { %v1062_v39 = vsel %vm1030_vm7, %v2811_v17, 32  ;;  %v3484_v27 = vcvt.s32.f32 %v1403_v4 }
 0x2fb   :  { %v953_v43 = vpop.xlane.xlu1 %952  ;;  %v3487_v51 = vsel %vm878_vm1, %v1062_v39, 2147483647 }
 0x2fc   :  { %vm999_vm8 = vcmp.eq.f32.partialorder %v3138_v54, %v953_v43  ;;  %1406 = vmin.xlane.f32.xlu0 %v3484_v27  ;;  %v1418_v56 = vshra.s32 %v3487_v51, 16 }
 0x2fd   :  { %vm1031_vm9 = vmand %vm845_vm0, %vm999_vm8 }
 0x2fe   :  { %v1063_v45 = vsel %vm1031_vm9, %v2811_v17, 32  ;;  %v3495_v33 = vcvt.s32.f32 %v1418_v56 }
 0x2ff   :  { %v956_v34 = vpop.xlane.xlu1 %955  ;;  %v3498_v4 = vsel %vm878_vm1, %v1063_v45, 2147483647 }
 0x300   :  { %4181 = vst [vmem:[#allocation81_spill] sm:$0xff] %v3495_v33  ;;  %vm1000_vm10 = vcmp.eq.f32.partialorder %v3151_v61, %v956_v34  ;;  %1421 = vmin.xlane.f32.xlu0 %v3495_v33  ;;  %v1433_v43 = vshra.s32 %v3498_v4, 16 }
 0x301   :  { %vm1032_vm11 = vmand %vm845_vm0, %vm1000_vm10 }
 0x302   :  { %v1064_v54 = vsel %vm1032_vm11, %v2811_v17, 32  ;;  %v3506_v39 = vcvt.s32.f32 %v1433_v43 }
 0x303   :  { %v959_v23 = vpop.xlane.xlu1 %958  ;;  %v3509_v56 = vsel %vm878_vm1, %v1064_v54, 2147483647 }
 0x304   :  { %4182 = vst [vmem:[#allocation82_spill] sm:$0xff] %v3506_v39  ;;  %vm1001_vm12 = vcmp.eq.f32.partialorder %v3164_v5, %v959_v23  ;;  %1436 = vmin.xlane.f32.xlu1 %v3506_v39  ;;  %v1448_v34 = vshra.s32 %v3509_v56, 16 }
 0x305   :  { %vm1033_vm13 = vmand %vm845_vm0, %vm1001_vm12 }
 0x306   :  { %v1065_v61 = vsel %vm1033_vm13, %v2811_v17, 32  ;;  %v3517_v45 = vcvt.s32.f32 %v1448_v34 }
 0x307   :  { %v962_v33 = vpop.xlane.xlu1 %961  ;;  %v3520_v43 = vsel %vm878_vm1, %v1065_v61, 2147483647 }
 0x308   :  { %4183 = vst [vmem:[#allocation83_spill] sm:$0xff] %v3517_v45  ;;  %vm1002_vm14 = vcmp.eq.f32.partialorder %v3177_v13, %v962_v33  ;;  %1451 = vmin.xlane.f32.xlu1 %v3517_v45  ;;  %v1463_v23 = vshra.s32 %v3520_v43, 16 }
 0x309   :  { %vm1034_vm15 = vmand %vm845_vm0, %vm1002_vm14 }
 0x30a   :  { %v1066_v5 = vsel %vm1034_vm15, %v2811_v17, 32  ;;  %v3528_v54 = vcvt.s32.f32 %v1463_v23 }
 0x30b   :  { %v965_v39 = vpop.xlane.xlu1 %964  ;;  %v3531_v34 = vsel %vm878_vm1, %v1066_v5, 2147483647 }
 0x30c   :  { %4184 = vst [vmem:[#allocation84_spill] sm:$0xff] %v3528_v54  ;;  %vm1003_vm2 = vcmp.eq.f32.partialorder %v3190_v22, %v965_v39  ;;  %1466 = vmin.xlane.f32.xlu1 %v3528_v54  ;;  %v1478_v13 = vshra.s32 %v3531_v34, 16 }
 0x30d   :  { %vm1035_vm3 = vmand %vm845_vm0, %vm1003_vm2 }
 0x30e   :  { %v1067_v33 = vsel %vm1035_vm3, %v2811_v17, 32  ;;  %v3539_v61 = vcvt.s32.f32 %v1478_v13 }
 0x30f   :  { %v968_v45 = vpop.xlane.xlu1 %967  ;;  %v3542_v23 = vsel %vm878_vm1, %v1067_v33, 2147483647 }
 0x310   :  { %4185 = vst [vmem:[#allocation85_spill] sm:$0xff] %v3539_v61  ;;  %4186 = vst [vmem:[#allocation86_spill] sm:$0xff] %v3542_v23  ;;  %vm1004_vm4 = vcmp.eq.f32.partialorder %v3203_v29, %v968_v45  ;;  %1481 = vmin.xlane.f32.xlu1 %v3539_v61  ;;  %v1493_v22 = vshra.s32 %v3542_v23, 16 }
 0x311   :  { %vm1036_vm5 = vmand %vm845_vm0, %vm1004_vm4 }
 0x312   :  { %v1068_v39 = vsel %vm1036_vm5, %v2811_v17, 32  ;;  %v3550_v5 = vcvt.s32.f32 %v1493_v22 }
 0x313   :  { %v971_v54 = vpop.xlane.xlu1 %970  ;;  %v3553_v13 = vsel %vm878_vm1, %v1068_v39, 2147483647  ;;  %v1648_v39 = vld [vmem:[#allocation7 + $0x320] sm:$0xff] }
 0x314   :  { %4187 = vst [vmem:[#allocation87_spill] sm:$0xff] %v3550_v5  ;;  %4188 = vst [vmem:[#allocation88_spill] sm:$0xff] %v3553_v13  ;;  %vm1005_vm6 = vcmp.eq.f32.partialorder %v3216_v37, %v971_v54  ;;  %1496 = vmin.xlane.f32.xlu1 %v3550_v5  ;;  %v1508_v29 = vshra.s32 %v3553_v13, 16  ;;  %v1647_v54 = vld [vmem:[#allocation7 + $0x310] sm:$0xff] }
 0x315   :  { %vm1037_vm7 = vmand %vm845_vm0, %vm1005_vm6  ;;  %v2451_v5 = vpack.c.bf16 %v1648_v39, %v1647_v54 }
 0x316   :  { %v1069_v45 = vsel %vm1037_vm7, %v2811_v17, 32  ;;  %v3561_v33 = vcvt.s32.f32 %v1508_v29 }
 0x317   :  { %v974_v61 = vpop.xlane.xlu1 %973  ;;  %v3564_v22 = vsel %vm878_vm1, %v1069_v45, 2147483647  ;;  %2452 = vmatprep.subr.bf16.mxu0 %v2451_v5  ;;  %2459 = vmatprep.subr.bf16.mxu1 %v2451_v5  ;;  %v1072_v45 = vand.u32 65535, %v3235_v0 }
 0x318   :  { %vm1006_vm8 = vcmp.eq.f32.partialorder %v3226_v55, %v974_v61  ;;  %1511 = vmin.xlane.f32.xlu1 %v3561_v33  ;;  %v1523_v37 = vshra.s32 %v3564_v22, 16  ;;  %2454 = vmatpush3.bf16.msra.mxu0 %v2451_v5 }
 0x319   :  { %vm1038_vm9 = vmand %vm845_vm0, %vm1006_vm8  ;;  %2461 = vmatpush3.bf16.msra.mxu1 %v2451_v5  ;;  %v1102_v5 = vand.u32 65535, %v3256_v44  ;;  %v1132_v44 = vand.u32 65535, %v3278_v49  ;;  %v1162_v49 = vand.u32 65535, %v3300_v28 }
 0x31a   :  { %v1070_v13 = vsel %vm1038_vm9, %v2811_v17, 32  ;;  %v3572_v29 = vcvt.s32.f32 %v1523_v37  ;;  %v1074_v37 = vcvt.s32.f32 %v1072_v45 }
 0x31b   :  { %v3575_v23 = vsel %vm878_vm1, %v1070_v13, 2147483647  ;;  %v1087_v13 = vand.u32 65535, %v3245_v50  ;;  %v1104_v45 = vcvt.s32.f32 %v1102_v5  ;;  %v1117_v50 = vand.u32 65535, %v3267_v7 }
 0x31c   :  { %4189 = vst [vmem:[#allocation89_spill] sm:$0xff] %v3572_v29  ;;  %1526 = vmin.xlane.f32.xlu1 %v3572_v29  ;;  %v1538_v55 = vshra.s32 %v3575_v23, 16  ;;  %v1147_v7 = vand.u32 65535, %v3289_v62 }
 0x31d   :  { %v1089_v29 = vcvt.s32.f32 %v1087_v13  ;;  %v1119_v13 = vcvt.s32.f32 %v1117_v50  ;;  %v1650_v50 = vld [vmem:[#allocation7 + $0x340] sm:$0xff] }
 0x31e   :  { %v3579_v61 = vcvt.s32.f32 %v1538_v55 }
 0x320   :  { %1541 = vmin.xlane.f32.xlu1 %v3579_v61 }
 0x331   :  { %v3583_v54 = vpop.xlane.xlu0 %1076 }
 0x332   :  { %vm1078_vm0 = vcmp.eq.f32.partialorder %v3242_v15, %v3583_v54 }
 0x333   :  { %v1079_v39 = vsel %vm1078_vm0, %v1074_v37, inf }
 0x334   :  { %1080 = vmin.xlane.f32.xlu0 %v1079_v39  ;;  %v1134_v39 = vcvt.s32.f32 %v1132_v44 }
 0x335   :  { %v3588_v17 = vpop.xlane.xlu1 %1091 }
 0x336   :  { %vm1093_vm10 = vcmp.eq.f32.partialorder %v3253_v63, %v3588_v17 }
 0x337   :  { %v1094_v55 = vsel %vm1093_vm10, %v1089_v29, inf }
 0x338   :  { %1095 = vmin.xlane.f32.xlu1 %v1094_v55  ;;  %v1149_v55 = vcvt.s32.f32 %v1147_v7 }
 0x339   :  { %v3593_v0 = vpop.xlane.xlu0 %1106 }
 0x33a   :  { %vm1108_vm11 = vcmp.eq.f32.partialorder %v3264_v30, %v3593_v0 }
 0x33b   :  { %v1109_v15 = vsel %vm1108_vm11, %v1104_v45, inf  ;;  %v1649_v45 = vld [vmem:[#allocation7 + $0x330] sm:$0xff] }
 0x33c   :  { %1110 = vmin.xlane.f32.xlu0 %v1109_v15 }
 0x33d   :  { %v3598_v37 = vpop.xlane.xlu1 %1121 }
 0x33e   :  { %vm1123_vm12 = vcmp.eq.f32.partialorder %v3275_v40, %v3598_v37  ;;  %v2455_v40 = vpack.c.bf16 %v1650_v50, %v1649_v45 }
 0x33f   :  { %v1124_v63 = vsel %vm1123_vm12, %v1119_v13, inf  ;;  %v1164_v13 = vcvt.s32.f32 %v1162_v49 }
 0x340   :  { %1125 = vmin.xlane.f32.xlu1 %v1124_v63  ;;  %2456 = vmatprep.subr.bf16.mxu0 %v2455_v40  ;;  %v1192_v63 = vand.u32 65535, %v3322_v19  ;;  %v1222_v19 = vand.u32 65535, %v3344_v38  ;;  %v1252_v38 = vand.u32 65535, %v3366_v60  ;;  %v1282_v60 = vand.u32 65535, %v3388_v25 }
 0x341   :  { %v3603_v29 = vpop.xlane.xlu0 %1136  ;;  %2458 = vmatpush3.bf16.msra.mxu0 %v2455_v40  ;;  %2460 = vmatprep.subr.bf16.mxu1 %v2455_v40  ;;  %v1312_v25 = vand.u32 65535, %v3410_v3  ;;  %v1342_v3 = vand.u32 65535, %v3432_v26  ;;  %v1372_v26 = vand.u32 65535, %v3454_v18  ;;  %v1402_v18 = vand.u32 65535, %v3476_v35 }
 0x342   :  { %vm1138_vm13 = vcmp.eq.f32.partialorder %v3286_v11, %v3603_v29  ;;  %v1177_v11 = vand.u32 65535, %v3311_v9  ;;  %2462 = vmatpush3.bf16.msra.mxu1 %v2455_v40  ;;  %v1194_v9 = vcvt.s32.f32 %v1192_v63  ;;  %v1224_v50 = vcvt.s32.f32 %v1222_v19 }
 0x343   :  { %v1139_v30 = vsel %vm1138_vm13, %v1134_v39, inf  ;;  %v1432_v35 = vand.u32 65535, %v3498_v4  ;;  %v1462_v4 = vand.u32 65535, %v3520_v43 }
 0x344   :  { %1140 = vmin.xlane.f32.xlu0 %v1139_v30  ;;  %v1207_v30 = vand.u32 65535, %v3333_v48  ;;  %v1237_v48 = vand.u32 65535, %v3355_v10  ;;  %v1267_v10 = vand.u32 65535, %v3377_v59  ;;  %v1297_v59 = vand.u32 65535, %v3399_v24 }
 0x345   :  { %v3608_v5 = vpop.xlane.xlu1 %1151  ;;  %v1327_v24 = vand.u32 65535, %v3421_v21  ;;  %v1357_v21 = vand.u32 65535, %v3443_v42  ;;  %v1387_v42 = vand.u32 65535, %v3465_v1  ;;  %v1417_v1 = vand.u32 65535, %v3487_v51 }
 0x346   :  { %vm1153_vm14 = vcmp.eq.f32.partialorder %v3297_v16, %v3608_v5  ;;  %v1179_v16 = vcvt.s32.f32 %v1177_v11  ;;  %v1209_v49 = vcvt.s32.f32 %v1207_v30  ;;  %v1254_v11 = vcvt.s32.f32 %v1252_v38 }
 0x347   :  { %v1154_v15 = vsel %vm1153_vm14, %v1149_v55, inf  ;;  %v1299_v30 = vcvt.s32.f32 %v1297_v59  ;;  %v1447_v51 = vand.u32 65535, %v3509_v56  ;;  %v1477_v56 = vand.u32 65535, %v3531_v34 }
 0x348   :  { %1155 = vmin.xlane.f32.xlu1 %v1154_v15  ;;  %v1239_v15 = vcvt.s32.f32 %v1237_v48  ;;  %v1344_v48 = vcvt.s32.f32 %v1342_v3  ;;  %v4193_v3 = vld [vmem:[#allocation84_spill] sm:$0xff] }
 0x349   :  { %v3613_v62 = vpop.xlane.xlu0 %1166 }
 0x34a   :  { %vm1168_vm15 = vcmp.eq.f32.partialorder %v3308_v12, %v3613_v62 }
 0x34b   :  { %v1169_v28 = vsel %vm1168_vm15, %v1164_v13, inf }
 0x34c   :  { %1170 = vmin.xlane.f32.xlu0 %v1169_v28 }
 0x34d   :  { %v3618_v44 = vpop.xlane.xlu1 %1181 }
 0x34e   :  { %vm1183_vm2 = vcmp.eq.f32.partialorder %v3319_v32, %v3618_v44 }
 0x34f   :  { %v1184_v39 = vsel %vm1183_vm2, %v1179_v16, inf  ;;  %v1269_v16 = vcvt.s32.f32 %v1267_v10  ;;  %v1389_v10 = vcvt.s32.f32 %v1387_v42  ;;  %v4196_v42 = vld [vmem:[#allocation88_spill] sm:$0xff] }
 0x350   :  { %1185 = vmin.xlane.f32.xlu1 %v1184_v39  ;;  %v1284_v39 = vcvt.s32.f32 %v1282_v60  ;;  %v1507_v34 = vand.u32 65535, %v4196_v42 }
 0x351   :  { %v3623_v7 = vpop.xlane.xlu0 %1196 }
 0x352   :  { %vm1198_vm3 = vcmp.eq.f32.partialorder %v3330_v47, %v3623_v7 }
 0x353   :  { %v1199_v12 = vsel %vm1198_vm3, %v1194_v9, inf }
 0x354   :  { %1200 = vmin.xlane.f32.xlu0 %v1199_v12 }
 0x355   :  { %v3628_v55 = vpop.xlane.xlu1 %1211 }
 0x356   :  { %vm1213_vm4 = vcmp.eq.f32.partialorder %v3341_v6, %v3628_v55 }
 0x357   :  { %v1214_v32 = vsel %vm1213_vm4, %v1209_v49, inf  ;;  %v1314_v49 = vcvt.s32.f32 %v1312_v25 }
 0x358   :  { %1215 = vmin.xlane.f32.xlu1 %v1214_v32  ;;  %v1329_v32 = vcvt.s32.f32 %v1327_v24 }
 0x359   :  { %v3633_v45 = vpop.xlane.xlu0 %1226 }
 0x35a   :  { %vm1228_vm5 = vcmp.eq.f32.partialorder %v3352_v53, %v3633_v45 }
 0x35b   :  { %v1229_v47 = vsel %vm1228_vm5, %v1224_v50, inf }
 0x35c   :  { %1230 = vmin.xlane.f32.xlu0 %v1229_v47 }
 0x35d   :  { %v3638_v40 = vpop.xlane.xlu1 %1241 }
 0x35e   :  { %vm1243_vm6 = vcmp.eq.f32.partialorder %v3363_v57, %v3638_v40 }
 0x35f   :  { %v1244_v6 = vsel %vm1243_vm6, %v1239_v15, inf  ;;  %v1359_v15 = vcvt.s32.f32 %v1357_v21  ;;  %v1479_v21 = vcvt.s32.f32 %v1477_v56 }
 0x360   :  { %1245 = vmin.xlane.f32.xlu1 %v1244_v6  ;;  %v1374_v6 = vcvt.s32.f32 %v1372_v26 }
 0x361   :  { %v3643_v13 = vpop.xlane.xlu0 %1256 }
 0x362   :  { %vm1258_vm7 = vcmp.eq.f32.partialorder %v3374_v31, %v3643_v13 }
 0x363   :  { %v1259_v53 = vsel %vm1258_vm7, %v1254_v11, inf }
 0x364   :  { %1260 = vmin.xlane.f32.xlu0 %v1259_v53 }
 0x365   :  { %v3648_v28 = vpop.xlane.xlu1 %1271 }
 0x366   :  { %vm1273_vm8 = vcmp.eq.f32.partialorder %v3385_v36, %v3648_v28 }
 0x367   :  { %v1274_v57 = vsel %vm1273_vm8, %v1269_v16, inf  ;;  %v1404_v16 = vcvt.s32.f32 %v1402_v18 }
 0x368   :  { %1275 = vmin.xlane.f32.xlu1 %v1274_v57  ;;  %v1419_v57 = vcvt.s32.f32 %v1417_v1 }
 0x369   :  { %v3653_v63 = vpop.xlane.xlu0 %1286 }
 0x36a   :  { %vm1288_vm9 = vcmp.eq.f32.partialorder %v3396_v41, %v3653_v63 }
 0x36b   :  { %v1289_v31 = vsel %vm1288_vm9, %v1284_v39, inf  ;;  %v4190_v39 = vld [vmem:[#allocation81_spill] sm:$0xff] }
 0x36c   :  { %1290 = vmin.xlane.f32.xlu0 %v1289_v31  ;;  %v1434_v31 = vcvt.s32.f32 %v1432_v35  ;;  %v1537_v35 = vand.u32 65535, %v3575_v23 }
 0x36d   :  { %v3658_v9 = vpop.xlane.xlu1 %1301 }
 0x36e   :  { %vm1303_vm0 = vcmp.eq.f32.partialorder %v3407_v46, %v3658_v9 }
 0x36f   :  { %v1304_v36 = vsel %vm1303_vm0, %v1299_v30, inf  ;;  %v4191_v30 = vld [vmem:[#allocation82_spill] sm:$0xff] }
 0x370   :  { %1305 = vmin.xlane.f32.xlu1 %v1304_v36  ;;  %v1449_v36 = vcvt.s32.f32 %v1447_v51  ;;  %v1539_v51 = vcvt.s32.f32 %v1537_v35 }
 0x371   :  { %v3663_v12 = vpop.xlane.xlu0 %1316 }
 0x372   :  { %vm1318_vm10 = vcmp.eq.f32.partialorder %v3418_v52, %v3663_v12 }
 0x373   :  { %v1319_v41 = vsel %vm1318_vm10, %v1314_v49, inf  ;;  %v4192_v49 = vld [vmem:[#allocation83_spill] sm:$0xff] }
 0x374   :  { %1320 = vmin.xlane.f32.xlu0 %v1319_v41 }
 0x375   :  { %v3668_v19 = vpop.xlane.xlu0 %1331 }
 0x376   :  { %vm1333_vm11 = vcmp.eq.f32.partialorder %v3429_v58, %v3668_v19 }
 0x377   :  { %v1334_v46 = vsel %vm1333_vm11, %v1329_v32, inf  ;;  %v1464_v32 = vcvt.s32.f32 %v1462_v4 }
 0x378   :  { %1335 = vmin.xlane.f32.xlu0 %v1334_v46 }
 0x379   :  { %v3673_v50 = vpop.xlane.xlu0 %1346 }
 0x37a   :  { %vm1348_vm12 = vcmp.eq.f32.partialorder %v3440_v2, %v3673_v50 }
 0x37b   :  { %v1349_v52 = vsel %vm1348_vm12, %v1344_v48, inf }
 0x37c   :  { %1350 = vmin.xlane.f32.xlu0 %v1349_v52  ;;  %v4194_v52 = vld [vmem:[#allocation86_spill] sm:$0xff] }
 0x37d   :  { %v3678_v47 = vpop.xlane.xlu0 %1361  ;;  %v1492_v43 = vand.u32 65535, %v4194_v52  ;;  %v4201_v52 = vld [vmem:[#allocation18_spill] sm:$0xff] }
 0x37e   :  { %vm1363_vm13 = vcmp.eq.f32.partialorder %v3451_v8, %v3678_v47 }
 0x37f   :  { %v1364_v58 = vsel %vm1363_vm13, %v1359_v15, inf  ;;  %v4195_v15 = vld [vmem:[#allocation85_spill] sm:$0xff] }
 0x380   :  { %1365 = vmin.xlane.f32.xlu0 %v1364_v58 }
 0x381   :  { %v3683_v38 = vpop.xlane.xlu0 %1376 }
 0x382   :  { %vm1378_vm14 = vcmp.eq.f32.partialorder %v3462_v14, %v3683_v38 }
 0x383   :  { %v1379_v2 = vsel %vm1378_vm14, %v1374_v6, inf  ;;  %v1494_v6 = vcvt.s32.f32 %v1492_v43 }
 0x384   :  { %1380 = vmin.xlane.f32.xlu0 %v1379_v2  ;;  %v4197_v2 = vld [vmem:[#allocation87_spill] sm:$0xff] }
 0x385   :  { %v3688_v11 = vpop.xlane.xlu0 %1391 }
 0x386   :  { %vm1393_vm15 = vcmp.eq.f32.partialorder %v3473_v20, %v3688_v11 }
 0x387   :  { %v1394_v8 = vsel %vm1393_vm15, %v1389_v10, inf }
 0x388   :  { %1395 = vmin.xlane.f32.xlu0 %v1394_v8  ;;  %v1509_v8 = vcvt.s32.f32 %v1507_v34  ;;  %v4202_v34 = vld [vmem:[#allocation20_spill] sm:$0xff] }
 0x389   :  { %v3693_v53 = vpop.xlane.xlu0 %1406 }
 0x38a   :  { %vm1408_vm2 = vcmp.eq.f32.partialorder %v3484_v27, %v3693_v53 }
 0x38b   :  { %v1409_v14 = vsel %vm1408_vm2, %v1404_v16, inf  ;;  %v1522_v16 = vand.u32 65535, %v3564_v22 }
 0x38c   :  { %1410 = vmin.xlane.f32.xlu0 %v1409_v14 }
 0x38d   :  { %v3698_v60 = vpop.xlane.xlu0 %1421 }
 0x38e   :  { %vm1423_vm3 = vcmp.eq.f32.partialorder %v4190_v39, %v3698_v60  ;;  %v4198_v39 = vld [vmem:[#allocation89_spill] sm:$0xff] }
 0x38f   :  { %v1424_v20 = vsel %vm1423_vm3, %v1419_v57, inf  ;;  %v1524_v57 = vcvt.s32.f32 %v1522_v16 }
 0x390   :  { %1425 = vmin.xlane.f32.xlu0 %v1424_v20 }
 0x391   :  { %v3703_v59 = vpop.xlane.xlu1 %1436 }
 0x392   :  { %vm1438_vm4 = vcmp.eq.f32.partialorder %v4191_v30, %v3703_v59 }
 0x393   :  { %v1439_v27 = vsel %vm1438_vm4, %v1434_v31, inf }
 0x394   :  { %1440 = vmin.xlane.f32.xlu1 %v1439_v27 }
 0x395   :  { %v3708_v25 = vpop.xlane.xlu1 %1451 }
 0x396   :  { %vm1453_vm5 = vcmp.eq.f32.partialorder %v4192_v49, %v3708_v25  ;;  %v1113_v49 = vcvt.f32.s32 %v3593_v0 }
 0x397   :  { %v1454_v24 = vsel %vm1453_vm5, %v1449_v36, inf  ;;  %v1098_v36 = vcvt.f32.s32 %v3588_v17 }
 0x398   :  { %1455 = vmin.xlane.f32.xlu1 %v1454_v24  ;;  %v4199_v24 = vld [vmem:[#allocation16_spill] sm:$0xff]  ;;  %v1114_v17 = vshll.u32 %v1113_v49, 16 }
 0x399   :  { %v3713_v41 = vpop.xlane.xlu1 %1466  ;;  %vm2068_vm11 = vcmp.eq.s32.totalorder %v4199_v24, 32  ;;  %v1099_v56 = vshll.u32 %v1098_v36, 16 }
 0x39a   :  { %vm1468_vm6 = vcmp.eq.f32.partialorder %v4193_v3, %v3713_v41 }
 0x39b   :  { %v1469_v46 = vsel %vm1468_vm6, %v1464_v32, inf }
 0x39c   :  { %1470 = vmin.xlane.f32.xlu1 %v1469_v46 }
 0x39d   :  { %v3718_v48 = vpop.xlane.xlu1 %1481 }
 0x39e   :  { %vm1483_vm7 = vcmp.eq.f32.partialorder %v4195_v15, %v3718_v48  ;;  %v1128_v15 = vcvt.f32.s32 %v3598_v37 }
 0x39f   :  { %v1484_v26 = vsel %vm1483_vm7, %v1479_v21, inf }
 0x3a0   :  { %1485 = vmin.xlane.f32.xlu1 %v1484_v26 }
 0x3a1   :  { %v3723_v58 = vpop.xlane.xlu1 %1496 }
 0x3a2   :  { %vm1498_vm8 = vcmp.eq.f32.partialorder %v4197_v2, %v3723_v58 }
 0x3a3   :  { %v1499_v10 = vsel %vm1498_vm8, %v1494_v6, inf }
 0x3a4   :  { %1500 = vmin.xlane.f32.xlu1 %v1499_v10 }
 0x3a5   :  { %v3728_v18 = vpop.xlane.xlu1 %1511 }
 0x3a6   :  { %vm1513_vm9 = vcmp.eq.f32.partialorder %v3561_v33, %v3728_v18  ;;  %v1083_v33 = vcvt.f32.s32 %v3583_v54 }
 0x3a7   :  { %v1514_v1 = vsel %vm1513_vm9, %v1509_v8, inf  ;;  %v1143_v8 = vcvt.f32.s32 %v3603_v29  ;;  %v1158_v29 = vcvt.f32.s32 %v3608_v5 }
 0x3a8   :  { %1515 = vmin.xlane.f32.xlu1 %v1514_v1  ;;  %v1084_v27 = vshll.u32 %v1083_v33, 16  ;;  %v1129_v1 = vshll.u32 %v1128_v15, 16 }
 0x3a9   :  { %v3733_v14 = vpop.xlane.xlu1 %1526 }
 0x3aa   :  { %vm1528_vm0 = vcmp.eq.f32.partialorder %v4198_v39, %v3733_v14  ;;  %v4203_v39 = vld [vmem:[#allocation22_spill] sm:$0xff] }
 0x3ab   :  { %v1529_v20 = vsel %vm1528_vm0, %v1524_v57, inf }
 0x3ac   :  { %1530 = vmin.xlane.f32.xlu1 %v1529_v20 }
 0x3ad   :  { %v3738_v31 = vpop.xlane.xlu1 %1541 }
 0x3ae   :  { %vm1543_vm10 = vcmp.eq.f32.partialorder %v3579_v61, %v3738_v31  ;;  %v4200_v61 = vmov 0.0  }
 0x3af   :  { %v1544_v22 = vsel %vm1543_vm10, %v1539_v51, inf }
 0x3b0   :  { %1545 = vmin.xlane.f32.xlu1 %v1544_v22  ;;  %v1144_v22 = vshll.u32 %v1143_v8, 16 }
 0x3c1   :  { %v1081_v30 = vpop.xlane.xlu0 %1080 }
 0x3c2   :  { %v1082_v23 = vcvt.f32.s32 %v1081_v30 }
 0x3c4   :  { %v1085_v4 = vadd.s32 %v1084_v27, %v1082_v23  ;;  %v4204_v23 = vld [vmem:[#allocation24_spill] sm:$0xff] }
 0x3c5   :  { %v1096_v32 = vpop.xlane.xlu1 %1095 }
 0x3c6   :  { %v2069_v3 = vcvt.s32.f32 %v1085_v4  ;;  %v1097_v46 = vcvt.f32.s32 %v1096_v32  ;;  %vm1551_vm12 = vcmp.eq.s32.totalorder %v4199_v24, %v1085_v4  ;;  %v1173_v32 = vcvt.f32.s32 %v3613_v62 }
 0x3c7   :  { %v2199_v21 = vsel %vm1551_vm12, 1.0, %v4200_v61  ;;  %v1188_v62 = vcvt.f32.s32 %v3618_v44 }
 0x3c8   :  { %v2101_v54 = vsel %vm2068_vm11, %v2069_v3, %v4201_v52  ;;  %v1100_v43 = vadd.s32 %v1099_v56, %v1097_v46  ;;  %2307 = vmatprep.mubr.msk.f32.mxu0 %vm878_vm1, %v2199_v21  ;;  %v1159_v3 = vshll.u32 %v1158_v29, 16  ;;  %v4205_v52 = vld [vmem:[#allocation26_spill] sm:$0xff] }
 0x3c9   :  { %2133 = vst [vmem:[#allocation8] sm:$0xff] %v2101_v54  ;;  %v1111_v0 = vpop.xlane.xlu0 %1110 }
 0x3ca   :  { %vm1552_vm13 = vcmp.eq.s32.totalorder %v4199_v24, %v1100_v43  ;;  %v2070_v26 = vcvt.s32.f32 %v1100_v43  ;;  %v1112_v6 = vcvt.f32.s32 %v1111_v0 }
 0x3cb   :  { %v2200_v42 = vsel %vm1552_vm13, 1.0, %v4200_v61 }
 0x3cc   :  { %v2102_v2 = vsel %vm2068_vm11, %v2070_v26, %v4202_v34  ;;  %v1115_v10 = vadd.s32 %v1114_v17, %v1112_v6  ;;  %2308 = vmatmul.mubr.msk.f32.vlgmr.msra.gmra.mrb[64].mxu0 %vm878_vm1, %v2200_v42  ;;  %v1174_v17 = vshll.u32 %v1173_v32, 16  ;;  %v4206_v42 = vld [vmem:[#allocation28_spill] sm:$0xff] }
 0x3cd   :  { %2134 = vst [vmem:[#allocation8 + $0x8] sm:$0xff] %v2102_v2  ;;  %v1126_v16 = vpop.xlane.xlu1 %1125 }
 0x3ce   :  { %v2071_v57 = vcvt.s32.f32 %v1115_v10  ;;  %v1127_v37 = vcvt.f32.s32 %v1126_v16  ;;  %vm1553_vm14 = vcmp.eq.s32.totalorder %v4199_v24, %v1115_v10  ;;  %v1203_v10 = vcvt.f32.s32 %v3623_v7 }
 0x3cf   :  { %v2201_v35 = vsel %vm1553_vm14, 1.0, %v4200_v61  ;;  %v1189_v16 = vshll.u32 %v1188_v62, 16  ;;  %v1218_v7 = vcvt.f32.s32 %v3628_v55 }
 0x3d0   :  { %v2103_v20 = vsel %vm2068_vm11, %v2071_v57, %v4203_v39  ;;  %v1130_v51 = vadd.s32 %v1129_v1, %v1127_v37  ;;  %2310 = vmatprep.mubr.msk.f32.mxu0 %vm878_vm1, %v2201_v35  ;;  %v4207_v37 = vld [vmem:[#allocation30_spill] sm:$0xff] }
 0x3d1   :  { %2135 = vst [vmem:[#allocation8 + $0x10] sm:$0xff] %v2103_v20  ;;  %v1141_v33 = vpop.xlane.xlu0 %1140  ;;  %v1204_v20 = vshll.u32 %v1203_v10, 16  ;;  %v4211_v10 = vld [vmem:[#allocation38_spill] sm:$0xff] }
 0x3d2   :  { %v2072_v30 = vcvt.s32.f32 %v1130_v51  ;;  %v1142_v27 = vcvt.f32.s32 %v1141_v33  ;;  %vm1554_vm15 = vcmp.eq.s32.totalorder %v4199_v24, %v1130_v51 }
 0x3d3   :  { %v2202_v36 = vsel %vm1554_vm15, 1.0, %v4200_v61 }
 0x3d4   :  { %v2104_v4 = vsel %vm2068_vm11, %v2072_v30, %v4204_v23  ;;  %v1145_v49 = vadd.s32 %v1144_v22, %v1142_v27  ;;  %2311 = vmatmul.mubr.msk.f32.gmra.mrb[66].mxu0 %vm878_vm1, %v2202_v36  ;;  %v4208_v30 = vld [vmem:[#allocation32_spill] sm:$0xff]  ;;  %v1233_v23 = vcvt.f32.s32 %v3633_v45  ;;  %v1248_v45 = vcvt.f32.s32 %v3638_v40 }
 0x3d5   :  { %2136 = vst [vmem:[#allocation8 + $0x18] sm:$0xff] %v2104_v4  ;;  %v1156_v56 = vpop.xlane.xlu1 %1155 }
 0x3d6   :  { %v2073_v46 = vcvt.s32.f32 %v1145_v49  ;;  %v1157_v5 = vcvt.f32.s32 %v1156_v56  ;;  %vm1555_vm2 = vcmp.eq.s32.totalorder %v4199_v24, %v1145_v49  ;;  %v1219_v49 = vshll.u32 %v1218_v7, 16 }
 0x3d7   :  { %v2203_v21 = vsel %vm1555_vm2, 1.0, %v4200_v61  ;;  %v1293_v7 = vcvt.f32.s32 %v3653_v63  ;;  %v1308_v63 = vcvt.f32.s32 %v3658_v9 }
 0x3d8   :  { %v2105_v54 = vsel %vm2068_vm11, %v2073_v46, %v4205_v52  ;;  %v1160_v43 = vadd.s32 %v1159_v3, %v1157_v5  ;;  %2313 = vmatprep.mubr.msk.f32.mxu0 %vm878_vm1, %v2203_v21  ;;  %v4209_v3 = vld [vmem:[#allocation34_spill] sm:$0xff]  ;;  %v1234_v21 = vshll.u32 %v1233_v23, 16 }
 0x3d9   :  { %2137 = vst [vmem:[#allocation8 + $0x20] sm:$0xff] %v2105_v54  ;;  %v1171_v0 = vpop.xlane.xlu0 %1170 }
 0x3da   :  { %v2074_v15 = vcvt.s32.f32 %v1160_v43  ;;  %v1172_v26 = vcvt.f32.s32 %v1171_v0  ;;  %vm1556_vm3 = vcmp.eq.s32.totalorder %v4199_v24, %v1160_v43  ;;  %v4210_v0 = vld [vmem:[#allocation36_spill] sm:$0xff] }
 0x3db   :  { %v2204_v6 = vsel %vm1556_vm3, 1.0, %v4200_v61 }
 0x3dc   :  { %v2106_v34 = vsel %vm2068_vm11, %v2074_v15, %v4206_v42  ;;  %v1175_v2 = vadd.s32 %v1174_v17, %v1172_v26  ;;  %2314 = vmatmul.mubr.msk.f32.gmra.mrb[68].mxu0 %vm878_vm1, %v2204_v6  ;;  %v1263_v26 = vcvt.f32.s32 %v3643_v13  ;;  %v1249_v42 = vshll.u32 %v1248_v45, 16 }
 0x3dd   :  { %2138 = vst [vmem:[#allocation8 + $0x28] sm:$0xff] %v2106_v34  ;;  %v1186_v8 = vpop.xlane.xlu1 %1185  ;;  %v1278_v13 = vcvt.f32.s32 %v3648_v28  ;;  %v1309_v45 = vshll.u32 %v1308_v63, 16 }
 0x3de   :  { %v2075_v1 = vcvt.s32.f32 %v1175_v2  ;;  %v1187_v44 = vcvt.f32.s32 %v1186_v8  ;;  %vm1557_vm4 = vcmp.eq.s32.totalorder %v4199_v24, %v1175_v2 }
 0x3df   :  { %v2205_v57 = vsel %vm1557_vm4, 1.0, %v4200_v61 }
 0x3e0   :  { %v2107_v35 = vsel %vm2068_vm11, %v2075_v1, %v4207_v37  ;;  %v1190_v39 = vadd.s32 %v1189_v16, %v1187_v44  ;;  %2316 = vmatprep.mubr.msk.f32.mxu0 %vm878_vm1, %v2205_v57  ;;  %v1264_v1 = vshll.u32 %v1263_v26, 16 }
 0x3e1   :  { %2139 = vst [vmem:[#allocation8 + $0x30] sm:$0xff] %v2107_v35  ;;  %v1201_v51 = vpop.xlane.xlu0 %1200 }
 0x3e2   :  { %v2076_v22 = vcvt.s32.f32 %v1190_v39  ;;  %v1202_v33 = vcvt.f32.s32 %v1201_v51  ;;  %vm1558_vm5 = vcmp.eq.s32.totalorder %v4199_v24, %v1190_v39  ;;  %v4212_v39 = vld [vmem:[#allocation40_spill] sm:$0xff] }
 0x3e3   :  { %v2206_v29 = vsel %vm1558_vm5, 1.0, %v4200_v61 }
 0x3e4   :  { %v2108_v27 = vsel %vm2068_vm11, %v2076_v22, %v4208_v30  ;;  %v1205_v36 = vadd.s32 %v1204_v20, %v1202_v33  ;;  %2317 = vmatmul.mubr.msk.f32.gmra.mrb[70].mxu0 %vm878_vm1, %v2206_v29  ;;  %v1279_v33 = vshll.u32 %v1278_v13, 16 }
 0x3e5   :  { %2140 = vst [vmem:[#allocation8 + $0x38] sm:$0xff] %v2108_v27  ;;  %v1216_v4 = vpop.xlane.xlu1 %1215  ;;  %v4213_v27 = vld [vmem:[#allocation42_spill] sm:$0xff] }
 0x3e6   :  { %v2077_v32 = vcvt.s32.f32 %v1205_v36  ;;  %v1217_v55 = vcvt.f32.s32 %v1216_v4  ;;  %vm1559_vm6 = vcmp.eq.s32.totalorder %v4199_v24, %v1205_v36  ;;  %v1294_v4 = vshll.u32 %v1293_v7, 16 }
 0x3e7   :  { %v2207_v56 = vsel %vm1559_vm6, 1.0, %v4200_v61 }
 0x3e8   :  { %v2109_v46 = vsel %vm2068_vm11, %v2077_v32, %v4209_v3  ;;  %v1220_v5 = vadd.s32 %v1219_v49, %v1217_v55  ;;  %2319 = vmatprep.mubr.msk.f32.mxu0 %vm878_vm1, %v2207_v56  ;;  %v4214_v3 = vld [vmem:[#allocation44_spill] sm:$0xff] }
 0x3e9   :  { %2141 = vst [vmem:[#allocation8 + $0x40] sm:$0xff] %v2109_v46  ;;  %v1231_v52 = vpop.xlane.xlu0 %1230 }
 0x3ea   :  { %v2078_v54 = vcvt.s32.f32 %v1220_v5  ;;  %v1232_v43 = vcvt.f32.s32 %v1231_v52  ;;  %vm1560_vm7 = vcmp.eq.s32.totalorder %v4199_v24, %v1220_v5 }
 0x3eb   :  { %v2208_v17 = vsel %vm1560_vm7, 1.0, %v4200_v61 }
 0x3ec   :  { %v2110_v62 = vsel %vm2068_vm11, %v2078_v54, %v4210_v0  ;;  %v1235_v15 = vadd.s32 %v1234_v21, %v1232_v43  ;;  %2320 = vmatmul.mubr.msk.f32.gmra.mrb[72].mxu0 %vm878_vm1, %v2208_v17  ;;  %v1323_v21 = vcvt.f32.s32 %v3663_v12  ;;  %v4215_v17 = vld [vmem:[#allocation46_spill] sm:$0xff]  ;;  %v1338_v12 = vcvt.f32.s32 %v3668_v19 }
 0x3ed   :  { %2142 = vst [vmem:[#allocation8 + $0x48] sm:$0xff] %v2110_v62  ;;  %v1246_v6 = vpop.xlane.xlu1 %1245 }
 0x3ee   :  { %v2079_v34 = vcvt.s32.f32 %v1235_v15  ;;  %v1247_v40 = vcvt.f32.s32 %v1246_v6  ;;  %vm1561_vm8 = vcmp.eq.s32.totalorder %v4199_v24, %v1235_v15  ;;  %v1324_v15 = vshll.u32 %v1323_v21, 16  ;;  %v4220_v21 = vld [vmem:[#allocation56_spill] sm:$0xff] }
 0x3ef   :  { %v2209_v2 = vsel %vm1561_vm8, 1.0, %v4200_v61 }
 0x3f0   :  { %v2111_v8 = vsel %vm2068_vm11, %v2079_v34, %v4211_v10  ;;  %v1250_v16 = vadd.s32 %v1249_v42, %v1247_v40  ;;  %2322 = vmatprep.mubr.msk.f32.mxu0 %vm878_vm1, %v2209_v2  ;;  %v4216_v40 = vld [vmem:[#allocation48_spill] sm:$0xff] }
 0x3f1   :  { %2143 = vst [vmem:[#allocation8 + $0x50] sm:$0xff] %v2111_v8  ;;  %v1261_v44 = vpop.xlane.xlu0 %1260  ;;  %v1353_v8 = vcvt.f32.s32 %v3673_v50  ;;  %v1368_v50 = vcvt.f32.s32 %v3678_v47 }
 0x3f2   :  { %v2080_v57 = vcvt.s32.f32 %v1250_v16  ;;  %v1262_v37 = vcvt.f32.s32 %v1261_v44  ;;  %vm1562_vm9 = vcmp.eq.s32.totalorder %v4199_v24, %v1250_v16 }
 0x3f3   :  { %v2210_v35 = vsel %vm1562_vm9, 1.0, %v4200_v61 }
 0x3f4   :  { %v2112_v20 = vsel %vm2068_vm11, %v2080_v57, %v4212_v39  ;;  %v1265_v51 = vadd.s32 %v1264_v1, %v1262_v37  ;;  %2323 = vmatmul.mubr.msk.f32.gmra.mrb[74].mxu0 %vm878_vm1, %v2210_v35  ;;  %v1339_v1 = vshll.u32 %v1338_v12, 16  ;;  %v4217_v57 = vld [vmem:[#allocation50_spill] sm:$0xff]  ;;  %v1354_v39 = vshll.u32 %v1353_v8, 16 }
 0x3f5   :  { %2144 = vst [vmem:[#allocation8 + $0x58] sm:$0xff] %v2112_v20  ;;  %v1276_v22 = vpop.xlane.xlu1 %1275 }
 0x3f6   :  { %v2081_v29 = vcvt.s32.f32 %v1265_v51  ;;  %v1277_v28 = vcvt.f32.s32 %v1276_v22  ;;  %vm1563_vm0 = vcmp.eq.s32.totalorder %v4199_v24, %v1265_v51 }
 0x3f7   :  { %v2211_v30 = vsel %vm1563_vm0, 1.0, %v4200_v61 }
 0x3f8   :  { %v2113_v36 = vsel %vm2068_vm11, %v2081_v29, %v4213_v27  ;;  %v1280_v23 = vadd.s32 %v1279_v33, %v1277_v28  ;;  %2325 = vmatprep.mubr.msk.f32.mxu0 %vm878_vm1, %v2211_v30  ;;  %v4218_v33 = vld [vmem:[#allocation52_spill] sm:$0xff]  ;;  %v1383_v30 = vcvt.f32.s32 %v3683_v38  ;;  %v1398_v38 = vcvt.f32.s32 %v3688_v11 }
 0x3f9   :  { %2145 = vst [vmem:[#allocation8 + $0x60] sm:$0xff] %v2113_v36  ;;  %v1291_v49 = vpop.xlane.xlu0 %1290  ;;  %v1369_v36 = vshll.u32 %v1368_v50, 16 }
 0x3fa   :  { %v2082_v32 = vcvt.s32.f32 %v1280_v23  ;;  %v1292_v55 = vcvt.f32.s32 %v1291_v49  ;;  %vm1564_vm10 = vcmp.eq.s32.totalorder %v4199_v24, %v1280_v23  ;;  %v4219_v49 = vld [vmem:[#allocation54_spill] sm:$0xff] }
 0x3fb   :  { %v2212_v56 = vsel %vm1564_vm10, 1.0, %v4200_v61 }
 0x3fc   :  { %v2114_v46 = vsel %vm2068_vm11, %v2082_v32, %v4214_v3  ;;  %v1295_v5 = vadd.s32 %v1294_v4, %v1292_v55  ;;  %2326 = vmatmul.mubr.msk.f32.gmra.mrb[76].mxu0 %vm878_vm1, %v2212_v56  ;;  %v1384_v55 = vshll.u32 %v1383_v30, 16 }
 0x3fd   :  { %2146 = vst [vmem:[#allocation8 + $0x68] sm:$0xff] %v2114_v46  ;;  %v1306_v52 = vpop.xlane.xlu1 %1305 }
 0x3fe   :  { %v2083_v54 = vcvt.s32.f32 %v1295_v5  ;;  %v1307_v9 = vcvt.f32.s32 %v1306_v52  ;;  %vm1565_vm12 = vcmp.eq.s32.totalorder %v4199_v24, %v1295_v5 }
 0x3ff   :  { %v2213_v43 = vsel %vm1565_vm12, 1.0, %v4200_v61 }
 0x400   :  { %v2115_v0 = vsel %vm2068_vm11, %v2083_v54, %v4215_v17  ;;  %v1310_v62 = vadd.s32 %v1309_v45, %v1307_v9  ;;  %2328 = vmatprep.mubr.msk.f32.mxu0 %vm878_vm1, %v2213_v43  ;;  %v1413_v54 = vcvt.f32.s32 %v3693_v53  ;;  %v1399_v43 = vshll.u32 %v1398_v38, 16 }
 0x401   :  { %2147 = vst [vmem:[#allocation8 + $0x70] sm:$0xff] %v2115_v0  ;;  %v1321_v26 = vpop.xlane.xlu0 %1320  ;;  %v1428_v53 = vcvt.f32.s32 %v3698_v60 }
 0x402   :  { %v2084_v6 = vcvt.s32.f32 %v1310_v62  ;;  %v1322_v42 = vcvt.f32.s32 %v1321_v26  ;;  %vm1566_vm13 = vcmp.eq.s32.totalorder %v4199_v24, %v1310_v62  ;;  %v4221_v62 = vld [vmem:[#allocation58_spill] sm:$0xff]  ;;  %v1414_v12 = vshll.u32 %v1413_v54, 16 }
 0x403   :  { %v2214_v34 = vsel %vm1566_vm13, 1.0, %v4200_v61 }
 0x404   :  { %v2116_v2 = vsel %vm2068_vm11, %v2084_v6, %v4216_v40  ;;  %v1325_v10 = vadd.s32 %v1324_v15, %v1322_v42  ;;  %2329 = vmatmul.mubr.msk.f32.gmra.mrb[78].mxu0 %vm878_vm1, %v2214_v34 }
 0x405   :  { %2148 = vst [vmem:[#allocation8 + $0x78] sm:$0xff] %v2116_v2  ;;  %v1336_v16 = vpop.xlane.xlu0 %1335  ;;  %v4222_v2 = vld [vmem:[#allocation60_spill] sm:$0xff] }
 0x406   :  { %v2085_v44 = vcvt.s32.f32 %v1325_v10  ;;  %v1337_v19 = vcvt.f32.s32 %v1336_v16  ;;  %vm1567_vm14 = vcmp.eq.s32.totalorder %v4199_v24, %v1325_v10  ;;  %v1443_v16 = vcvt.f32.s32 %v3703_v59 }
 0x407   :  { %v2215_v13 = vsel %vm1567_vm14, 1.0, %v4200_v61  ;;  %v1458_v59 = vcvt.f32.s32 %v3708_v25 }
 0x408   :  { %v2117_v37 = vsel %vm2068_vm11, %v2085_v44, %v4217_v57  ;;  %v1340_v35 = vadd.s32 %v1339_v1, %v1337_v19  ;;  %2331 = vmatprep.mubr.msk.f32.mxu0 %vm878_vm1, %v2215_v13  ;;  %v1429_v44 = vshll.u32 %v1428_v53, 16  ;;  %v4223_v57 = vld [vmem:[#allocation62_spill] sm:$0xff] }
 0x409   :  { %2149 = vst [vmem:[#allocation8 + $0x80] sm:$0xff] %v2117_v37  ;;  %v1351_v20 = vpop.xlane.xlu0 %1350 }
 0x40a   :  { %v2086_v51 = vcvt.s32.f32 %v1340_v35  ;;  %v1352_v7 = vcvt.f32.s32 %v1351_v20  ;;  %vm1568_vm15 = vcmp.eq.s32.totalorder %v4199_v24, %v1340_v35 }
 0x40b   :  { %v2216_v22 = vsel %vm1568_vm15, 1.0, %v4200_v61 }
 0x40c   :  { %v2118_v29 = vsel %vm2068_vm11, %v2086_v51, %v4218_v33  ;;  %v1355_v28 = vadd.s32 %v1354_v39, %v1352_v7  ;;  %2332 = vmatmul.mubr.msk.f32.gmra.mrb[80].mxu0 %vm878_vm1, %v2216_v22  ;;  %v1444_v39 = vshll.u32 %v1443_v16, 16  ;;  %v4224_v22 = vld [vmem:[#allocation64_spill] sm:$0xff]  ;;  %v4229_v16 = vld [vmem:[#allocation74_spill] sm:$0xff] }
 0x40d   :  { %2150 = vst [vmem:[#allocation8 + $0x88] sm:$0xff] %v2118_v29  ;;  %v1366_v27 = vpop.xlane.xlu0 %1365 }
 0x40e   :  { %v2087_v23 = vcvt.s32.f32 %v1355_v28  ;;  %v1367_v47 = vcvt.f32.s32 %v1366_v27  ;;  %vm1569_vm2 = vcmp.eq.s32.totalorder %v4199_v24, %v1355_v28  ;;  %v1473_v28 = vcvt.f32.s32 %v3713_v41 }
 0x40f   :  { %v2217_v4 = vsel %vm1569_vm2, 1.0, %v4200_v61  ;;  %v1459_v27 = vshll.u32 %v1458_v59, 16  ;;  %v1488_v41 = vcvt.f32.s32 %v3718_v48 }
 0x410   :  { %v2119_v63 = vsel %vm2068_vm11, %v2087_v23, %v4219_v49  ;;  %v1370_v32 = vadd.s32 %v1369_v36, %v1367_v47  ;;  %2334 = vmatprep.mubr.msk.f32.mxu0 %vm878_vm1, %v2217_v4  ;;  %v4225_v47 = vld [vmem:[#allocation66_spill] sm:$0xff] }
 0x411   :  { %2151 = vst [vmem:[#allocation8 + $0x90] sm:$0xff] %v2119_v63  ;;  %v1381_v56 = vpop.xlane.xlu0 %1380  ;;  %v1474_v63 = vshll.u32 %v1473_v28, 16 }
 0x412   :  { %v2088_v3 = vcvt.s32.f32 %v1370_v32  ;;  %v1382_v46 = vcvt.f32.s32 %v1381_v56  ;;  %vm1570_vm3 = vcmp.eq.s32.totalorder %v4199_v24, %v1370_v32 }
 0x413   :  { %v2218_v5 = vsel %vm1570_vm3, 1.0, %v4200_v61 }
 0x414   :  { %v2120_v52 = vsel %vm2068_vm11, %v2088_v3, %v4220_v21  ;;  %v1385_v45 = vadd.s32 %v1384_v55, %v1382_v46  ;;  %2335 = vmatmul.mubr.msk.f32.gmra.mrb[82].mxu0 %vm878_vm1, %v2218_v5  ;;  %v4226_v3 = vld [vmem:[#allocation68_spill] sm:$0xff]  ;;  %v1503_v21 = vcvt.f32.s32 %v3723_v58  ;;  %v1518_v58 = vcvt.f32.s32 %v3728_v18 }
 0x415   :  { %2152 = vst [vmem:[#allocation8 + $0x98] sm:$0xff] %v2120_v52  ;;  %v1396_v9 = vpop.xlane.xlu0 %1395 }
 0x416   :  { %v2089_v17 = vcvt.s32.f32 %v1385_v45  ;;  %v1397_v11 = vcvt.f32.s32 %v1396_v9  ;;  %vm1571_vm4 = vcmp.eq.s32.totalorder %v4199_v24, %v1385_v45  ;;  %v1489_v45 = vshll.u32 %v1488_v41, 16 }
 0x417   :  { %v2219_v0 = vsel %vm1571_vm4, 1.0, %v4200_v61 }
 0x418   :  { %v2121_v15 = vsel %vm2068_vm11, %v2089_v17, %v4221_v62  ;;  %v1400_v26 = vadd.s32 %v1399_v43, %v1397_v11  ;;  %2337 = vmatprep.mubr.msk.f32.mxu0 %vm878_vm1, %v2219_v0  ;;  %v4227_v43 = vld [vmem:[#allocation70_spill] sm:$0xff]  ;;  %v1504_v0 = vshll.u32 %v1503_v21, 16 }
 0x419   :  { %2153 = vst [vmem:[#allocation8 + $0xa0] sm:$0xff] %v2121_v15  ;;  %v1411_v6 = vpop.xlane.xlu0 %1410 }
 0x41a   :  { %v2090_v42 = vcvt.s32.f32 %v1400_v26  ;;  %v1412_v34 = vcvt.f32.s32 %v1411_v6  ;;  %vm1572_vm5 = vcmp.eq.s32.totalorder %v4199_v24, %v1400_v26  ;;  %v4228_v6 = vld [vmem:[#allocation72_spill] sm:$0xff] }
 0x41b   :  { %v2220_v40 = vsel %vm1572_vm5, 1.0, %v4200_v61 }
 0x41c   :  { %v2122_v10 = vsel %vm2068_vm11, %v2090_v42, %v4222_v2  ;;  %v1415_v8 = vadd.s32 %v1414_v12, %v1412_v34  ;;  %2338 = vmatmul.mubr.msk.f32.gmra.mrb[84].mxu0 %vm878_vm1, %v2220_v40  ;;  %v1533_v34 = vcvt.f32.s32 %v3733_v14  ;;  %v1519_v2 = vshll.u32 %v1518_v58, 16 }
 0x41d   :  { %2154 = vst [vmem:[#allocation8 + $0xa8] sm:$0xff] %v2122_v10  ;;  %v1426_v1 = vpop.xlane.xlu0 %1425  ;;  %v1548_v14 = vcvt.f32.s32 %v3738_v31 }
 0x41e   :  { %v2091_v19 = vcvt.s32.f32 %v1415_v8  ;;  %v1427_v60 = vcvt.f32.s32 %v1426_v1  ;;  %vm1573_vm6 = vcmp.eq.s32.totalorder %v4199_v24, %v1415_v8 }
 0x41f   :  { %v2221_v13 = vsel %vm1573_vm6, 1.0, %v4200_v61 }
 0x420   :  { %v2123_v37 = vsel %vm2068_vm11, %v2091_v19, %v4223_v57  ;;  %v1430_v35 = vadd.s32 %v1429_v44, %v1427_v60  ;;  %2340 = vmatprep.mubr.msk.f32.mxu0 %vm878_vm1, %v2221_v13  ;;  %v1534_v19 = vshll.u32 %v1533_v34, 16 }
 0x421   :  { %2155 = vst [vmem:[#allocation8 + $0xb0] sm:$0xff] %v2123_v37  ;;  %v1441_v20 = vpop.xlane.xlu1 %1440 }
 0x422   :  { %vm1574_vm7 = vcmp.eq.s32.totalorder %v4199_v24, %v1430_v35  ;;  %v2092_v50 = vcvt.s32.f32 %v1430_v35  ;;  %v1442_v51 = vcvt.f32.s32 %v1441_v20  ;;  %v4230_v35 = vld [vmem:[#allocation76_spill] sm:$0xff] }
 0x423   :  { %v2222_v7 = vsel %vm1574_vm7, 1.0, %v4200_v61 }
 0x424   :  { %v2124_v33 = vsel %vm2068_vm11, %v2092_v50, %v4224_v22  ;;  %v1445_v29 = vadd.s32 %v1444_v39, %v1442_v51  ;;  %2341 = vmatmul.mubr.msk.f32.gmra.mrb[86].mxu0 %vm878_vm1, %v2222_v7  ;;  %v1549_v50 = vshll.u32 %v1548_v14, 16  ;;  %v4231_v22 = vld [vmem:[#allocation78_spill] sm:$0xff] }
 0x425   :  { %2156 = vst [vmem:[#allocation8 + $0xb8] sm:$0xff] %v2124_v33  ;;  %v1456_v30 = vpop.xlane.xlu1 %1455 }
 0x426   :  { %v2093_v36 = vcvt.s32.f32 %v1445_v29  ;;  %v1457_v25 = vcvt.f32.s32 %v1456_v30  ;;  %vm1575_vm8 = vcmp.eq.s32.totalorder %v4199_v24, %v1445_v29 }
 0x427   :  { %v2223_v23 = vsel %vm1575_vm8, 1.0, %v4200_v61 }
 0x428   :  { %v2125_v4 = vsel %vm2068_vm11, %v2093_v36, %v4225_v47  ;;  %v1460_v49 = vadd.s32 %v1459_v27, %v1457_v25  ;;  %2343 = vmatprep.mubr.msk.f32.mxu1 %vm878_vm1, %v2223_v23  ;;  %v4232_v27 = vld [vmem:[#allocation80_spill] sm:$0xff]  ;;  %v4233_v25 = vld [vmem:[#allocation15_spill] sm:$0xff]  ;;  %v2473_v47 = vld [vmem:[#allocation7 + $0x300] ss:$8 sm:$0x3] }
 0x429   :  { %2157 = vst [vmem:[#allocation8 + $0xc0] sm:$0xff] %v2125_v4  ;;  %v1471_v32 = vpop.xlane.xlu1 %1470  ;;  %v550_v23 = vsub.s32 1, %v4233_v25 }
 0x42a   :  { %vm1576_vm9 = vcmp.eq.s32.totalorder %v4199_v24, %v1460_v49  ;;  %v2094_v55 = vcvt.s32.f32 %v1460_v49  ;;  %v1472_v56 = vcvt.f32.s32 %v1471_v32  ;;  %v4234_v49 = vld [vmem:[#allocation19_spill] sm:$0xff] }
 0x42b   :  { %v2224_v38 = vsel %vm1576_vm9, 1.0, %v4200_v61  ;;  %v3968_v4 = vrot.slane %v2473_v47, %v550_v23 }
 0x42c   :  { %v2126_v46 = vsel %vm2068_vm11, %v2094_v55, %v4226_v3  ;;  %v1475_v5 = vadd.s32 %v1474_v63, %v1472_v56  ;;  %2344 = vmatmul.mubr.msk.f32.vlgmr.msra.gmra.mrb[64].mxu1 %vm878_vm1, %v2224_v38 }
 0x42d   :  { %2158 = vst [vmem:[#allocation8 + $0xc8] sm:$0xff] %v2126_v46  ;;  %v1486_v52 = vpop.xlane.xlu1 %1485  ;;  %v629_v63 = vadd.f32 %v4234_v49, %v3968_v4 }
 0x42e   :  { %v2095_v54 = vcvt.s32.f32 %v1475_v5  ;;  %v1487_v48 = vcvt.f32.s32 %v1486_v52  ;;  %vm1577_vm0 = vcmp.eq.s32.totalorder %v4199_v24, %v1475_v5 }
 0x42f   :  { %v2225_v9 = vsel %vm1577_vm0, 1.0, %v4200_v61 }
 0x430   :  { %v2127_v17 = vsel %vm2068_vm11, %v2095_v54, %v4227_v43  ;;  %v1490_v11 = vadd.s32 %v1489_v45, %v1487_v48  ;;  %2346 = vmatprep.mubr.msk.f32.mxu1 %vm878_vm1, %v2225_v9 }
 0x431   :  { %2159 = vst [vmem:[#allocation8 + $0xd0] sm:$0xff] %v2127_v17  ;;  %v1501_v62 = vpop.xlane.xlu1 %1500 }
 0x432   :  { %v2096_v15 = vcvt.s32.f32 %v1490_v11  ;;  %v1502_v26 = vcvt.f32.s32 %v1501_v62  ;;  %vm1578_vm10 = vcmp.eq.s32.totalorder %v4199_v24, %v1490_v11 }
 0x433   :  { %v2226_v12 = vsel %vm1578_vm10, 1.0, %v4200_v61 }
 0x434   :  { %v2128_v53 = vsel %vm2068_vm11, %v2096_v15, %v4228_v6  ;;  %v1505_v42 = vadd.s32 %v1504_v0, %v1502_v26  ;;  %2347 = vmatmul.mubr.msk.f32.gmra.mrb[66].mxu1 %vm878_vm1, %v2226_v12 }
 0x435   :  { %2160 = vst [vmem:[#allocation8 + $0xd8] sm:$0xff] %v2128_v53  ;;  %v1516_v40 = vpop.xlane.xlu1 %1515 }
 0x436   :  { %v2097_v10 = vcvt.s32.f32 %v1505_v42  ;;  %v1517_v18 = vcvt.f32.s32 %v1516_v40  ;;  %vm1579_vm12 = vcmp.eq.s32.totalorder %v4199_v24, %v1505_v42 }
 0x437   :  { %v2227_v8 = vsel %vm1579_vm12, 1.0, %v4200_v61 }
 0x438   :  { %v2129_v1 = vsel %vm2068_vm11, %v2097_v10, %v4229_v16  ;;  %v1520_v44 = vadd.s32 %v1519_v2, %v1517_v18  ;;  %2349 = vmatprep.mubr.msk.f32.mxu1 %vm878_vm1, %v2227_v8 }
 0x439   :  { %2161 = vst [vmem:[#allocation8 + $0xe0] sm:$0xff] %v2129_v1  ;;  %v1531_v60 = vpop.xlane.xlu1 %1530 }
 0x43a   :  { %v2098_v13 = vcvt.s32.f32 %v1520_v44  ;;  %v1532_v57 = vcvt.f32.s32 %v1531_v60  ;;  %vm1580_vm13 = vcmp.eq.s32.totalorder %v4199_v24, %v1520_v44 }
 0x43b   :  { %v2228_v37 = vsel %vm1580_vm13, 1.0, %v4200_v61 }
 0x43c   :  { %v2130_v39 = vsel %vm2068_vm11, %v2098_v13, %v4230_v35  ;;  %v1535_v20 = vadd.s32 %v1534_v19, %v1532_v57  ;;  %2350 = vmatmul.mubr.msk.f32.gmra.mrb[68].mxu1 %vm878_vm1, %v2228_v37 }
 0x43d   :  { %2162 = vst [vmem:[#allocation8 + $0xe8] sm:$0xff] %v2130_v39  ;;  %v1546_v59 = vpop.xlane.xlu1 %1545 }
 0x43e   :  { %v2099_v51 = vcvt.s32.f32 %v1535_v20  ;;  %v1547_v7 = vcvt.f32.s32 %v1546_v59  ;;  %vm1581_vm14 = vcmp.eq.s32.totalorder %v4199_v24, %v1535_v20 }
 0x43f   :  { %v2229_v31 = vsel %vm1581_vm14, 1.0, %v4200_v61 }
 0x440   :  { %v2131_v33 = vsel %vm2068_vm11, %v2099_v51, %v4231_v22  ;;  %v1550_v29 = vadd.s32 %v1549_v50, %v1547_v7  ;;  %2352 = vmatprep.mubr.msk.f32.mxu1 %vm878_vm1, %v2229_v31 }
 0x441   :  { %2163 = vst [vmem:[#allocation8 + $0xf0] sm:$0xff] %v2131_v33 }
 0x442   :  { %vm1582_vm15 = vcmp.eq.s32.totalorder %v4199_v24, %v1550_v29  ;;  %v2100_v28 = vcvt.s32.f32 %v1550_v29 }
 0x443   :  { %v2230_v30 = vsel %vm1582_vm15, 1.0, %v4200_v61 }
 0x444   :  { %v2132_v36 = vsel %vm2068_vm11, %v2100_v28, %v4232_v27  ;;  %2353 = vmatmul.mubr.msk.f32.gmra.mrb[70].mxu1 %vm878_vm1, %v2230_v30 }
 0x445   :  { %2164 = vst [vmem:[#allocation8 + $0xf8] sm:$0xff] %v2132_v36 }
 0x446   :  { %2551 = shalt.err (!%p2548_p0)
}
 0x447   :  { %s2552_s7 = scalar_lea.hbm %s4067_s3, 4096 }
 0x448   :  { %p2553_p1 = scmp.ne.s32.totalorder %s4067_s3, %s2552_s7  ;;  %p2556_p2 = scmp.lt.u32.totalorder %s2552_s7, %s4067_s3 }
 0x44a   :  { %p2558_p3 = pnand %p2556_p2, %p2553_p1 }
 0x44c   :  { %2561 = shalt.err (!%p2558_p3)
}
 0x44d   :  { %2176 = dma.vmem_to_hbm [thread:$0]  %s2171_s29, 4096, %s4067_s3, [#allocation4], %s2594_s27, %s2594_s27, %s2595_s28   ;;  %v4235_v24 = vld [vmem:[#allocation17_spill] sm:$0xff]  ;;  %v4236_v46 = vld [vmem:[#allocation23_spill] sm:$0xff] }
 0x44e   :  { %v623_v61 = vadd.f32 %v4235_v24, %v3968_v4  ;;  %v641_v5 = vadd.f32 %v4236_v46, %v3968_v4  ;;  %v4237_v21 = vld [vmem:[#allocation21_spill] sm:$0xff]  ;;  %v4238_v11 = vld [vmem:[#allocation27_spill] sm:$0xff]  ;;  %s2601_s3 = smov [#allocation9]  }
 0x44f   :  { %v635_v52 = vadd.f32 %v4237_v21, %v3968_v4  ;;  %v653_v0 = vadd.f32 %v4238_v11, %v3968_v4  ;;  %v4239_v62 = vld [vmem:[#allocation25_spill] sm:$0xff]  ;;  %v4240_v34 = vld [vmem:[#allocation31_spill] sm:$0xff]  ;;  %s2182_s13 = sshll.u32 %s2601_s3, 4  ;;  %s2183_s13 = int_to_ptr.vmem [resolvable:$true] %s2182_s13 }
 0x450   :  { %v647_v58 = vadd.f32 %v4239_v62, %v3968_v4  ;;  %v665_v40 = vadd.f32 %v4240_v34, %v3968_v4  ;;  %v4241_v2 = vld [vmem:[#allocation29_spill] sm:$0xff]  ;;  %v4242_v60 = vld [vmem:[#allocation35_spill] sm:$0xff]  ;;  %s2562_s14 = scalar_lea.vmem %s2183_s13, 4096  ;;  %p2567_p5 = scmp.lt.s32.totalorder %s2183_s13, %s2183_s13 }
 0x451   :  { %v659_v10 = vadd.f32 %v4241_v2, %v3968_v4  ;;  %v677_v14 = vadd.f32 %v4242_v60, %v3968_v4  ;;  %v4243_v13 = vld [vmem:[#allocation33_spill] sm:$0xff]  ;;  %v4244_v51 = vld [vmem:[#allocation39_spill] sm:$0xff]  ;;  %p2563_p4 = scmp.ne.s32.totalorder %s2183_s13, %s2562_s14  ;;  %p2568_p6 = scmp.lt.s32.totalorder %s2562_s14, %s2562_s14 }
 0x452   :  { %v671_v57 = vadd.f32 %v4243_v13, %v3968_v4  ;;  %v689_v7 = vadd.f32 %v4244_v51, %v3968_v4  ;;  %v4245_v31 = vld [vmem:[#allocation37_spill] sm:$0xff]  ;;  %v4246_v25 = vld [vmem:[#allocation43_spill] sm:$0xff] }
 0x453   :  { %v683_v22 = vadd.f32 %v4245_v31, %v3968_v4  ;;  %v701_v23 = vadd.f32 %v4246_v25, %v3968_v4  ;;  %v4247_v47 = vld [vmem:[#allocation41_spill] sm:$0xff]  ;;  %p2569_p7 = por %p2568_p6, %p2567_p5 }
 0x454   :  { %v695_v49 = vadd.f32 %v4247_v47, %v3968_v4 }
 0x455   :  { %p2570_p8 = pnand %p2569_p7, %p2563_p4 }
 0x49f   :  { %v2309_v32 = vpop.f32.mrb[64].mxu0 }
 0x4a0   :  { %v1973_v41 = vadd.f32 %v2309_v32, %v629_v63  ;;  %v1813_v55 = vpop.f32.mrb[65].mxu0 }
 0x4a1   :  { %v1972_v56 = vadd.f32 %v1813_v55, %v623_v61 }
 0x4a2   :  { %v2005_v38 = vmax.f32 %v1973_v41, 0.0 }
 0x4a3   :  { %v2004_v3 = vmax.f32 %v1972_v56, 0.0  ;;  %v4248_v56 = vld [vmem:[#allocation47_spill] sm:$0xff] }
 0x4a4   :  { %2037 = vst [vmem:[#allocation9 + $0x8] sm:$0xff] %v2005_v38  ;;  %v713_v38 = vadd.f32 %v4248_v56, %v3968_v4 }
 0x4a5   :  { %2036 = vst [vmem:[#allocation9] sm:$0xff] %v2004_v3  ;;  %v4249_v3 = vld [vmem:[#allocation45_spill] sm:$0xff] }
 0x4a6   :  { %v707_v46 = vadd.f32 %v4249_v3, %v3968_v4 }
 0x4a7   :  { %v2312_v45 = vpop.f32.mrb[66].mxu0 }
 0x4a8   :  { %v1975_v54 = vadd.f32 %v2312_v45, %v641_v5  ;;  %v1823_v48 = vpop.f32.mrb[67].mxu0 }
 0x4a9   :  { %v1974_v9 = vadd.f32 %v1823_v48, %v635_v52 }
 0x4aa   :  { %v2007_v43 = vmax.f32 %v1975_v54, 0.0 }
 0x4ab   :  { %v2006_v17 = vmax.f32 %v1974_v9, 0.0  ;;  %v4250_v9 = vld [vmem:[#allocation51_spill] sm:$0xff] }
 0x4ac   :  { %2039 = vst [vmem:[#allocation9 + $0x18] sm:$0xff] %v2007_v43  ;;  %v725_v43 = vadd.f32 %v4250_v9, %v3968_v4 }
 0x4ad   :  { %2038 = vst [vmem:[#allocation9 + $0x10] sm:$0xff] %v2006_v17  ;;  %v4251_v17 = vld [vmem:[#allocation49_spill] sm:$0xff] }
 0x4ae   :  { %v719_v11 = vadd.f32 %v4251_v17, %v3968_v4 }
 0x4af   :  { %v2315_v15 = vpop.f32.mrb[68].mxu0 }
 0x4b0   :  { %v1977_v26 = vadd.f32 %v2315_v15, %v653_v0  ;;  %v1833_v12 = vpop.f32.mrb[69].mxu0 }
 0x4b1   :  { %v1976_v6 = vadd.f32 %v1833_v12, %v647_v58 }
 0x4b2   :  { %v2009_v53 = vmax.f32 %v1977_v26, 0.0 }
 0x4b3   :  { %v2008_v42 = vmax.f32 %v1976_v6, 0.0  ;;  %v4252_v6 = vld [vmem:[#allocation55_spill] sm:$0xff] }
 0x4b4   :  { %2041 = vst [vmem:[#allocation9 + $0x28] sm:$0xff] %v2009_v53  ;;  %v737_v53 = vadd.f32 %v4252_v6, %v3968_v4 }
 0x4b5   :  { %2040 = vst [vmem:[#allocation9 + $0x20] sm:$0xff] %v2008_v42  ;;  %v4253_v42 = vld [vmem:[#allocation53_spill] sm:$0xff] }
 0x4b6   :  { %v731_v34 = vadd.f32 %v4253_v42, %v3968_v4 }
 0x4b7   :  { %v2318_v18 = vpop.f32.mrb[70].mxu0 }
 0x4b8   :  { %v1979_v8 = vadd.f32 %v2318_v18, %v665_v40  ;;  %v1843_v16 = vpop.f32.mrb[71].mxu0 }
 0x4b9   :  { %v1978_v1 = vadd.f32 %v1843_v16, %v659_v10 }
 0x4ba   :  { %v2011_v44 = vmax.f32 %v1979_v8, 0.0 }
 0x4bb   :  { %v2010_v19 = vmax.f32 %v1978_v1, 0.0  ;;  %v4254_v1 = vld [vmem:[#allocation59_spill] sm:$0xff] }
 0x4bc   :  { %2043 = vst [vmem:[#allocation9 + $0x38] sm:$0xff] %v2011_v44  ;;  %v749_v44 = vadd.f32 %v4254_v1, %v3968_v4 }
 0x4bd   :  { %2042 = vst [vmem:[#allocation9 + $0x30] sm:$0xff] %v2010_v19  ;;  %v4255_v19 = vld [vmem:[#allocation57_spill] sm:$0xff] }
 0x4be   :  { %v743_v60 = vadd.f32 %v4255_v19, %v3968_v4 }
 0x4bf   :  { %v2321_v37 = vpop.f32.mrb[72].mxu0 }
 0x4c0   :  { %v1981_v35 = vadd.f32 %v2321_v37, %v677_v14  ;;  %v1853_v39 = vpop.f32.mrb[73].mxu0 }
 0x4c1   :  { %v1980_v20 = vadd.f32 %v1853_v39, %v671_v57 }
 0x4c2   :  { %v2013_v59 = vmax.f32 %v1981_v35, 0.0 }
 0x4c3   :  { %v2012_v50 = vmax.f32 %v1980_v20, 0.0  ;;  %v4256_v20 = vld [vmem:[#allocation63_spill] sm:$0xff] }
 0x4c4   :  { %2045 = vst [vmem:[#allocation9 + $0x48] sm:$0xff] %v2013_v59  ;;  %v761_v59 = vadd.f32 %v4256_v20, %v3968_v4 }
 0x4c5   :  { %2044 = vst [vmem:[#allocation9 + $0x40] sm:$0xff] %v2012_v50  ;;  %v4257_v50 = vld [vmem:[#allocation61_spill] sm:$0xff] }
 0x4c6   :  { %v755_v51 = vadd.f32 %v4257_v50, %v3968_v4 }
 0x4c7   :  { %v2324_v33 = vpop.f32.mrb[74].mxu0 }
 0x4c8   :  { %v1983_v29 = vadd.f32 %v2324_v33, %v689_v7  ;;  %v1863_v28 = vpop.f32.mrb[75].mxu0 }
 0x4c9   :  { %v1982_v30 = vadd.f32 %v1863_v28, %v683_v22 }
 0x4ca   :  { %v2015_v27 = vmax.f32 %v1983_v29, 0.0 }
 0x4cb   :  { %v2014_v36 = vmax.f32 %v1982_v30, 0.0  ;;  %v4258_v30 = vld [vmem:[#allocation67_spill] sm:$0xff] }
 0x4cc   :  { %2047 = vst [vmem:[#allocation9 + $0x58] sm:$0xff] %v2015_v27  ;;  %v773_v27 = vadd.f32 %v4258_v30, %v3968_v4 }
 0x4cd   :  { %2046 = vst [vmem:[#allocation9 + $0x50] sm:$0xff] %v2014_v36  ;;  %v4259_v36 = vld [vmem:[#allocation65_spill] sm:$0xff] }
 0x4ce   :  { %v767_v25 = vadd.f32 %v4259_v36, %v3968_v4 }
 0x4cf   :  { %v2327_v63 = vpop.f32.mrb[76].mxu0 }
 0x4d0   :  { %v1985_v24 = vadd.f32 %v2327_v63, %v701_v23  ;;  %v1873_v61 = vpop.f32.mrb[77].mxu0 }
 0x4d1   :  { %v1984_v32 = vadd.f32 %v1873_v61, %v695_v49 }
 0x4d2   :  { %v2017_v41 = vmax.f32 %v1985_v24, 0.0 }
 0x4d3   :  { %v2016_v55 = vmax.f32 %v1984_v32, 0.0  ;;  %v4260_v32 = vld [vmem:[#allocation71_spill] sm:$0xff] }
 0x4d4   :  { %2049 = vst [vmem:[#allocation9 + $0x68] sm:$0xff] %v2017_v41  ;;  %v785_v41 = vadd.f32 %v4260_v32, %v3968_v4 }
 0x4d5   :  { %2048 = vst [vmem:[#allocation9 + $0x60] sm:$0xff] %v2016_v55  ;;  %v4261_v55 = vld [vmem:[#allocation69_spill] sm:$0xff] }
 0x4d6   :  { %v779_v56 = vadd.f32 %v4261_v55, %v3968_v4 }
 0x4d7   :  { %v2330_v5 = vpop.f32.mrb[78].mxu0 }
 0x4d8   :  { %v1987_v21 = vadd.f32 %v2330_v5, %v713_v38  ;;  %v1883_v52 = vpop.f32.mrb[79].mxu0 }
 0x4d9   :  { %v1986_v45 = vadd.f32 %v1883_v52, %v707_v46 }
 0x4da   :  { %v2019_v54 = vmax.f32 %v1987_v21, 0.0 }
 0x4db   :  { %v2018_v48 = vmax.f32 %v1986_v45, 0.0  ;;  %v4262_v45 = vld [vmem:[#allocation75_spill] sm:$0xff] }
 0x4dc   :  { %2051 = vst [vmem:[#allocation9 + $0x78] sm:$0xff] %v2019_v54  ;;  %v797_v54 = vadd.f32 %v4262_v45, %v3968_v4 }
 0x4dd   :  { %2050 = vst [vmem:[#allocation9 + $0x70] sm:$0xff] %v2018_v48  ;;  %v4263_v48 = vld [vmem:[#allocation73_spill] sm:$0xff] }
 0x4de   :  { %v791_v9 = vadd.f32 %v4263_v48, %v3968_v4 }
 0x4df   :  { %v2333_v0 = vpop.f32.mrb[80].mxu0 }
 0x4e0   :  { %v1989_v62 = vadd.f32 %v2333_v0, %v725_v43  ;;  %v1893_v58 = vpop.f32.mrb[81].mxu0 }
 0x4e1   :  { %v1988_v15 = vadd.f32 %v1893_v58, %v719_v11 }
 0x4e2   :  { %v2021_v26 = vmax.f32 %v1989_v62, 0.0 }
 0x4e3   :  { %v2020_v12 = vmax.f32 %v1988_v15, 0.0  ;;  %v4264_v15 = vld [vmem:[#allocation79_spill] sm:$0xff] }
 0x4e4   :  { %2053 = vst [vmem:[#allocation9 + $0x88] sm:$0xff] %v2021_v26  ;;  %v809_v26 = vadd.f32 %v4264_v15, %v3968_v4 }
 0x4e5   :  { %2052 = vst [vmem:[#allocation9 + $0x80] sm:$0xff] %v2020_v12  ;;  %v4265_v12 = vld [vmem:[#allocation77_spill] sm:$0xff] }
 0x4e6   :  { %v803_v6 = vadd.f32 %v4265_v12, %v3968_v4 }
 0x4e7   :  { %v2336_v40 = vpop.f32.mrb[82].mxu0 }
 0x4e8   :  { %v1991_v2 = vadd.f32 %v2336_v40, %v737_v53  ;;  %v1903_v10 = vpop.f32.mrb[83].mxu0 }
 0x4e9   :  { %v1990_v18 = vadd.f32 %v1903_v10, %v731_v34 }
 0x4ea   :  { %v2023_v8 = vmax.f32 %v1991_v2, 0.0 }
 0x4eb   :  { %v2022_v16 = vmax.f32 %v1990_v18, 0.0 }
 0x4ec   :  { %2055 = vst [vmem:[#allocation9 + $0x98] sm:$0xff] %v2023_v8 }
 0x4ed   :  { %2054 = vst [vmem:[#allocation9 + $0x90] sm:$0xff] %v2022_v16 }
 0x4ef   :  { %v2339_v14 = vpop.f32.mrb[84].mxu0 }
 0x4f0   :  { %v1993_v13 = vadd.f32 %v2339_v14, %v749_v44  ;;  %v1913_v57 = vpop.f32.mrb[85].mxu0 }
 0x4f1   :  { %v1992_v37 = vadd.f32 %v1913_v57, %v743_v60 }
 0x4f2   :  { %v2025_v35 = vmax.f32 %v1993_v13, 0.0 }
 0x4f3   :  { %v2024_v39 = vmax.f32 %v1992_v37, 0.0 }
 0x4f4   :  { %2057 = vst [vmem:[#allocation9 + $0xa8] sm:$0xff] %v2025_v35 }
 0x4f5   :  { %2056 = vst [vmem:[#allocation9 + $0xa0] sm:$0xff] %v2024_v39 }
 0x4f7   :  { %v2342_v7 = vpop.f32.mrb[86].mxu0 }
 0x4f8   :  { %v1995_v31 = vadd.f32 %v2342_v7, %v761_v59  ;;  %v1923_v22 = vpop.f32.mrb[87].mxu0 }
 0x4f9   :  { %v1994_v33 = vadd.f32 %v1923_v22, %v755_v51 }
 0x4fa   :  { %v2027_v29 = vmax.f32 %v1995_v31, 0.0 }
 0x4fb   :  { %v2026_v28 = vmax.f32 %v1994_v33, 0.0 }
 0x4fc   :  { %2059 = vst [vmem:[#allocation9 + $0xb8] sm:$0xff] %v2027_v29 }
 0x4fd   :  { %2058 = vst [vmem:[#allocation9 + $0xb0] sm:$0xff] %v2026_v28 }
 0x4ff   :  { %v2345_v23 = vpop.f32.mrb[64].mxu1 }
 0x500   :  { %v1997_v47 = vadd.f32 %v2345_v23, %v773_v27  ;;  %v1933_v49 = vpop.f32.mrb[65].mxu1 }
 0x501   :  { %v1996_v63 = vadd.f32 %v1933_v49, %v767_v25 }
 0x502   :  { %v2029_v24 = vmax.f32 %v1997_v47, 0.0 }
 0x503   :  { %v2028_v61 = vmax.f32 %v1996_v63, 0.0 }
 0x504   :  { %2061 = vst [vmem:[#allocation9 + $0xc8] sm:$0xff] %v2029_v24 }
 0x505   :  { %2060 = vst [vmem:[#allocation9 + $0xc0] sm:$0xff] %v2028_v61 }
 0x507   :  { %v2348_v38 = vpop.f32.mrb[66].mxu1 }
 0x508   :  { %v1999_v3 = vadd.f32 %v2348_v38, %v785_v41  ;;  %v1943_v46 = vpop.f32.mrb[67].mxu1 }
 0x509   :  { %v1998_v5 = vadd.f32 %v1943_v46, %v779_v56 }
 0x50a   :  { %v2031_v21 = vmax.f32 %v1999_v3, 0.0 }
 0x50b   :  { %v2030_v52 = vmax.f32 %v1998_v5, 0.0 }
 0x50c   :  { %2063 = vst [vmem:[#allocation9 + $0xd8] sm:$0xff] %v2031_v21 }
 0x50d   :  { %2062 = vst [vmem:[#allocation9 + $0xd0] sm:$0xff] %v2030_v52 }
 0x50f   :  { %v2351_v43 = vpop.f32.mrb[68].mxu1 }
 0x510   :  { %v2001_v17 = vadd.f32 %v2351_v43, %v797_v54  ;;  %v1953_v11 = vpop.f32.mrb[69].mxu1 }
 0x511   :  { %v2000_v0 = vadd.f32 %v1953_v11, %v791_v9 }
 0x512   :  { %v2033_v62 = vmax.f32 %v2001_v17, 0.0 }
 0x513   :  { %v2032_v58 = vmax.f32 %v2000_v0, 0.0 }
 0x514   :  { %2065 = vst [vmem:[#allocation9 + $0xe8] sm:$0xff] %v2033_v62 }
 0x515   :  { %2064 = vst [vmem:[#allocation9 + $0xe0] sm:$0xff] %v2032_v58 }
 0x517   :  { %v2354_v53 = vpop.f32.mrb[70].mxu1 }
 0x518   :  { %v2003_v42 = vadd.f32 %v2354_v53, %v809_v26  ;;  %v1963_v34 = vpop.f32.mrb[71].mxu1 }
 0x519   :  { %v2002_v40 = vadd.f32 %v1963_v34, %v803_v6 }
 0x51a   :  { %v2035_v2 = vmax.f32 %v2003_v42, 0.0 }
 0x51b   :  { %v2034_v10 = vmax.f32 %v2002_v40, 0.0 }
 0x51c   :  { %2067 = vst [vmem:[#allocation9 + $0xf8] sm:$0xff] %v2035_v2 }
 0x51d   :  { %2066 = vst [vmem:[#allocation9 + $0xf0] sm:$0xff] %v2034_v10 }
 0x51e   :  { %2573 = shalt.err (!%p2570_p8)
}
 0x51f   :  { %s2574_s17 = scalar_lea.hbm %s4068_s4, 4096 }
 0x520   :  { %p2575_p9 = scmp.ne.s32.totalorder %s4068_s4, %s2574_s17  ;;  %p2578_p10 = scmp.lt.u32.totalorder %s2574_s17, %s4068_s4 }
 0x522   :  { %p2580_p11 = pnand %p2578_p10, %p2575_p9 }
 0x524   :  { %2583 = shalt.err (!%p2580_p11)
}
 0x525   :  { %2188 = dma.vmem_to_hbm [thread:$0]  %s2183_s13, 4096, %s4068_s4, [#allocation10], %s2594_s27, %s2594_s27, %s2595_s28  }
 0x526   :  { %2588 = dma.done.wait [#allocation4], 4096  }
 0x527   :  { %2589 = vsyncadd [#allocation4], 4294963200 }
 0x528   :  { %2590 = dma.done.wait [#allocation10], 4096  }
 0x529   :  { %2591 = vsyncadd [#allocation10], 4294963200 }
 0x52a   :  { %2195 = vsyncpa [#allocation3], 1 }
 0x52b   :  { %2196 = vsyncpa [#allocation6], 1 }
 0x52c   :  { %2197 = vsyncpa [#allocation4], 1 }
 0x52d   :  { %2198 = vsyncpa [#allocation10], 1 }

</bundles_post_ra>
